<compile_context>
chip_gen: v6e
topology: v6e:2x2x1
jax: 0.10.0
libtpu: 0.0.40
codegen_flags: <defaults>
</compile_context>

<pallas_src>
import functools

import jax
import jax.numpy as jnp
from jax.experimental import pallas as pl
from jax.experimental.pallas import tpu as pltpu

# ----------------------------- KAN static config -----------------------------
GRID_SIZE = 5
SPLINE_ORDER = 3
GRID_RANGE = (-1.0, 1.0)
NUM_BASES = GRID_SIZE + SPLINE_ORDER            # 8 cubic B-spline bases per input
NUM_FEATS = NUM_BASES + 1                       # + SiLU(x) base-path feature
_H = (GRID_RANGE[1] - GRID_RANGE[0]) / GRID_SIZE
INV_H = 1.0 / _H                                # reciprocal constant (no divides)
KNOT0 = GRID_RANGE[0] - SPLINE_ORDER * _H       # left-most extended knot
_N0 = GRID_SIZE + 2 * SPLINE_ORDER              # 11 order-0 bases
# knot values for the pure-JAX reference path only
GRID_VALS = tuple(GRID_RANGE[0] + i * _H
                  for i in range(-SPLINE_ORDER, GRID_SIZE + SPLINE_ORDER + 1))


# --------------------------- shared in-kernel math ----------------------------
def _silu(x):
    return x * jax.nn.sigmoid(x)


def _leaky(x):
    return jnp.where(x >= 0, x, jnp.float32(0.1) * x)


def _spline_bases(x):
    """All NUM_BASES cubic B-spline basis values of x (list of arrays, x's shape).

    Uniform-knot Cox-de Boor: with s = (x - knot0)/h and a_m = s - m,
        B_j^k = (a_j * B_j^{k-1} - a_{j+k+1} * B_{j+1}^{k-1}) * (1/k)
    Only multiplies by compile-time reciprocal constants; a_m terms are recomputed
    from s (one VPU sub) instead of kept live, cutting VALU/EUP work and vreg
    pressure vs. the generic recursion with per-knot divisions.
    """
    s = (x - jnp.float32(KNOT0)) * jnp.float32(INV_H)
    bases = [jnp.where((s >= jnp.float32(j)) & (s < jnp.float32(j + 1)),
                       jnp.float32(1.0), jnp.float32(0.0))
             for j in range(_N0)]
    for k in range(1, SPLINE_ORDER + 1):
        inv_k = jnp.float32(1.0 / k)
        nxt = []
        for j in range(_N0 - k):
            v = (s - jnp.float32(j)) * bases[j] \
                - (s - jnp.float32(j + k + 1)) * bases[j + 1]
            nxt.append(v if k == 1 else v * inv_k)
        bases = nxt
    return bases                                # length NUM_BASES


def _write_feats(feat_ref, x, width):
    """Stream [SiLU(x) | B_0(x) | ... | B_7(x)] into the lane-dense VMEM slab."""
    feat_ref[:, 0:width] = _silu(x)
    for j, bj in enumerate(_spline_bases(x)):
        feat_ref[:, (1 + j) * width:(2 + j) * width] = bj


# ------------------------ single fused module kernel --------------------------
def _kan_embedding_kernel(x_ref, w1_ref, w2_ref, w3_ref, w4_ref,
                          xe_ref, xcomb_ref, xde_ref, xdec_ref,
                          feat1_ref, feat4_ref, *, emb_num, emb_dim, hot):
    x = x_ref[...]                                          # (TN, emb_num) f32
    tn = x.shape[0]
    g = tn // hot                                           # batches in this tile

    # ---- layer 1: w_node_embedding (emb_num -> emb_dim), leaky fused ----------
    _write_feats(feat1_ref, x, emb_num)
    xe = jnp.dot(feat1_ref[...].astype(jnp.bfloat16), w1_ref[...],
                 preferred_element_type=jnp.float32)        # (TN, emb_dim)
    xe = _leaky(xe)
    xe_ref[...] = xe

    # ---- layer 2: embedding_combine_coef (hot -> 1), permute folded ----------
    # Per (b, d) it is a weighted reduction over the hot axis -> pure VPU + one
    # sublane reduce (no K=hot, O=1 MXU matmul, no XLA transpose).
    xe3 = xe.reshape(g, hot, emb_dim)                       # layout-preserving (hot==8)
    w2 = w2_ref[...]                                        # (NUM_FEATS, hot, 1)
    feats = [_silu(xe3)] + _spline_bases(xe3)               # NUM_FEATS x (g, hot, E)
    acc = feats[0] * w2[0][None]
    for j in range(1, NUM_FEATS):
        acc = acc + feats[j] * w2[j][None]
    c = jnp.sum(acc, axis=1, keepdims=True)                 # (g, 1, E)
    xcomb_ref[...] = c                                      # == x_combine.permute(0,2,1)

    # ---- layer 3: decoder_divide_coef (1 -> hot), permute + leaky fused -------
    w3 = w3_ref[...]                                        # (NUM_FEATS, hot, 1)
    feats_c = [_silu(c)] + _spline_bases(c)                 # NUM_FEATS x (g, 1, E)
    out = feats_c[0] * w3[0][None]                          # broadcast -> (g, hot, E)
    for j in range(1, NUM_FEATS):
        out = out + feats_c[j] * w3[j][None]
    xde = _leaky(out).reshape(tn, emb_dim)                  # (TN, emb_dim)
    xde_ref[...] = xde

    # ---- layer 4: w_node_decoder (emb_dim -> emb_num) -------------------------
    _write_feats(feat4_ref, xde, emb_dim)
    xdec_ref[...] = jnp.dot(feat4_ref[...].astype(jnp.bfloat16), w4_ref[...],
                            preferred_element_type=jnp.float32)   # (TN, emb_num)


# ---------------------- hoisted (one-time) weight packing ---------------------
def prepare_kan_matmul_weight(p):
    """(O,I) base, (O,I,8) spline, (O,I) scaler -> (NUM_FEATS*I, O) bf16 weight.

    Row layout matches the kernel's [SiLU | B_0 | ... | B_7] feature slab."""
    base = p["base_weight"]                                        # (O, I)
    scaled = p["spline_weight"] * p["spline_scaler"][..., None]    # (O, I, 8)
    w_spline = jnp.transpose(scaled, (2, 1, 0))                    # (8, I, O)
    w_cat = jnp.concatenate([base.T[None], w_spline], axis=0)      # (9, I, O)
    return w_cat.reshape(-1, base.shape[0]).astype(jnp.bfloat16)   # (9*I, O)


def prepare_kan_vector_weight(p, axis):
    """Pack a K=1 / O=1 KANLinear into (NUM_FEATS, hot, 1) f32 for the VPU path."""
    base = p["base_weight"]
    scaled = p["spline_weight"] * p["spline_scaler"][..., None]
    if axis == "in":      # KANLinear(hot -> 1): weights indexed by input feature h
        b_vec, s_mat = base[0], scaled[0]           # (hot,), (hot, 8)
    else:                 # KANLinear(1 -> hot): weights indexed by output feature h
        b_vec, s_mat = base[:, 0], scaled[:, 0, :]  # (hot,), (hot, 8)
    w = jnp.concatenate([b_vec[None, :], s_mat.T], axis=0)         # (9, hot)
    return w[:, :, None].astype(jnp.float32)                       # (9, hot, 1)


def prepare_params(params):
    return dict(
        w1=prepare_kan_matmul_weight(params["w_node_embedding"]),
        w2=prepare_kan_vector_weight(params["embedding_combine_coef"], "in"),
        w3=prepare_kan_vector_weight(params["decoder_divide_coef"], "out"),
        w4=prepare_kan_matmul_weight(params["w_node_decoder"]),
    )


# ------------------------------- module forward -------------------------------
def kan_embedding_forward(prepared, multi_hot_feature, *, batch_tile=64):
    b, hot, emb_num = multi_hot_feature.shape
    emb_dim = prepared["w1"].shape[1]
    k1 = NUM_FEATS * emb_num
    k4 = NUM_FEATS * emb_dim

    # batch tile: whole groups of `hot` rows; when tiling (grid > 1) the row tile
    # must be 8-aligned and divide the batch.  Fall back to the full batch
    # (block == full array is always legal) if no such tile exists.
    tb = min(batch_tile, b)
    if tb < b and (b % tb != 0 or (tb * hot) % 8 != 0):
        cand = [t for t in range(tb, 0, -1) if b % t == 0 and (t * hot) % 8 == 0]
        tb = cand[0] if cand else b
    grid = (pl.cdiv(b, tb),)
    tn = tb * hot
    n = b * hot

    x2d = multi_hot_feature.reshape(n, emb_num).astype(jnp.float32)

    cost = pl.CostEstimate(
        flops=int(2 * n * (k1 * emb_dim + k4 * emb_num)
                  + 400 * n * (emb_num + emb_dim)),
        transcendentals=int(n * (emb_num + 2 * emb_dim) + b * emb_dim),
        bytes_accessed=int(4 * n * (2 * emb_num + 3 * emb_dim)
                           + 2 * (k1 * emb_dim + k4 * emb_num)),
    )
    kernel = functools.partial(_kan_embedding_kernel,
                               emb_num=emb_num, emb_dim=emb_dim, hot=hot)

    xe2d, xcomb, xde2d, xdec2d = pl.pallas_call(
        kernel,
        out_shape=(jax.ShapeDtypeStruct((n, emb_dim), jnp.float32),   # x_embedding
                   jax.ShapeDtypeStruct((b, 1, emb_dim), jnp.float32),  # x_combine^T
                   jax.ShapeDtypeStruct((n, emb_dim), jnp.float32),   # x_de_embedding
                   jax.ShapeDtypeStruct((n, emb_num), jnp.float32)),  # x_decoder
        grid=grid,
        in_specs=[pl.BlockSpec((tn, emb_num), lambda t: (t, 0)),        # row-tiled
                  pl.BlockSpec((k1, emb_dim), lambda t: (0, 0)),        # resident weights
                  pl.BlockSpec((NUM_FEATS, hot, 1), lambda t: (0, 0, 0)),
                  pl.BlockSpec((NUM_FEATS, hot, 1), lambda t: (0, 0, 0)),
                  pl.BlockSpec((k4, emb_num), lambda t: (0, 0))],
        out_specs=(pl.BlockSpec((tn, emb_dim), lambda t: (t, 0)),
                   pl.BlockSpec((tb, 1, emb_dim), lambda t: (t, 0, 0)),
                   pl.BlockSpec((tn, emb_dim), lambda t: (t, 0)),
                   pl.BlockSpec((tn, emb_num), lambda t: (t, 0))),
        scratch_shapes=[pltpu.VMEM((tn, k1), jnp.float32),   # layer-1 feature slab
                        pltpu.VMEM((tn, k4), jnp.float32)],  # layer-4 feature slab
        compiler_params=pltpu.CompilerParams(
            dimension_semantics=("parallel",),     # megacore sharding on v7x
            vmem_limit_bytes=32 * 1024 * 1024),
        cost_estimate=cost,
    )(x2d, prepared["w1"], prepared["w2"], prepared["w3"], prepared["w4"])

    return (xdec2d.reshape(b, hot, emb_num),     # x_decoder
            xe2d.reshape(b, hot, emb_dim),       # x_embedding (post-leaky)
            xde2d.reshape(b, hot, emb_dim),      # x_de_embedding (post-leaky)
            xcomb)                               # x_combine.permute(0, 2, 1)


# ------------------------- pure-JAX reference (check) --------------------------
def kan_linear_ref(x2d, base_weight, spline_weight, spline_scaler, *, apply_leaky=False):
    grid = jnp.asarray(GRID_VALS, jnp.float32)
    xe = x2d[..., None]
    bases = ((xe >= grid[:-1]) & (xe < grid[1:])).astype(jnp.float32)
    for k in range(1, SPLINE_ORDER + 1):
        bases = ((xe - grid[: -(k + 1)]) / (grid[k:-1] - grid[: -(k + 1)]) * bases[..., :-1]
                 + (grid[k + 1:] - xe) / (grid[k + 1:] - grid[1:-k]) * bases[..., 1:])
    silu = x2d * jax.nn.sigmoid(x2d)
    base_out = silu @ base_weight.T
    scaled = spline_weight * spline_scaler[..., None]
    spline_out = bases.reshape(x2d.shape[0], -1) @ scaled.reshape(base_weight.shape[0], -1).T
    out = base_out + spline_out
    if apply_leaky:
        out = jnp.where(out >= 0, out, 0.1 * out)
    return out


def kan_embedding_forward_ref(params, multi_hot_feature):
    b, hot_num, emb_num = multi_hot_feature.shape
    p = params["w_node_embedding"]
    emb_dim = p["base_weight"].shape[0]
    xe = kan_linear_ref(multi_hot_feature.reshape(-1, emb_num),
                        p["base_weight"], p["spline_weight"], p["spline_scaler"],
                        apply_leaky=True)
    x_embedding = xe.reshape(b, hot_num, emb_dim)

    p = params["embedding_combine_coef"]
    xc = kan_linear_ref(jnp.transpose(x_embedding, (0, 2, 1)).reshape(-1, hot_num),
                        p["base_weight"], p["spline_weight"], p["spline_scaler"])
    x_combine = xc.reshape(b, emb_dim, 1)

    p = params["decoder_divide_coef"]
    xd = kan_linear_ref(x_combine.reshape(-1, 1),
                        p["base_weight"], p["spline_weight"], p["spline_scaler"],
                        apply_leaky=True)
    x_de_embedding = jnp.transpose(xd.reshape(b, emb_dim, hot_num), (0, 2, 1))

    p = params["w_node_decoder"]
    xdec = kan_linear_ref(x_de_embedding.reshape(-1, emb_dim),
                          p["base_weight"], p["spline_weight"], p["spline_scaler"])
    x_decoder = xdec.reshape(b, hot_num, emb_num)
    return x_decoder, x_embedding, x_de_embedding, jnp.transpose(x_combine, (0, 2, 1))


# ------------------------------ deterministic init -----------------------------
def init_params(key, embedding_num, embedding_dim, hot_num):
    def kan_params(k, in_f, out_f, eye_base=False):
        k1, k2, k3 = jax.random.split(k, 3)
        if eye_base:  # torch.nn.init.eye_(base_weight)
            base = jnp.eye(out_f, in_f, dtype=jnp.float32)
        else:
            base = 0.1 * jax.random.normal(k1, (out_f, in_f), jnp.float32)
        spline = 0.1 * jax.random.normal(k2, (out_f, in_f, NUM_BASES), jnp.float32)
        scaler = 1.0 + 0.1 * jax.random.normal(k3, (out_f, in_f), jnp.float32)
        return dict(base_weight=base, spline_weight=spline, spline_scaler=scaler)

    ks = jax.random.split(key, 4)
    return dict(
        w_node_embedding=kan_params(ks[0], embedding_num, embedding_dim, eye_base=True),
        embedding_combine_coef=kan_params(ks[1], hot_num, 1),
        decoder_divide_coef=kan_params(ks[2], 1, hot_num),
        w_node_decoder=kan_params(ks[3], embedding_dim, embedding_num),
    )


if __name__ == "__main__":
    batch, hot_num, embedding_num, embedding_dim = 2, 8, 16, 32

    key = jax.random.PRNGKey(0)
    k_in, k_par = jax.random.split(key)
    multi_hot_feature = jax.random.bernoulli(
        k_in, 0.3, (batch, hot_num, embedding_num)).astype(jnp.float32)
    params = init_params(k_par, embedding_num, embedding_dim, hot_num)

    # weight packing hoisted: done ONCE, outside the jitted forward
    prepared = jax.block_until_ready(prepare_params(params))

    fwd = jax.jit(kan_embedding_forward)
    outs = jax.block_until_ready(fwd(prepared, multi_hot_feature))
    refs = kan_embedding_forward_ref(params, multi_hot_feature)

    expected_shapes = [
        (batch, hot_num, embedding_num),   # x_decoder
        (batch, hot_num, embedding_dim),   # x_embedding
        (batch, hot_num, embedding_dim),   # x_de_embedding
        (batch, 1, embedding_dim),         # x_combine.permute(0,2,1)
    ]
    # tolerance loosened for bf16 MXU operands (f32 accumulation)
    for o, r, s in zip(outs, refs, expected_shapes):
        assert o.shape == s, (o.shape, s)
        assert jnp.allclose(o, r, atol=3e-2, rtol=3e-2), float(jnp.max(jnp.abs(o - r)))

    print("KERNEL_OK")
</pallas_src>

<mosaic_0001>
module attributes {stable_mosaic.version = 11 : i64} {
  func.func @_kan_embedding_kernel(%arg0: i32, %arg1: memref<16x16xf32, #tpu.memory_space<vmem>>, %arg2: memref<144x32xbf16, #tpu.memory_space<vmem>>, %arg3: memref<9x8x1xf32, #tpu.memory_space<vmem>>, %arg4: memref<9x8x1xf32, #tpu.memory_space<vmem>>, %arg5: memref<288x16xbf16, #tpu.memory_space<vmem>>, %arg6: memref<16x32xf32, #tpu.memory_space<vmem>>, %arg7: memref<2x1x32xf32, #tpu.memory_space<vmem>>, %arg8: memref<16x32xf32, #tpu.memory_space<vmem>>, %arg9: memref<16x16xf32, #tpu.memory_space<vmem>>, %arg10: memref<16x144xf32, #tpu.memory_space<vmem>>, %arg11: memref<16x288xf32, #tpu.memory_space<vmem>>) attributes {dimension_semantics = [#tpu.dimension_semantics<parallel>], iteration_bounds = array<i64: 1>, scalar_prefetch = 0 : i64, scratch_operands = 2 : i64, tpu.core_type = #tpu.core_type<tc>, window_params = [{transform_indices = @transform_0, window_bounds = array<i64: 16, 16>}, {pipeline_mode = #tpu.pipeline_mode<synchronous>, transform_indices = @transform_1, window_bounds = array<i64: 144, 32>}, {pipeline_mode = #tpu.pipeline_mode<synchronous>, transform_indices = @transform_2, window_bounds = array<i64: 9, 8, 1>}, {pipeline_mode = #tpu.pipeline_mode<synchronous>, transform_indices = @transform_3, window_bounds = array<i64: 9, 8, 1>}, {pipeline_mode = #tpu.pipeline_mode<synchronous>, transform_indices = @transform_4, window_bounds = array<i64: 288, 16>}, {transform_indices = @transform_5, window_bounds = array<i64: 16, 32>}, {transform_indices = @transform_6, window_bounds = array<i64: 2, 1, 32>}, {transform_indices = @transform_7, window_bounds = array<i64: 16, 32>}, {transform_indices = @transform_8, window_bounds = array<i64: 16, 16>}]} {
    %c0 = arith.constant 0 : index
    %c0_0 = arith.constant 0 : index
    %0 = vector.load %arg1[%c0, %c0_0] : memref<16x16xf32, #tpu.memory_space<vmem>>, vector<16x16xf32>
    %1 = arith.negf %0 : vector<16x16xf32>
    %2 = math.exp %1 : vector<16x16xf32>
    %cst = arith.constant 1.000000e+00 : f32
    %3 = vector.broadcast %cst : f32 to vector<16x16xf32>
    %4 = arith.addf %3, %2 : vector<16x16xf32>
    %5 = arith.divf %3, %4 : vector<16x16xf32>
    %6 = arith.mulf %0, %5 : vector<16x16xf32>
    %c0_1 = arith.constant 0 : index
    %c0_2 = arith.constant 0 : index
    %7 = vector.load %arg10[%c0_1, %c0_2] : memref<16x144xf32, #tpu.memory_space<vmem>>, vector<16x16xf32>
    tpu.vector_store %arg10[%c0_1, %c0_2], %6 {strides = array<i32>} : memref<16x144xf32, #tpu.memory_space<vmem>>, vector<16x16xf32>,
    %cst_3 = arith.constant -2.200000e+00 : f32
    %8 = vector.broadcast %cst_3 : f32 to vector<16x16xf32>
    %9 = arith.subf %0, %8 : vector<16x16xf32>
    %cst_4 = arith.constant 2.500000e+00 : f32
    %10 = vector.broadcast %cst_4 : f32 to vector<16x16xf32>
    %11 = arith.mulf %9, %10 : vector<16x16xf32>
    %cst_5 = arith.constant 0.000000e+00 : f32
    %12 = vector.broadcast %cst_5 : f32 to vector<16x16xf32>
    %13 = arith.cmpf oge, %11, %12 : vector<16x16xf32>
    %cst_6 = arith.constant 1.000000e+00 : f32
    %14 = vector.broadcast %cst_6 : f32 to vector<16x16xf32>
    %15 = arith.cmpf olt, %11, %14 : vector<16x16xf32>
    %16 = arith.andi %13, %15 : vector<16x16xi1>
    %cst_7 = arith.constant 1.000000e+00 : f32
    %cst_8 = arith.constant 0.000000e+00 : f32
    %17 = vector.broadcast %cst_7 : f32 to vector<16x16xf32>
    %18 = vector.broadcast %cst_8 : f32 to vector<16x16xf32>
    %19 = arith.select %16, %17, %18 : vector<16x16xi1>, vector<16x16xf32>
    %cst_9 = arith.constant 1.000000e+00 : f32
    %20 = vector.broadcast %cst_9 : f32 to vector<16x16xf32>
    %21 = arith.cmpf oge, %11, %20 : vector<16x16xf32>
    %cst_10 = arith.constant 2.000000e+00 : f32
    %22 = vector.broadcast %cst_10 : f32 to vector<16x16xf32>
    %23 = arith.cmpf olt, %11, %22 : vector<16x16xf32>
    %24 = arith.andi %21, %23 : vector<16x16xi1>
    %cst_11 = arith.constant 1.000000e+00 : f32
    %cst_12 = arith.constant 0.000000e+00 : f32
    %25 = vector.broadcast %cst_11 : f32 to vector<16x16xf32>
    %26 = vector.broadcast %cst_12 : f32 to vector<16x16xf32>
    %27 = arith.select %24, %25, %26 : vector<16x16xi1>, vector<16x16xf32>
    %cst_13 = arith.constant 2.000000e+00 : f32
    %28 = vector.broadcast %cst_13 : f32 to vector<16x16xf32>
    %29 = arith.cmpf oge, %11, %28 : vector<16x16xf32>
    %cst_14 = arith.constant 3.000000e+00 : f32
    %30 = vector.broadcast %cst_14 : f32 to vector<16x16xf32>
    %31 = arith.cmpf olt, %11, %30 : vector<16x16xf32>
    %32 = arith.andi %29, %31 : vector<16x16xi1>
    %cst_15 = arith.constant 1.000000e+00 : f32
    %cst_16 = arith.constant 0.000000e+00 : f32
    %33 = vector.broadcast %cst_15 : f32 to vector<16x16xf32>
    %34 = vector.broadcast %cst_16 : f32 to vector<16x16xf32>
    %35 = arith.select %32, %33, %34 : vector<16x16xi1>, vector<16x16xf32>
    %cst_17 = arith.constant 3.000000e+00 : f32
    %36 = vector.broadcast %cst_17 : f32 to vector<16x16xf32>
    %37 = arith.cmpf oge, %11, %36 : vector<16x16xf32>
    %cst_18 = arith.constant 4.000000e+00 : f32
    %38 = vector.broadcast %cst_18 : f32 to vector<16x16xf32>
    %39 = arith.cmpf olt, %11, %38 : vector<16x16xf32>
    %40 = arith.andi %37, %39 : vector<16x16xi1>
    %cst_19 = arith.constant 1.000000e+00 : f32
    %cst_20 = arith.constant 0.000000e+00 : f32
    %41 = vector.broadcast %cst_19 : f32 to vector<16x16xf32>
    %42 = vector.broadcast %cst_20 : f32 to vector<16x16xf32>
    %43 = arith.select %40, %41, %42 : vector<16x16xi1>, vector<16x16xf32>
    %cst_21 = arith.constant 4.000000e+00 : f32
    %44 = vector.broadcast %cst_21 : f32 to vector<16x16xf32>
    %45 = arith.cmpf oge, %11, %44 : vector<16x16xf32>
    %cst_22 = arith.constant 5.000000e+00 : f32
    %46 = vector.broadcast %cst_22 : f32 to vector<16x16xf32>
    %47 = arith.cmpf olt, %11, %46 : vector<16x16xf32>
    %48 = arith.andi %45, %47 : vector<16x16xi1>
    %cst_23 = arith.constant 1.000000e+00 : f32
    %cst_24 = arith.constant 0.000000e+00 : f32
    %49 = vector.broadcast %cst_23 : f32 to vector<16x16xf32>
    %50 = vector.broadcast %cst_24 : f32 to vector<16x16xf32>
    %51 = arith.select %48, %49, %50 : vector<16x16xi1>, vector<16x16xf32>
    %cst_25 = arith.constant 5.000000e+00 : f32
    %52 = vector.broadcast %cst_25 : f32 to vector<16x16xf32>
    %53 = arith.cmpf oge, %11, %52 : vector<16x16xf32>
    %cst_26 = arith.constant 6.000000e+00 : f32
    %54 = vector.broadcast %cst_26 : f32 to vector<16x16xf32>
    %55 = arith.cmpf olt, %11, %54 : vector<16x16xf32>
    %56 = arith.andi %53, %55 : vector<16x16xi1>
    %cst_27 = arith.constant 1.000000e+00 : f32
    %cst_28 = arith.constant 0.000000e+00 : f32
    %57 = vector.broadcast %cst_27 : f32 to vector<16x16xf32>
    %58 = vector.broadcast %cst_28 : f32 to vector<16x16xf32>
    %59 = arith.select %56, %57, %58 : vector<16x16xi1>, vector<16x16xf32>
    %cst_29 = arith.constant 6.000000e+00 : f32
    %60 = vector.broadcast %cst_29 : f32 to vector<16x16xf32>
    %61 = arith.cmpf oge, %11, %60 : vector<16x16xf32>
    %cst_30 = arith.constant 7.000000e+00 : f32
    %62 = vector.broadcast %cst_30 : f32 to vector<16x16xf32>
    %63 = arith.cmpf olt, %11, %62 : vector<16x16xf32>
    %64 = arith.andi %61, %63 : vector<16x16xi1>
    %cst_31 = arith.constant 1.000000e+00 : f32
    %cst_32 = arith.constant 0.000000e+00 : f32
    %65 = vector.broadcast %cst_31 : f32 to vector<16x16xf32>
    %66 = vector.broadcast %cst_32 : f32 to vector<16x16xf32>
    %67 = arith.select %64, %65, %66 : vector<16x16xi1>, vector<16x16xf32>
    %cst_33 = arith.constant 7.000000e+00 : f32
    %68 = vector.broadcast %cst_33 : f32 to vector<16x16xf32>
    %69 = arith.cmpf oge, %11, %68 : vector<16x16xf32>
    %cst_34 = arith.constant 8.000000e+00 : f32
    %70 = vector.broadcast %cst_34 : f32 to vector<16x16xf32>
    %71 = arith.cmpf olt, %11, %70 : vector<16x16xf32>
    %72 = arith.andi %69, %71 : vector<16x16xi1>
    %cst_35 = arith.constant 1.000000e+00 : f32
    %cst_36 = arith.constant 0.000000e+00 : f32
    %73 = vector.broadcast %cst_35 : f32 to vector<16x16xf32>
    %74 = vector.broadcast %cst_36 : f32 to vector<16x16xf32>
    %75 = arith.select %72, %73, %74 : vector<16x16xi1>, vector<16x16xf32>
    %cst_37 = arith.constant 8.000000e+00 : f32
    %76 = vector.broadcast %cst_37 : f32 to vector<16x16xf32>
    %77 = arith.cmpf oge, %11, %76 : vector<16x16xf32>
    %cst_38 = arith.constant 9.000000e+00 : f32
    %78 = vector.broadcast %cst_38 : f32 to vector<16x16xf32>
    %79 = arith.cmpf olt, %11, %78 : vector<16x16xf32>
    %80 = arith.andi %77, %79 : vector<16x16xi1>
    %cst_39 = arith.constant 1.000000e+00 : f32
    %cst_40 = arith.constant 0.000000e+00 : f32
    %81 = vector.broadcast %cst_39 : f32 to vector<16x16xf32>
    %82 = vector.broadcast %cst_40 : f32 to vector<16x16xf32>
    %83 = arith.select %80, %81, %82 : vector<16x16xi1>, vector<16x16xf32>
    %cst_41 = arith.constant 9.000000e+00 : f32
    %84 = vector.broadcast %cst_41 : f32 to vector<16x16xf32>
    %85 = arith.cmpf oge, %11, %84 : vector<16x16xf32>
    %cst_42 = arith.constant 1.000000e+01 : f32
    %86 = vector.broadcast %cst_42 : f32 to vector<16x16xf32>
    %87 = arith.cmpf olt, %11, %86 : vector<16x16xf32>
    %88 = arith.andi %85, %87 : vector<16x16xi1>
    %cst_43 = arith.constant 1.000000e+00 : f32
    %cst_44 = arith.constant 0.000000e+00 : f32
    %89 = vector.broadcast %cst_43 : f32 to vector<16x16xf32>
    %90 = vector.broadcast %cst_44 : f32 to vector<16x16xf32>
    %91 = arith.select %88, %89, %90 : vector<16x16xi1>, vector<16x16xf32>
    %cst_45 = arith.constant 1.000000e+01 : f32
    %92 = vector.broadcast %cst_45 : f32 to vector<16x16xf32>
    %93 = arith.cmpf oge, %11, %92 : vector<16x16xf32>
    %cst_46 = arith.constant 1.100000e+01 : f32
    %94 = vector.broadcast %cst_46 : f32 to vector<16x16xf32>
    %95 = arith.cmpf olt, %11, %94 : vector<16x16xf32>
    %96 = arith.andi %93, %95 : vector<16x16xi1>
    %cst_47 = arith.constant 1.000000e+00 : f32
    %cst_48 = arith.constant 0.000000e+00 : f32
    %97 = vector.broadcast %cst_47 : f32 to vector<16x16xf32>
    %98 = vector.broadcast %cst_48 : f32 to vector<16x16xf32>
    %99 = arith.select %96, %97, %98 : vector<16x16xi1>, vector<16x16xf32>
    %cst_49 = arith.constant 0.000000e+00 : f32
    %100 = vector.broadcast %cst_49 : f32 to vector<16x16xf32>
    %101 = arith.subf %11, %100 : vector<16x16xf32>
    %102 = arith.mulf %101, %19 : vector<16x16xf32>
    %cst_50 = arith.constant 2.000000e+00 : f32
    %103 = vector.broadcast %cst_50 : f32 to vector<16x16xf32>
    %104 = arith.subf %11, %103 : vector<16x16xf32>
    %105 = arith.mulf %104, %27 : vector<16x16xf32>
    %106 = arith.subf %102, %105 : vector<16x16xf32>
    %cst_51 = arith.constant 1.000000e+00 : f32
    %107 = vector.broadcast %cst_51 : f32 to vector<16x16xf32>
    %108 = arith.subf %11, %107 : vector<16x16xf32>
    %109 = arith.mulf %108, %27 : vector<16x16xf32>
    %cst_52 = arith.constant 3.000000e+00 : f32
    %110 = vector.broadcast %cst_52 : f32 to vector<16x16xf32>
    %111 = arith.subf %11, %110 : vector<16x16xf32>
    %112 = arith.mulf %111, %35 : vector<16x16xf32>
    %113 = arith.subf %109, %112 : vector<16x16xf32>
    %cst_53 = arith.constant 2.000000e+00 : f32
    %114 = vector.broadcast %cst_53 : f32 to vector<16x16xf32>
    %115 = arith.subf %11, %114 : vector<16x16xf32>
    %116 = arith.mulf %115, %35 : vector<16x16xf32>
    %cst_54 = arith.constant 4.000000e+00 : f32
    %117 = vector.broadcast %cst_54 : f32 to vector<16x16xf32>
    %118 = arith.subf %11, %117 : vector<16x16xf32>
    %119 = arith.mulf %118, %43 : vector<16x16xf32>
    %120 = arith.subf %116, %119 : vector<16x16xf32>
    %cst_55 = arith.constant 3.000000e+00 : f32
    %121 = vector.broadcast %cst_55 : f32 to vector<16x16xf32>
    %122 = arith.subf %11, %121 : vector<16x16xf32>
    %123 = arith.mulf %122, %43 : vector<16x16xf32>
    %cst_56 = arith.constant 5.000000e+00 : f32
    %124 = vector.broadcast %cst_56 : f32 to vector<16x16xf32>
    %125 = arith.subf %11, %124 : vector<16x16xf32>
    %126 = arith.mulf %125, %51 : vector<16x16xf32>
    %127 = arith.subf %123, %126 : vector<16x16xf32>
    %cst_57 = arith.constant 4.000000e+00 : f32
    %128 = vector.broadcast %cst_57 : f32 to vector<16x16xf32>
    %129 = arith.subf %11, %128 : vector<16x16xf32>
    %130 = arith.mulf %129, %51 : vector<16x16xf32>
    %cst_58 = arith.constant 6.000000e+00 : f32
    %131 = vector.broadcast %cst_58 : f32 to vector<16x16xf32>
    %132 = arith.subf %11, %131 : vector<16x16xf32>
    %133 = arith.mulf %132, %59 : vector<16x16xf32>
    %134 = arith.subf %130, %133 : vector<16x16xf32>
    %cst_59 = arith.constant 5.000000e+00 : f32
    %135 = vector.broadcast %cst_59 : f32 to vector<16x16xf32>
    %136 = arith.subf %11, %135 : vector<16x16xf32>
    %137 = arith.mulf %136, %59 : vector<16x16xf32>
    %cst_60 = arith.constant 7.000000e+00 : f32
    %138 = vector.broadcast %cst_60 : f32 to vector<16x16xf32>
    %139 = arith.subf %11, %138 : vector<16x16xf32>
    %140 = arith.mulf %139, %67 : vector<16x16xf32>
    %141 = arith.subf %137, %140 : vector<16x16xf32>
    %cst_61 = arith.constant 6.000000e+00 : f32
    %142 = vector.broadcast %cst_61 : f32 to vector<16x16xf32>
    %143 = arith.subf %11, %142 : vector<16x16xf32>
    %144 = arith.mulf %143, %67 : vector<16x16xf32>
    %cst_62 = arith.constant 8.000000e+00 : f32
    %145 = vector.broadcast %cst_62 : f32 to vector<16x16xf32>
    %146 = arith.subf %11, %145 : vector<16x16xf32>
    %147 = arith.mulf %146, %75 : vector<16x16xf32>
    %148 = arith.subf %144, %147 : vector<16x16xf32>
    %cst_63 = arith.constant 7.000000e+00 : f32
    %149 = vector.broadcast %cst_63 : f32 to vector<16x16xf32>
    %150 = arith.subf %11, %149 : vector<16x16xf32>
    %151 = arith.mulf %150, %75 : vector<16x16xf32>
    %cst_64 = arith.constant 9.000000e+00 : f32
    %152 = vector.broadcast %cst_64 : f32 to vector<16x16xf32>
    %153 = arith.subf %11, %152 : vector<16x16xf32>
    %154 = arith.mulf %153, %83 : vector<16x16xf32>
    %155 = arith.subf %151, %154 : vector<16x16xf32>
    %cst_65 = arith.constant 8.000000e+00 : f32
    %156 = vector.broadcast %cst_65 : f32 to vector<16x16xf32>
    %157 = arith.subf %11, %156 : vector<16x16xf32>
    %158 = arith.mulf %157, %83 : vector<16x16xf32>
    %cst_66 = arith.constant 1.000000e+01 : f32
    %159 = vector.broadcast %cst_66 : f32 to vector<16x16xf32>
    %160 = arith.subf %11, %159 : vector<16x16xf32>
    %161 = arith.mulf %160, %91 : vector<16x16xf32>
    %162 = arith.subf %158, %161 : vector<16x16xf32>
    %cst_67 = arith.constant 9.000000e+00 : f32
    %163 = vector.broadcast %cst_67 : f32 to vector<16x16xf32>
    %164 = arith.subf %11, %163 : vector<16x16xf32>
    %165 = arith.mulf %164, %91 : vector<16x16xf32>
    %cst_68 = arith.constant 1.100000e+01 : f32
    %166 = vector.broadcast %cst_68 : f32 to vector<16x16xf32>
    %167 = arith.subf %11, %166 : vector<16x16xf32>
    %168 = arith.mulf %167, %99 : vector<16x16xf32>
    %169 = arith.subf %165, %168 : vector<16x16xf32>
    %cst_69 = arith.constant 0.000000e+00 : f32
    %170 = vector.broadcast %cst_69 : f32 to vector<16x16xf32>
    %171 = arith.subf %11, %170 : vector<16x16xf32>
    %172 = arith.mulf %171, %106 : vector<16x16xf32>
    %cst_70 = arith.constant 3.000000e+00 : f32
    %173 = vector.broadcast %cst_70 : f32 to vector<16x16xf32>
    %174 = arith.subf %11, %173 : vector<16x16xf32>
    %175 = arith.mulf %174, %113 : vector<16x16xf32>
    %176 = arith.subf %172, %175 : vector<16x16xf32>
    %cst_71 = arith.constant 5.000000e-01 : f32
    %177 = vector.broadcast %cst_71 : f32 to vector<16x16xf32>
    %178 = arith.mulf %176, %177 : vector<16x16xf32>
    %cst_72 = arith.constant 1.000000e+00 : f32
    %179 = vector.broadcast %cst_72 : f32 to vector<16x16xf32>
    %180 = arith.subf %11, %179 : vector<16x16xf32>
    %181 = arith.mulf %180, %113 : vector<16x16xf32>
    %cst_73 = arith.constant 4.000000e+00 : f32
    %182 = vector.broadcast %cst_73 : f32 to vector<16x16xf32>
    %183 = arith.subf %11, %182 : vector<16x16xf32>
    %184 = arith.mulf %183, %120 : vector<16x16xf32>
    %185 = arith.subf %181, %184 : vector<16x16xf32>
    %cst_74 = arith.constant 5.000000e-01 : f32
    %186 = vector.broadcast %cst_74 : f32 to vector<16x16xf32>
    %187 = arith.mulf %185, %186 : vector<16x16xf32>
    %cst_75 = arith.constant 2.000000e+00 : f32
    %188 = vector.broadcast %cst_75 : f32 to vector<16x16xf32>
    %189 = arith.subf %11, %188 : vector<16x16xf32>
    %190 = arith.mulf %189, %120 : vector<16x16xf32>
    %cst_76 = arith.constant 5.000000e+00 : f32
    %191 = vector.broadcast %cst_76 : f32 to vector<16x16xf32>
    %192 = arith.subf %11, %191 : vector<16x16xf32>
    %193 = arith.mulf %192, %127 : vector<16x16xf32>
    %194 = arith.subf %190, %193 : vector<16x16xf32>
    %cst_77 = arith.constant 5.000000e-01 : f32
    %195 = vector.broadcast %cst_77 : f32 to vector<16x16xf32>
    %196 = arith.mulf %194, %195 : vector<16x16xf32>
    %cst_78 = arith.constant 3.000000e+00 : f32
    %197 = vector.broadcast %cst_78 : f32 to vector<16x16xf32>
    %198 = arith.subf %11, %197 : vector<16x16xf32>
    %199 = arith.mulf %198, %127 : vector<16x16xf32>
    %cst_79 = arith.constant 6.000000e+00 : f32
    %200 = vector.broadcast %cst_79 : f32 to vector<16x16xf32>
    %201 = arith.subf %11, %200 : vector<16x16xf32>
    %202 = arith.mulf %201, %134 : vector<16x16xf32>
    %203 = arith.subf %199, %202 : vector<16x16xf32>
    %cst_80 = arith.constant 5.000000e-01 : f32
    %204 = vector.broadcast %cst_80 : f32 to vector<16x16xf32>
    %205 = arith.mulf %203, %204 : vector<16x16xf32>
    %cst_81 = arith.constant 4.000000e+00 : f32
    %206 = vector.broadcast %cst_81 : f32 to vector<16x16xf32>
    %207 = arith.subf %11, %206 : vector<16x16xf32>
    %208 = arith.mulf %207, %134 : vector<16x16xf32>
    %cst_82 = arith.constant 7.000000e+00 : f32
    %209 = vector.broadcast %cst_82 : f32 to vector<16x16xf32>
    %210 = arith.subf %11, %209 : vector<16x16xf32>
    %211 = arith.mulf %210, %141 : vector<16x16xf32>
    %212 = arith.subf %208, %211 : vector<16x16xf32>
    %cst_83 = arith.constant 5.000000e-01 : f32
    %213 = vector.broadcast %cst_83 : f32 to vector<16x16xf32>
    %214 = arith.mulf %212, %213 : vector<16x16xf32>
    %cst_84 = arith.constant 5.000000e+00 : f32
    %215 = vector.broadcast %cst_84 : f32 to vector<16x16xf32>
    %216 = arith.subf %11, %215 : vector<16x16xf32>
    %217 = arith.mulf %216, %141 : vector<16x16xf32>
    %cst_85 = arith.constant 8.000000e+00 : f32
    %218 = vector.broadcast %cst_85 : f32 to vector<16x16xf32>
    %219 = arith.subf %11, %218 : vector<16x16xf32>
    %220 = arith.mulf %219, %148 : vector<16x16xf32>
    %221 = arith.subf %217, %220 : vector<16x16xf32>
    %cst_86 = arith.constant 5.000000e-01 : f32
    %222 = vector.broadcast %cst_86 : f32 to vector<16x16xf32>
    %223 = arith.mulf %221, %222 : vector<16x16xf32>
    %cst_87 = arith.constant 6.000000e+00 : f32
    %224 = vector.broadcast %cst_87 : f32 to vector<16x16xf32>
    %225 = arith.subf %11, %224 : vector<16x16xf32>
    %226 = arith.mulf %225, %148 : vector<16x16xf32>
    %cst_88 = arith.constant 9.000000e+00 : f32
    %227 = vector.broadcast %cst_88 : f32 to vector<16x16xf32>
    %228 = arith.subf %11, %227 : vector<16x16xf32>
    %229 = arith.mulf %228, %155 : vector<16x16xf32>
    %230 = arith.subf %226, %229 : vector<16x16xf32>
    %cst_89 = arith.constant 5.000000e-01 : f32
    %231 = vector.broadcast %cst_89 : f32 to vector<16x16xf32>
    %232 = arith.mulf %230, %231 : vector<16x16xf32>
    %cst_90 = arith.constant 7.000000e+00 : f32
    %233 = vector.broadcast %cst_90 : f32 to vector<16x16xf32>
    %234 = arith.subf %11, %233 : vector<16x16xf32>
    %235 = arith.mulf %234, %155 : vector<16x16xf32>
    %cst_91 = arith.constant 1.000000e+01 : f32
    %236 = vector.broadcast %cst_91 : f32 to vector<16x16xf32>
    %237 = arith.subf %11, %236 : vector<16x16xf32>
    %238 = arith.mulf %237, %162 : vector<16x16xf32>
    %239 = arith.subf %235, %238 : vector<16x16xf32>
    %cst_92 = arith.constant 5.000000e-01 : f32
    %240 = vector.broadcast %cst_92 : f32 to vector<16x16xf32>
    %241 = arith.mulf %239, %240 : vector<16x16xf32>
    %cst_93 = arith.constant 8.000000e+00 : f32
    %242 = vector.broadcast %cst_93 : f32 to vector<16x16xf32>
    %243 = arith.subf %11, %242 : vector<16x16xf32>
    %244 = arith.mulf %243, %162 : vector<16x16xf32>
    %cst_94 = arith.constant 1.100000e+01 : f32
    %245 = vector.broadcast %cst_94 : f32 to vector<16x16xf32>
    %246 = arith.subf %11, %245 : vector<16x16xf32>
    %247 = arith.mulf %246, %169 : vector<16x16xf32>
    %248 = arith.subf %244, %247 : vector<16x16xf32>
    %cst_95 = arith.constant 5.000000e-01 : f32
    %249 = vector.broadcast %cst_95 : f32 to vector<16x16xf32>
    %250 = arith.mulf %248, %249 : vector<16x16xf32>
    %cst_96 = arith.constant 0.000000e+00 : f32
    %251 = vector.broadcast %cst_96 : f32 to vector<16x16xf32>
    %252 = arith.subf %11, %251 : vector<16x16xf32>
    %253 = arith.mulf %252, %178 : vector<16x16xf32>
    %cst_97 = arith.constant 4.000000e+00 : f32
    %254 = vector.broadcast %cst_97 : f32 to vector<16x16xf32>
    %255 = arith.subf %11, %254 : vector<16x16xf32>
    %256 = arith.mulf %255, %187 : vector<16x16xf32>
    %257 = arith.subf %253, %256 : vector<16x16xf32>
    %cst_98 = arith.constant 0.333333343 : f32
    %258 = vector.broadcast %cst_98 : f32 to vector<16x16xf32>
    %259 = arith.mulf %257, %258 : vector<16x16xf32>
    %cst_99 = arith.constant 1.000000e+00 : f32
    %260 = vector.broadcast %cst_99 : f32 to vector<16x16xf32>
    %261 = arith.subf %11, %260 : vector<16x16xf32>
    %262 = arith.mulf %261, %187 : vector<16x16xf32>
    %cst_100 = arith.constant 5.000000e+00 : f32
    %263 = vector.broadcast %cst_100 : f32 to vector<16x16xf32>
    %264 = arith.subf %11, %263 : vector<16x16xf32>
    %265 = arith.mulf %264, %196 : vector<16x16xf32>
    %266 = arith.subf %262, %265 : vector<16x16xf32>
    %cst_101 = arith.constant 0.333333343 : f32
    %267 = vector.broadcast %cst_101 : f32 to vector<16x16xf32>
    %268 = arith.mulf %266, %267 : vector<16x16xf32>
    %cst_102 = arith.constant 2.000000e+00 : f32
    %269 = vector.broadcast %cst_102 : f32 to vector<16x16xf32>
    %270 = arith.subf %11, %269 : vector<16x16xf32>
    %271 = arith.mulf %270, %196 : vector<16x16xf32>
    %cst_103 = arith.constant 6.000000e+00 : f32
    %272 = vector.broadcast %cst_103 : f32 to vector<16x16xf32>
    %273 = arith.subf %11, %272 : vector<16x16xf32>
    %274 = arith.mulf %273, %205 : vector<16x16xf32>
    %275 = arith.subf %271, %274 : vector<16x16xf32>
    %cst_104 = arith.constant 0.333333343 : f32
    %276 = vector.broadcast %cst_104 : f32 to vector<16x16xf32>
    %277 = arith.mulf %275, %276 : vector<16x16xf32>
    %cst_105 = arith.constant 3.000000e+00 : f32
    %278 = vector.broadcast %cst_105 : f32 to vector<16x16xf32>
    %279 = arith.subf %11, %278 : vector<16x16xf32>
    %280 = arith.mulf %279, %205 : vector<16x16xf32>
    %cst_106 = arith.constant 7.000000e+00 : f32
    %281 = vector.broadcast %cst_106 : f32 to vector<16x16xf32>
    %282 = arith.subf %11, %281 : vector<16x16xf32>
    %283 = arith.mulf %282, %214 : vector<16x16xf32>
    %284 = arith.subf %280, %283 : vector<16x16xf32>
    %cst_107 = arith.constant 0.333333343 : f32
    %285 = vector.broadcast %cst_107 : f32 to vector<16x16xf32>
    %286 = arith.mulf %284, %285 : vector<16x16xf32>
    %cst_108 = arith.constant 4.000000e+00 : f32
    %287 = vector.broadcast %cst_108 : f32 to vector<16x16xf32>
    %288 = arith.subf %11, %287 : vector<16x16xf32>
    %289 = arith.mulf %288, %214 : vector<16x16xf32>
    %cst_109 = arith.constant 8.000000e+00 : f32
    %290 = vector.broadcast %cst_109 : f32 to vector<16x16xf32>
    %291 = arith.subf %11, %290 : vector<16x16xf32>
    %292 = arith.mulf %291, %223 : vector<16x16xf32>
    %293 = arith.subf %289, %292 : vector<16x16xf32>
    %cst_110 = arith.constant 0.333333343 : f32
    %294 = vector.broadcast %cst_110 : f32 to vector<16x16xf32>
    %295 = arith.mulf %293, %294 : vector<16x16xf32>
    %cst_111 = arith.constant 5.000000e+00 : f32
    %296 = vector.broadcast %cst_111 : f32 to vector<16x16xf32>
    %297 = arith.subf %11, %296 : vector<16x16xf32>
    %298 = arith.mulf %297, %223 : vector<16x16xf32>
    %cst_112 = arith.constant 9.000000e+00 : f32
    %299 = vector.broadcast %cst_112 : f32 to vector<16x16xf32>
    %300 = arith.subf %11, %299 : vector<16x16xf32>
    %301 = arith.mulf %300, %232 : vector<16x16xf32>
    %302 = arith.subf %298, %301 : vector<16x16xf32>
    %cst_113 = arith.constant 0.333333343 : f32
    %303 = vector.broadcast %cst_113 : f32 to vector<16x16xf32>
    %304 = arith.mulf %302, %303 : vector<16x16xf32>
    %cst_114 = arith.constant 6.000000e+00 : f32
    %305 = vector.broadcast %cst_114 : f32 to vector<16x16xf32>
    %306 = arith.subf %11, %305 : vector<16x16xf32>
    %307 = arith.mulf %306, %232 : vector<16x16xf32>
    %cst_115 = arith.constant 1.000000e+01 : f32
    %308 = vector.broadcast %cst_115 : f32 to vector<16x16xf32>
    %309 = arith.subf %11, %308 : vector<16x16xf32>
    %310 = arith.mulf %309, %241 : vector<16x16xf32>
    %311 = arith.subf %307, %310 : vector<16x16xf32>
    %cst_116 = arith.constant 0.333333343 : f32
    %312 = vector.broadcast %cst_116 : f32 to vector<16x16xf32>
    %313 = arith.mulf %311, %312 : vector<16x16xf32>
    %cst_117 = arith.constant 7.000000e+00 : f32
    %314 = vector.broadcast %cst_117 : f32 to vector<16x16xf32>
    %315 = arith.subf %11, %314 : vector<16x16xf32>
    %316 = arith.mulf %315, %241 : vector<16x16xf32>
    %cst_118 = arith.constant 1.100000e+01 : f32
    %317 = vector.broadcast %cst_118 : f32 to vector<16x16xf32>
    %318 = arith.subf %11, %317 : vector<16x16xf32>
    %319 = arith.mulf %318, %250 : vector<16x16xf32>
    %320 = arith.subf %316, %319 : vector<16x16xf32>
    %cst_119 = arith.constant 0.333333343 : f32
    %321 = vector.broadcast %cst_119 : f32 to vector<16x16xf32>
    %322 = arith.mulf %320, %321 : vector<16x16xf32>
    %c0_120 = arith.constant 0 : index
    %c16 = arith.constant 16 : index
    %323 = vector.load %arg10[%c0_120, %c16] : memref<16x144xf32, #tpu.memory_space<vmem>>, vector<16x16xf32>
    tpu.vector_store %arg10[%c0_120, %c16], %259 {strides = array<i32>} : memref<16x144xf32, #tpu.memory_space<vmem>>, vector<16x16xf32>,
    %c0_121 = arith.constant 0 : index
    %c32 = arith.constant 32 : index
    %324 = vector.load %arg10[%c0_121, %c32] : memref<16x144xf32, #tpu.memory_space<vmem>>, vector<16x16xf32>
    tpu.vector_store %arg10[%c0_121, %c32], %268 {strides = array<i32>} : memref<16x144xf32, #tpu.memory_space<vmem>>, vector<16x16xf32>,
    %c0_122 = arith.constant 0 : index
    %c48 = arith.constant 48 : index
    %325 = vector.load %arg10[%c0_122, %c48] : memref<16x144xf32, #tpu.memory_space<vmem>>, vector<16x16xf32>
    tpu.vector_store %arg10[%c0_122, %c48], %277 {strides = array<i32>} : memref<16x144xf32, #tpu.memory_space<vmem>>, vector<16x16xf32>,
    %c0_123 = arith.constant 0 : index
    %c64 = arith.constant 64 : index
    %326 = vector.load %arg10[%c0_123, %c64] : memref<16x144xf32, #tpu.memory_space<vmem>>, vector<16x16xf32>
    tpu.vector_store %arg10[%c0_123, %c64], %286 {strides = array<i32>} : memref<16x144xf32, #tpu.memory_space<vmem>>, vector<16x16xf32>,
    %c0_124 = arith.constant 0 : index
    %c80 = arith.constant 80 : index
    %327 = vector.load %arg10[%c0_124, %c80] : memref<16x144xf32, #tpu.memory_space<vmem>>, vector<16x16xf32>
    tpu.vector_store %arg10[%c0_124, %c80], %295 {strides = array<i32>} : memref<16x144xf32, #tpu.memory_space<vmem>>, vector<16x16xf32>,
    %c0_125 = arith.constant 0 : index
    %c96 = arith.constant 96 : index
    %328 = vector.load %arg10[%c0_125, %c96] : memref<16x144xf32, #tpu.memory_space<vmem>>, vector<16x16xf32>
    tpu.vector_store %arg10[%c0_125, %c96], %304 {strides = array<i32>} : memref<16x144xf32, #tpu.memory_space<vmem>>, vector<16x16xf32>,
    %c0_126 = arith.constant 0 : index
    %c112 = arith.constant 112 : index
    %329 = vector.load %arg10[%c0_126, %c112] : memref<16x144xf32, #tpu.memory_space<vmem>>, vector<16x16xf32>
    tpu.vector_store %arg10[%c0_126, %c112], %313 {strides = array<i32>} : memref<16x144xf32, #tpu.memory_space<vmem>>, vector<16x16xf32>,
    %c0_127 = arith.constant 0 : index
    %c128 = arith.constant 128 : index
    %330 = vector.load %arg10[%c0_127, %c128] : memref<16x144xf32, #tpu.memory_space<vmem>>, vector<16x16xf32>
    tpu.vector_store %arg10[%c0_127, %c128], %322 {strides = array<i32>} : memref<16x144xf32, #tpu.memory_space<vmem>>, vector<16x16xf32>,
    %c0_128 = arith.constant 0 : index
    %c0_129 = arith.constant 0 : index
    %331 = vector.load %arg10[%c0_128, %c0_129] : memref<16x144xf32, #tpu.memory_space<vmem>>, vector<16x144xf32>
    %332 = arith.truncf %331 : vector<16x144xf32> to vector<16x144xbf16>
    %c0_130 = arith.constant 0 : index
    %c0_131 = arith.constant 0 : index
    %333 = vector.load %arg2[%c0_130, %c0_131] : memref<144x32xbf16, #tpu.memory_space<vmem>>, vector<144x32xbf16>
    %cst_132 = arith.constant dense<0.000000e+00> : vector<16x32xf32>
    %334 = tpu.matmul %332, %333, %cst_132 {dimension_numbers = #tpu.dot_dimension_numbers<[1], [0], [0], [1], [0, 0, 1, 1], [], []>} : vector<16x144xbf16>, vector<144x32xbf16>, vector<16x32xf32> -> vector<16x32xf32>
    %cst_133 = arith.constant 0.000000e+00 : f32
    %335 = vector.broadcast %cst_133 : f32 to vector<16x32xf32>
    %336 = arith.cmpf oge, %334, %335 : vector<16x32xf32>
    %cst_134 = arith.constant 1.000000e-01 : f32
    %337 = vector.broadcast %cst_134 : f32 to vector<16x32xf32>
    %338 = arith.mulf %337, %334 : vector<16x32xf32>
    %339 = arith.select %336, %334, %338 : vector<16x32xi1>, vector<16x32xf32>
    %c0_135 = arith.constant 0 : index
    %c0_136 = arith.constant 0 : index
    %340 = vector.load %arg6[%c0_135, %c0_136] : memref<16x32xf32, #tpu.memory_space<vmem>>, vector<16x32xf32>
    tpu.vector_store %arg6[%c0_135, %c0_136], %339 {strides = array<i32>} : memref<16x32xf32, #tpu.memory_space<vmem>>, vector<16x32xf32>,
    %341 = vector.shape_cast %339 : vector<16x32xf32> to vector<2x8x32xf32>
    %c0_137 = arith.constant 0 : index
    %c0_138 = arith.constant 0 : index
    %c0_139 = arith.constant 0 : index
    %342 = vector.load %arg3[%c0_137, %c0_138, %c0_139] : memref<9x8x1xf32, #tpu.memory_space<vmem>>, vector<9x8x1xf32>
    %343 = arith.negf %341 : vector<2x8x32xf32>
    %344 = math.exp %343 : vector<2x8x32xf32>
    %cst_140 = arith.constant 1.000000e+00 : f32
    %345 = vector.broadcast %cst_140 : f32 to vector<2x8x32xf32>
    %346 = arith.addf %345, %344 : vector<2x8x32xf32>
    %347 = arith.divf %345, %346 : vector<2x8x32xf32>
    %348 = arith.mulf %341, %347 : vector<2x8x32xf32>
    %cst_141 = arith.constant -2.200000e+00 : f32
    %349 = vector.broadcast %cst_141 : f32 to vector<2x8x32xf32>
    %350 = arith.subf %341, %349 : vector<2x8x32xf32>
    %cst_142 = arith.constant 2.500000e+00 : f32
    %351 = vector.broadcast %cst_142 : f32 to vector<2x8x32xf32>
    %352 = arith.mulf %350, %351 : vector<2x8x32xf32>
    %cst_143 = arith.constant 0.000000e+00 : f32
    %353 = vector.broadcast %cst_143 : f32 to vector<2x8x32xf32>
    %354 = arith.cmpf oge, %352, %353 : vector<2x8x32xf32>
    %cst_144 = arith.constant 1.000000e+00 : f32
    %355 = vector.broadcast %cst_144 : f32 to vector<2x8x32xf32>
    %356 = arith.cmpf olt, %352, %355 : vector<2x8x32xf32>
    %357 = arith.andi %354, %356 : vector<2x8x32xi1>
    %cst_145 = arith.constant 1.000000e+00 : f32
    %cst_146 = arith.constant 0.000000e+00 : f32
    %358 = vector.broadcast %cst_145 : f32 to vector<2x8x32xf32>
    %359 = vector.broadcast %cst_146 : f32 to vector<2x8x32xf32>
    %360 = arith.select %357, %358, %359 : vector<2x8x32xi1>, vector<2x8x32xf32>
    %cst_147 = arith.constant 1.000000e+00 : f32
    %361 = vector.broadcast %cst_147 : f32 to vector<2x8x32xf32>
    %362 = arith.cmpf oge, %352, %361 : vector<2x8x32xf32>
    %cst_148 = arith.constant 2.000000e+00 : f32
    %363 = vector.broadcast %cst_148 : f32 to vector<2x8x32xf32>
    %364 = arith.cmpf olt, %352, %363 : vector<2x8x32xf32>
    %365 = arith.andi %362, %364 : vector<2x8x32xi1>
    %cst_149 = arith.constant 1.000000e+00 : f32
    %cst_150 = arith.constant 0.000000e+00 : f32
    %366 = vector.broadcast %cst_149 : f32 to vector<2x8x32xf32>
    %367 = vector.broadcast %cst_150 : f32 to vector<2x8x32xf32>
    %368 = arith.select %365, %366, %367 : vector<2x8x32xi1>, vector<2x8x32xf32>
    %cst_151 = arith.constant 2.000000e+00 : f32
    %369 = vector.broadcast %cst_151 : f32 to vector<2x8x32xf32>
    %370 = arith.cmpf oge, %352, %369 : vector<2x8x32xf32>
    %cst_152 = arith.constant 3.000000e+00 : f32
    %371 = vector.broadcast %cst_152 : f32 to vector<2x8x32xf32>
    %372 = arith.cmpf olt, %352, %371 : vector<2x8x32xf32>
    %373 = arith.andi %370, %372 : vector<2x8x32xi1>
    %cst_153 = arith.constant 1.000000e+00 : f32
    %cst_154 = arith.constant 0.000000e+00 : f32
    %374 = vector.broadcast %cst_153 : f32 to vector<2x8x32xf32>
    %375 = vector.broadcast %cst_154 : f32 to vector<2x8x32xf32>
    %376 = arith.select %373, %374, %375 : vector<2x8x32xi1>, vector<2x8x32xf32>
    %cst_155 = arith.constant 3.000000e+00 : f32
    %377 = vector.broadcast %cst_155 : f32 to vector<2x8x32xf32>
    %378 = arith.cmpf oge, %352, %377 : vector<2x8x32xf32>
    %cst_156 = arith.constant 4.000000e+00 : f32
    %379 = vector.broadcast %cst_156 : f32 to vector<2x8x32xf32>
    %380 = arith.cmpf olt, %352, %379 : vector<2x8x32xf32>
    %381 = arith.andi %378, %380 : vector<2x8x32xi1>
    %cst_157 = arith.constant 1.000000e+00 : f32
    %cst_158 = arith.constant 0.000000e+00 : f32
    %382 = vector.broadcast %cst_157 : f32 to vector<2x8x32xf32>
    %383 = vector.broadcast %cst_158 : f32 to vector<2x8x32xf32>
    %384 = arith.select %381, %382, %383 : vector<2x8x32xi1>, vector<2x8x32xf32>
    %cst_159 = arith.constant 4.000000e+00 : f32
    %385 = vector.broadcast %cst_159 : f32 to vector<2x8x32xf32>
    %386 = arith.cmpf oge, %352, %385 : vector<2x8x32xf32>
    %cst_160 = arith.constant 5.000000e+00 : f32
    %387 = vector.broadcast %cst_160 : f32 to vector<2x8x32xf32>
    %388 = arith.cmpf olt, %352, %387 : vector<2x8x32xf32>
    %389 = arith.andi %386, %388 : vector<2x8x32xi1>
    %cst_161 = arith.constant 1.000000e+00 : f32
    %cst_162 = arith.constant 0.000000e+00 : f32
    %390 = vector.broadcast %cst_161 : f32 to vector<2x8x32xf32>
    %391 = vector.broadcast %cst_162 : f32 to vector<2x8x32xf32>
    %392 = arith.select %389, %390, %391 : vector<2x8x32xi1>, vector<2x8x32xf32>
    %cst_163 = arith.constant 5.000000e+00 : f32
    %393 = vector.broadcast %cst_163 : f32 to vector<2x8x32xf32>
    %394 = arith.cmpf oge, %352, %393 : vector<2x8x32xf32>
    %cst_164 = arith.constant 6.000000e+00 : f32
    %395 = vector.broadcast %cst_164 : f32 to vector<2x8x32xf32>
    %396 = arith.cmpf olt, %352, %395 : vector<2x8x32xf32>
    %397 = arith.andi %394, %396 : vector<2x8x32xi1>
    %cst_165 = arith.constant 1.000000e+00 : f32
    %cst_166 = arith.constant 0.000000e+00 : f32
    %398 = vector.broadcast %cst_165 : f32 to vector<2x8x32xf32>
    %399 = vector.broadcast %cst_166 : f32 to vector<2x8x32xf32>
    %400 = arith.select %397, %398, %399 : vector<2x8x32xi1>, vector<2x8x32xf32>
    %cst_167 = arith.constant 6.000000e+00 : f32
    %401 = vector.broadcast %cst_167 : f32 to vector<2x8x32xf32>
    %402 = arith.cmpf oge, %352, %401 : vector<2x8x32xf32>
    %cst_168 = arith.constant 7.000000e+00 : f32
    %403 = vector.broadcast %cst_168 : f32 to vector<2x8x32xf32>
    %404 = arith.cmpf olt, %352, %403 : vector<2x8x32xf32>
    %405 = arith.andi %402, %404 : vector<2x8x32xi1>
    %cst_169 = arith.constant 1.000000e+00 : f32
    %cst_170 = arith.constant 0.000000e+00 : f32
    %406 = vector.broadcast %cst_169 : f32 to vector<2x8x32xf32>
    %407 = vector.broadcast %cst_170 : f32 to vector<2x8x32xf32>
    %408 = arith.select %405, %406, %407 : vector<2x8x32xi1>, vector<2x8x32xf32>
    %cst_171 = arith.constant 7.000000e+00 : f32
    %409 = vector.broadcast %cst_171 : f32 to vector<2x8x32xf32>
    %410 = arith.cmpf oge, %352, %409 : vector<2x8x32xf32>
    %cst_172 = arith.constant 8.000000e+00 : f32
    %411 = vector.broadcast %cst_172 : f32 to vector<2x8x32xf32>
    %412 = arith.cmpf olt, %352, %411 : vector<2x8x32xf32>
    %413 = arith.andi %410, %412 : vector<2x8x32xi1>
    %cst_173 = arith.constant 1.000000e+00 : f32
    %cst_174 = arith.constant 0.000000e+00 : f32
    %414 = vector.broadcast %cst_173 : f32 to vector<2x8x32xf32>
    %415 = vector.broadcast %cst_174 : f32 to vector<2x8x32xf32>
    %416 = arith.select %413, %414, %415 : vector<2x8x32xi1>, vector<2x8x32xf32>
    %cst_175 = arith.constant 8.000000e+00 : f32
    %417 = vector.broadcast %cst_175 : f32 to vector<2x8x32xf32>
    %418 = arith.cmpf oge, %352, %417 : vector<2x8x32xf32>
    %cst_176 = arith.constant 9.000000e+00 : f32
    %419 = vector.broadcast %cst_176 : f32 to vector<2x8x32xf32>
    %420 = arith.cmpf olt, %352, %419 : vector<2x8x32xf32>
    %421 = arith.andi %418, %420 : vector<2x8x32xi1>
    %cst_177 = arith.constant 1.000000e+00 : f32
    %cst_178 = arith.constant 0.000000e+00 : f32
    %422 = vector.broadcast %cst_177 : f32 to vector<2x8x32xf32>
    %423 = vector.broadcast %cst_178 : f32 to vector<2x8x32xf32>
    %424 = arith.select %421, %422, %423 : vector<2x8x32xi1>, vector<2x8x32xf32>
    %cst_179 = arith.constant 9.000000e+00 : f32
    %425 = vector.broadcast %cst_179 : f32 to vector<2x8x32xf32>
    %426 = arith.cmpf oge, %352, %425 : vector<2x8x32xf32>
    %cst_180 = arith.constant 1.000000e+01 : f32
    %427 = vector.broadcast %cst_180 : f32 to vector<2x8x32xf32>
    %428 = arith.cmpf olt, %352, %427 : vector<2x8x32xf32>
    %429 = arith.andi %426, %428 : vector<2x8x32xi1>
    %cst_181 = arith.constant 1.000000e+00 : f32
    %cst_182 = arith.constant 0.000000e+00 : f32
    %430 = vector.broadcast %cst_181 : f32 to vector<2x8x32xf32>
    %431 = vector.broadcast %cst_182 : f32 to vector<2x8x32xf32>
    %432 = arith.select %429, %430, %431 : vector<2x8x32xi1>, vector<2x8x32xf32>
    %cst_183 = arith.constant 1.000000e+01 : f32
    %433 = vector.broadcast %cst_183 : f32 to vector<2x8x32xf32>
    %434 = arith.cmpf oge, %352, %433 : vector<2x8x32xf32>
    %cst_184 = arith.constant 1.100000e+01 : f32
    %435 = vector.broadcast %cst_184 : f32 to vector<2x8x32xf32>
    %436 = arith.cmpf olt, %352, %435 : vector<2x8x32xf32>
    %437 = arith.andi %434, %436 : vector<2x8x32xi1>
    %cst_185 = arith.constant 1.000000e+00 : f32
    %cst_186 = arith.constant 0.000000e+00 : f32
    %438 = vector.broadcast %cst_185 : f32 to vector<2x8x32xf32>
    %439 = vector.broadcast %cst_186 : f32 to vector<2x8x32xf32>
    %440 = arith.select %437, %438, %439 : vector<2x8x32xi1>, vector<2x8x32xf32>
    %cst_187 = arith.constant 0.000000e+00 : f32
    %441 = vector.broadcast %cst_187 : f32 to vector<2x8x32xf32>
    %442 = arith.subf %352, %441 : vector<2x8x32xf32>
    %443 = arith.mulf %442, %360 : vector<2x8x32xf32>
    %cst_188 = arith.constant 2.000000e+00 : f32
    %444 = vector.broadcast %cst_188 : f32 to vector<2x8x32xf32>
    %445 = arith.subf %352, %444 : vector<2x8x32xf32>
    %446 = arith.mulf %445, %368 : vector<2x8x32xf32>
    %447 = arith.subf %443, %446 : vector<2x8x32xf32>
    %cst_189 = arith.constant 1.000000e+00 : f32
    %448 = vector.broadcast %cst_189 : f32 to vector<2x8x32xf32>
    %449 = arith.subf %352, %448 : vector<2x8x32xf32>
    %450 = arith.mulf %449, %368 : vector<2x8x32xf32>
    %cst_190 = arith.constant 3.000000e+00 : f32
    %451 = vector.broadcast %cst_190 : f32 to vector<2x8x32xf32>
    %452 = arith.subf %352, %451 : vector<2x8x32xf32>
    %453 = arith.mulf %452, %376 : vector<2x8x32xf32>
    %454 = arith.subf %450, %453 : vector<2x8x32xf32>
    %cst_191 = arith.constant 2.000000e+00 : f32
    %455 = vector.broadcast %cst_191 : f32 to vector<2x8x32xf32>
    %456 = arith.subf %352, %455 : vector<2x8x32xf32>
    %457 = arith.mulf %456, %376 : vector<2x8x32xf32>
    %cst_192 = arith.constant 4.000000e+00 : f32
    %458 = vector.broadcast %cst_192 : f32 to vector<2x8x32xf32>
    %459 = arith.subf %352, %458 : vector<2x8x32xf32>
    %460 = arith.mulf %459, %384 : vector<2x8x32xf32>
    %461 = arith.subf %457, %460 : vector<2x8x32xf32>
    %cst_193 = arith.constant 3.000000e+00 : f32
    %462 = vector.broadcast %cst_193 : f32 to vector<2x8x32xf32>
    %463 = arith.subf %352, %462 : vector<2x8x32xf32>
    %464 = arith.mulf %463, %384 : vector<2x8x32xf32>
    %cst_194 = arith.constant 5.000000e+00 : f32
    %465 = vector.broadcast %cst_194 : f32 to vector<2x8x32xf32>
    %466 = arith.subf %352, %465 : vector<2x8x32xf32>
    %467 = arith.mulf %466, %392 : vector<2x8x32xf32>
    %468 = arith.subf %464, %467 : vector<2x8x32xf32>
    %cst_195 = arith.constant 4.000000e+00 : f32
    %469 = vector.broadcast %cst_195 : f32 to vector<2x8x32xf32>
    %470 = arith.subf %352, %469 : vector<2x8x32xf32>
    %471 = arith.mulf %470, %392 : vector<2x8x32xf32>
    %cst_196 = arith.constant 6.000000e+00 : f32
    %472 = vector.broadcast %cst_196 : f32 to vector<2x8x32xf32>
    %473 = arith.subf %352, %472 : vector<2x8x32xf32>
    %474 = arith.mulf %473, %400 : vector<2x8x32xf32>
    %475 = arith.subf %471, %474 : vector<2x8x32xf32>
    %cst_197 = arith.constant 5.000000e+00 : f32
    %476 = vector.broadcast %cst_197 : f32 to vector<2x8x32xf32>
    %477 = arith.subf %352, %476 : vector<2x8x32xf32>
    %478 = arith.mulf %477, %400 : vector<2x8x32xf32>
    %cst_198 = arith.constant 7.000000e+00 : f32
    %479 = vector.broadcast %cst_198 : f32 to vector<2x8x32xf32>
    %480 = arith.subf %352, %479 : vector<2x8x32xf32>
    %481 = arith.mulf %480, %408 : vector<2x8x32xf32>
    %482 = arith.subf %478, %481 : vector<2x8x32xf32>
    %cst_199 = arith.constant 6.000000e+00 : f32
    %483 = vector.broadcast %cst_199 : f32 to vector<2x8x32xf32>
    %484 = arith.subf %352, %483 : vector<2x8x32xf32>
    %485 = arith.mulf %484, %408 : vector<2x8x32xf32>
    %cst_200 = arith.constant 8.000000e+00 : f32
    %486 = vector.broadcast %cst_200 : f32 to vector<2x8x32xf32>
    %487 = arith.subf %352, %486 : vector<2x8x32xf32>
    %488 = arith.mulf %487, %416 : vector<2x8x32xf32>
    %489 = arith.subf %485, %488 : vector<2x8x32xf32>
    %cst_201 = arith.constant 7.000000e+00 : f32
    %490 = vector.broadcast %cst_201 : f32 to vector<2x8x32xf32>
    %491 = arith.subf %352, %490 : vector<2x8x32xf32>
    %492 = arith.mulf %491, %416 : vector<2x8x32xf32>
    %cst_202 = arith.constant 9.000000e+00 : f32
    %493 = vector.broadcast %cst_202 : f32 to vector<2x8x32xf32>
    %494 = arith.subf %352, %493 : vector<2x8x32xf32>
    %495 = arith.mulf %494, %424 : vector<2x8x32xf32>
    %496 = arith.subf %492, %495 : vector<2x8x32xf32>
    %cst_203 = arith.constant 8.000000e+00 : f32
    %497 = vector.broadcast %cst_203 : f32 to vector<2x8x32xf32>
    %498 = arith.subf %352, %497 : vector<2x8x32xf32>
    %499 = arith.mulf %498, %424 : vector<2x8x32xf32>
    %cst_204 = arith.constant 1.000000e+01 : f32
    %500 = vector.broadcast %cst_204 : f32 to vector<2x8x32xf32>
    %501 = arith.subf %352, %500 : vector<2x8x32xf32>
    %502 = arith.mulf %501, %432 : vector<2x8x32xf32>
    %503 = arith.subf %499, %502 : vector<2x8x32xf32>
    %cst_205 = arith.constant 9.000000e+00 : f32
    %504 = vector.broadcast %cst_205 : f32 to vector<2x8x32xf32>
    %505 = arith.subf %352, %504 : vector<2x8x32xf32>
    %506 = arith.mulf %505, %432 : vector<2x8x32xf32>
    %cst_206 = arith.constant 1.100000e+01 : f32
    %507 = vector.broadcast %cst_206 : f32 to vector<2x8x32xf32>
    %508 = arith.subf %352, %507 : vector<2x8x32xf32>
    %509 = arith.mulf %508, %440 : vector<2x8x32xf32>
    %510 = arith.subf %506, %509 : vector<2x8x32xf32>
    %cst_207 = arith.constant 0.000000e+00 : f32
    %511 = vector.broadcast %cst_207 : f32 to vector<2x8x32xf32>
    %512 = arith.subf %352, %511 : vector<2x8x32xf32>
    %513 = arith.mulf %512, %447 : vector<2x8x32xf32>
    %cst_208 = arith.constant 3.000000e+00 : f32
    %514 = vector.broadcast %cst_208 : f32 to vector<2x8x32xf32>
    %515 = arith.subf %352, %514 : vector<2x8x32xf32>
    %516 = arith.mulf %515, %454 : vector<2x8x32xf32>
    %517 = arith.subf %513, %516 : vector<2x8x32xf32>
    %cst_209 = arith.constant 5.000000e-01 : f32
    %518 = vector.broadcast %cst_209 : f32 to vector<2x8x32xf32>
    %519 = arith.mulf %517, %518 : vector<2x8x32xf32>
    %cst_210 = arith.constant 1.000000e+00 : f32
    %520 = vector.broadcast %cst_210 : f32 to vector<2x8x32xf32>
    %521 = arith.subf %352, %520 : vector<2x8x32xf32>
    %522 = arith.mulf %521, %454 : vector<2x8x32xf32>
    %cst_211 = arith.constant 4.000000e+00 : f32
    %523 = vector.broadcast %cst_211 : f32 to vector<2x8x32xf32>
    %524 = arith.subf %352, %523 : vector<2x8x32xf32>
    %525 = arith.mulf %524, %461 : vector<2x8x32xf32>
    %526 = arith.subf %522, %525 : vector<2x8x32xf32>
    %cst_212 = arith.constant 5.000000e-01 : f32
    %527 = vector.broadcast %cst_212 : f32 to vector<2x8x32xf32>
    %528 = arith.mulf %526, %527 : vector<2x8x32xf32>
    %cst_213 = arith.constant 2.000000e+00 : f32
    %529 = vector.broadcast %cst_213 : f32 to vector<2x8x32xf32>
    %530 = arith.subf %352, %529 : vector<2x8x32xf32>
    %531 = arith.mulf %530, %461 : vector<2x8x32xf32>
    %cst_214 = arith.constant 5.000000e+00 : f32
    %532 = vector.broadcast %cst_214 : f32 to vector<2x8x32xf32>
    %533 = arith.subf %352, %532 : vector<2x8x32xf32>
    %534 = arith.mulf %533, %468 : vector<2x8x32xf32>
    %535 = arith.subf %531, %534 : vector<2x8x32xf32>
    %cst_215 = arith.constant 5.000000e-01 : f32
    %536 = vector.broadcast %cst_215 : f32 to vector<2x8x32xf32>
    %537 = arith.mulf %535, %536 : vector<2x8x32xf32>
    %cst_216 = arith.constant 3.000000e+00 : f32
    %538 = vector.broadcast %cst_216 : f32 to vector<2x8x32xf32>
    %539 = arith.subf %352, %538 : vector<2x8x32xf32>
    %540 = arith.mulf %539, %468 : vector<2x8x32xf32>
    %cst_217 = arith.constant 6.000000e+00 : f32
    %541 = vector.broadcast %cst_217 : f32 to vector<2x8x32xf32>
    %542 = arith.subf %352, %541 : vector<2x8x32xf32>
    %543 = arith.mulf %542, %475 : vector<2x8x32xf32>
    %544 = arith.subf %540, %543 : vector<2x8x32xf32>
    %cst_218 = arith.constant 5.000000e-01 : f32
    %545 = vector.broadcast %cst_218 : f32 to vector<2x8x32xf32>
    %546 = arith.mulf %544, %545 : vector<2x8x32xf32>
    %cst_219 = arith.constant 4.000000e+00 : f32
    %547 = vector.broadcast %cst_219 : f32 to vector<2x8x32xf32>
    %548 = arith.subf %352, %547 : vector<2x8x32xf32>
    %549 = arith.mulf %548, %475 : vector<2x8x32xf32>
    %cst_220 = arith.constant 7.000000e+00 : f32
    %550 = vector.broadcast %cst_220 : f32 to vector<2x8x32xf32>
    %551 = arith.subf %352, %550 : vector<2x8x32xf32>
    %552 = arith.mulf %551, %482 : vector<2x8x32xf32>
    %553 = arith.subf %549, %552 : vector<2x8x32xf32>
    %cst_221 = arith.constant 5.000000e-01 : f32
    %554 = vector.broadcast %cst_221 : f32 to vector<2x8x32xf32>
    %555 = arith.mulf %553, %554 : vector<2x8x32xf32>
    %cst_222 = arith.constant 5.000000e+00 : f32
    %556 = vector.broadcast %cst_222 : f32 to vector<2x8x32xf32>
    %557 = arith.subf %352, %556 : vector<2x8x32xf32>
    %558 = arith.mulf %557, %482 : vector<2x8x32xf32>
    %cst_223 = arith.constant 8.000000e+00 : f32
    %559 = vector.broadcast %cst_223 : f32 to vector<2x8x32xf32>
    %560 = arith.subf %352, %559 : vector<2x8x32xf32>
    %561 = arith.mulf %560, %489 : vector<2x8x32xf32>
    %562 = arith.subf %558, %561 : vector<2x8x32xf32>
    %cst_224 = arith.constant 5.000000e-01 : f32
    %563 = vector.broadcast %cst_224 : f32 to vector<2x8x32xf32>
    %564 = arith.mulf %562, %563 : vector<2x8x32xf32>
    %cst_225 = arith.constant 6.000000e+00 : f32
    %565 = vector.broadcast %cst_225 : f32 to vector<2x8x32xf32>
    %566 = arith.subf %352, %565 : vector<2x8x32xf32>
    %567 = arith.mulf %566, %489 : vector<2x8x32xf32>
    %cst_226 = arith.constant 9.000000e+00 : f32
    %568 = vector.broadcast %cst_226 : f32 to vector<2x8x32xf32>
    %569 = arith.subf %352, %568 : vector<2x8x32xf32>
    %570 = arith.mulf %569, %496 : vector<2x8x32xf32>
    %571 = arith.subf %567, %570 : vector<2x8x32xf32>
    %cst_227 = arith.constant 5.000000e-01 : f32
    %572 = vector.broadcast %cst_227 : f32 to vector<2x8x32xf32>
    %573 = arith.mulf %571, %572 : vector<2x8x32xf32>
    %cst_228 = arith.constant 7.000000e+00 : f32
    %574 = vector.broadcast %cst_228 : f32 to vector<2x8x32xf32>
    %575 = arith.subf %352, %574 : vector<2x8x32xf32>
    %576 = arith.mulf %575, %496 : vector<2x8x32xf32>
    %cst_229 = arith.constant 1.000000e+01 : f32
    %577 = vector.broadcast %cst_229 : f32 to vector<2x8x32xf32>
    %578 = arith.subf %352, %577 : vector<2x8x32xf32>
    %579 = arith.mulf %578, %503 : vector<2x8x32xf32>
    %580 = arith.subf %576, %579 : vector<2x8x32xf32>
    %cst_230 = arith.constant 5.000000e-01 : f32
    %581 = vector.broadcast %cst_230 : f32 to vector<2x8x32xf32>
    %582 = arith.mulf %580, %581 : vector<2x8x32xf32>
    %cst_231 = arith.constant 8.000000e+00 : f32
    %583 = vector.broadcast %cst_231 : f32 to vector<2x8x32xf32>
    %584 = arith.subf %352, %583 : vector<2x8x32xf32>
    %585 = arith.mulf %584, %503 : vector<2x8x32xf32>
    %cst_232 = arith.constant 1.100000e+01 : f32
    %586 = vector.broadcast %cst_232 : f32 to vector<2x8x32xf32>
    %587 = arith.subf %352, %586 : vector<2x8x32xf32>
    %588 = arith.mulf %587, %510 : vector<2x8x32xf32>
    %589 = arith.subf %585, %588 : vector<2x8x32xf32>
    %cst_233 = arith.constant 5.000000e-01 : f32
    %590 = vector.broadcast %cst_233 : f32 to vector<2x8x32xf32>
    %591 = arith.mulf %589, %590 : vector<2x8x32xf32>
    %cst_234 = arith.constant 0.000000e+00 : f32
    %592 = vector.broadcast %cst_234 : f32 to vector<2x8x32xf32>
    %593 = arith.subf %352, %592 : vector<2x8x32xf32>
    %594 = arith.mulf %593, %519 : vector<2x8x32xf32>
    %cst_235 = arith.constant 4.000000e+00 : f32
    %595 = vector.broadcast %cst_235 : f32 to vector<2x8x32xf32>
    %596 = arith.subf %352, %595 : vector<2x8x32xf32>
    %597 = arith.mulf %596, %528 : vector<2x8x32xf32>
    %598 = arith.subf %594, %597 : vector<2x8x32xf32>
    %cst_236 = arith.constant 0.333333343 : f32
    %599 = vector.broadcast %cst_236 : f32 to vector<2x8x32xf32>
    %600 = arith.mulf %598, %599 : vector<2x8x32xf32>
    %cst_237 = arith.constant 1.000000e+00 : f32
    %601 = vector.broadcast %cst_237 : f32 to vector<2x8x32xf32>
    %602 = arith.subf %352, %601 : vector<2x8x32xf32>
    %603 = arith.mulf %602, %528 : vector<2x8x32xf32>
    %cst_238 = arith.constant 5.000000e+00 : f32
    %604 = vector.broadcast %cst_238 : f32 to vector<2x8x32xf32>
    %605 = arith.subf %352, %604 : vector<2x8x32xf32>
    %606 = arith.mulf %605, %537 : vector<2x8x32xf32>
    %607 = arith.subf %603, %606 : vector<2x8x32xf32>
    %cst_239 = arith.constant 0.333333343 : f32
    %608 = vector.broadcast %cst_239 : f32 to vector<2x8x32xf32>
    %609 = arith.mulf %607, %608 : vector<2x8x32xf32>
    %cst_240 = arith.constant 2.000000e+00 : f32
    %610 = vector.broadcast %cst_240 : f32 to vector<2x8x32xf32>
    %611 = arith.subf %352, %610 : vector<2x8x32xf32>
    %612 = arith.mulf %611, %537 : vector<2x8x32xf32>
    %cst_241 = arith.constant 6.000000e+00 : f32
    %613 = vector.broadcast %cst_241 : f32 to vector<2x8x32xf32>
    %614 = arith.subf %352, %613 : vector<2x8x32xf32>
    %615 = arith.mulf %614, %546 : vector<2x8x32xf32>
    %616 = arith.subf %612, %615 : vector<2x8x32xf32>
    %cst_242 = arith.constant 0.333333343 : f32
    %617 = vector.broadcast %cst_242 : f32 to vector<2x8x32xf32>
    %618 = arith.mulf %616, %617 : vector<2x8x32xf32>
    %cst_243 = arith.constant 3.000000e+00 : f32
    %619 = vector.broadcast %cst_243 : f32 to vector<2x8x32xf32>
    %620 = arith.subf %352, %619 : vector<2x8x32xf32>
    %621 = arith.mulf %620, %546 : vector<2x8x32xf32>
    %cst_244 = arith.constant 7.000000e+00 : f32
    %622 = vector.broadcast %cst_244 : f32 to vector<2x8x32xf32>
    %623 = arith.subf %352, %622 : vector<2x8x32xf32>
    %624 = arith.mulf %623, %555 : vector<2x8x32xf32>
    %625 = arith.subf %621, %624 : vector<2x8x32xf32>
    %cst_245 = arith.constant 0.333333343 : f32
    %626 = vector.broadcast %cst_245 : f32 to vector<2x8x32xf32>
    %627 = arith.mulf %625, %626 : vector<2x8x32xf32>
    %cst_246 = arith.constant 4.000000e+00 : f32
    %628 = vector.broadcast %cst_246 : f32 to vector<2x8x32xf32>
    %629 = arith.subf %352, %628 : vector<2x8x32xf32>
    %630 = arith.mulf %629, %555 : vector<2x8x32xf32>
    %cst_247 = arith.constant 8.000000e+00 : f32
    %631 = vector.broadcast %cst_247 : f32 to vector<2x8x32xf32>
    %632 = arith.subf %352, %631 : vector<2x8x32xf32>
    %633 = arith.mulf %632, %564 : vector<2x8x32xf32>
    %634 = arith.subf %630, %633 : vector<2x8x32xf32>
    %cst_248 = arith.constant 0.333333343 : f32
    %635 = vector.broadcast %cst_248 : f32 to vector<2x8x32xf32>
    %636 = arith.mulf %634, %635 : vector<2x8x32xf32>
    %cst_249 = arith.constant 5.000000e+00 : f32
    %637 = vector.broadcast %cst_249 : f32 to vector<2x8x32xf32>
    %638 = arith.subf %352, %637 : vector<2x8x32xf32>
    %639 = arith.mulf %638, %564 : vector<2x8x32xf32>
    %cst_250 = arith.constant 9.000000e+00 : f32
    %640 = vector.broadcast %cst_250 : f32 to vector<2x8x32xf32>
    %641 = arith.subf %352, %640 : vector<2x8x32xf32>
    %642 = arith.mulf %641, %573 : vector<2x8x32xf32>
    %643 = arith.subf %639, %642 : vector<2x8x32xf32>
    %cst_251 = arith.constant 0.333333343 : f32
    %644 = vector.broadcast %cst_251 : f32 to vector<2x8x32xf32>
    %645 = arith.mulf %643, %644 : vector<2x8x32xf32>
    %cst_252 = arith.constant 6.000000e+00 : f32
    %646 = vector.broadcast %cst_252 : f32 to vector<2x8x32xf32>
    %647 = arith.subf %352, %646 : vector<2x8x32xf32>
    %648 = arith.mulf %647, %573 : vector<2x8x32xf32>
    %cst_253 = arith.constant 1.000000e+01 : f32
    %649 = vector.broadcast %cst_253 : f32 to vector<2x8x32xf32>
    %650 = arith.subf %352, %649 : vector<2x8x32xf32>
    %651 = arith.mulf %650, %582 : vector<2x8x32xf32>
    %652 = arith.subf %648, %651 : vector<2x8x32xf32>
    %cst_254 = arith.constant 0.333333343 : f32
    %653 = vector.broadcast %cst_254 : f32 to vector<2x8x32xf32>
    %654 = arith.mulf %652, %653 : vector<2x8x32xf32>
    %cst_255 = arith.constant 7.000000e+00 : f32
    %655 = vector.broadcast %cst_255 : f32 to vector<2x8x32xf32>
    %656 = arith.subf %352, %655 : vector<2x8x32xf32>
    %657 = arith.mulf %656, %582 : vector<2x8x32xf32>
    %cst_256 = arith.constant 1.100000e+01 : f32
    %658 = vector.broadcast %cst_256 : f32 to vector<2x8x32xf32>
    %659 = arith.subf %352, %658 : vector<2x8x32xf32>
    %660 = arith.mulf %659, %591 : vector<2x8x32xf32>
    %661 = arith.subf %657, %660 : vector<2x8x32xf32>
    %cst_257 = arith.constant 0.333333343 : f32
    %662 = vector.broadcast %cst_257 : f32 to vector<2x8x32xf32>
    %663 = arith.mulf %661, %662 : vector<2x8x32xf32>
    %664 = vector.extract_strided_slice %342 {offsets = [0, 0, 0], sizes = [1, 8, 1], strides = [1, 1, 1]} : vector<9x8x1xf32> to vector<1x8x1xf32>
    %665 = vector.shape_cast %664 : vector<1x8x1xf32> to vector<8x1xf32>
    %666 = vector.shape_cast %665 : vector<8x1xf32> to vector<1x8x1xf32>
    %667 = vector.broadcast %666 : vector<1x8x1xf32> to vector<2x8x32xf32>
    %668 = arith.mulf %348, %667 : vector<2x8x32xf32>
    %669 = vector.extract_strided_slice %342 {offsets = [1, 0, 0], sizes = [1, 8, 1], strides = [1, 1, 1]} : vector<9x8x1xf32> to vector<1x8x1xf32>
    %670 = vector.shape_cast %669 : vector<1x8x1xf32> to vector<8x1xf32>
    %671 = vector.shape_cast %670 : vector<8x1xf32> to vector<1x8x1xf32>
    %672 = vector.broadcast %671 : vector<1x8x1xf32> to vector<2x8x32xf32>
    %673 = arith.mulf %600, %672 : vector<2x8x32xf32>
    %674 = arith.addf %668, %673 : vector<2x8x32xf32>
    %675 = vector.extract_strided_slice %342 {offsets = [2, 0, 0], sizes = [1, 8, 1], strides = [1, 1, 1]} : vector<9x8x1xf32> to vector<1x8x1xf32>
    %676 = vector.shape_cast %675 : vector<1x8x1xf32> to vector<8x1xf32>
    %677 = vector.shape_cast %676 : vector<8x1xf32> to vector<1x8x1xf32>
    %678 = vector.broadcast %677 : vector<1x8x1xf32> to vector<2x8x32xf32>
    %679 = arith.mulf %609, %678 : vector<2x8x32xf32>
    %680 = arith.addf %674, %679 : vector<2x8x32xf32>
    %681 = vector.extract_strided_slice %342 {offsets = [3, 0, 0], sizes = [1, 8, 1], strides = [1, 1, 1]} : vector<9x8x1xf32> to vector<1x8x1xf32>
    %682 = vector.shape_cast %681 : vector<1x8x1xf32> to vector<8x1xf32>
    %683 = vector.shape_cast %682 : vector<8x1xf32> to vector<1x8x1xf32>
    %684 = vector.broadcast %683 : vector<1x8x1xf32> to vector<2x8x32xf32>
    %685 = arith.mulf %618, %684 : vector<2x8x32xf32>
    %686 = arith.addf %680, %685 : vector<2x8x32xf32>
    %687 = vector.extract_strided_slice %342 {offsets = [4, 0, 0], sizes = [1, 8, 1], strides = [1, 1, 1]} : vector<9x8x1xf32> to vector<1x8x1xf32>
    %688 = vector.shape_cast %687 : vector<1x8x1xf32> to vector<8x1xf32>
    %689 = vector.shape_cast %688 : vector<8x1xf32> to vector<1x8x1xf32>
    %690 = vector.broadcast %689 : vector<1x8x1xf32> to vector<2x8x32xf32>
    %691 = arith.mulf %627, %690 : vector<2x8x32xf32>
    %692 = arith.addf %686, %691 : vector<2x8x32xf32>
    %693 = vector.extract_strided_slice %342 {offsets = [5, 0, 0], sizes = [1, 8, 1], strides = [1, 1, 1]} : vector<9x8x1xf32> to vector<1x8x1xf32>
    %694 = vector.shape_cast %693 : vector<1x8x1xf32> to vector<8x1xf32>
    %695 = vector.shape_cast %694 : vector<8x1xf32> to vector<1x8x1xf32>
    %696 = vector.broadcast %695 : vector<1x8x1xf32> to vector<2x8x32xf32>
    %697 = arith.mulf %636, %696 : vector<2x8x32xf32>
    %698 = arith.addf %692, %697 : vector<2x8x32xf32>
    %699 = vector.extract_strided_slice %342 {offsets = [6, 0, 0], sizes = [1, 8, 1], strides = [1, 1, 1]} : vector<9x8x1xf32> to vector<1x8x1xf32>
    %700 = vector.shape_cast %699 : vector<1x8x1xf32> to vector<8x1xf32>
    %701 = vector.shape_cast %700 : vector<8x1xf32> to vector<1x8x1xf32>
    %702 = vector.broadcast %701 : vector<1x8x1xf32> to vector<2x8x32xf32>
    %703 = arith.mulf %645, %702 : vector<2x8x32xf32>
    %704 = arith.addf %698, %703 : vector<2x8x32xf32>
    %705 = vector.extract_strided_slice %342 {offsets = [7, 0, 0], sizes = [1, 8, 1], strides = [1, 1, 1]} : vector<9x8x1xf32> to vector<1x8x1xf32>
    %706 = vector.shape_cast %705 : vector<1x8x1xf32> to vector<8x1xf32>
    %707 = vector.shape_cast %706 : vector<8x1xf32> to vector<1x8x1xf32>
    %708 = vector.broadcast %707 : vector<1x8x1xf32> to vector<2x8x32xf32>
    %709 = arith.mulf %654, %708 : vector<2x8x32xf32>
    %710 = arith.addf %704, %709 : vector<2x8x32xf32>
    %711 = vector.extract_strided_slice %342 {offsets = [8, 0, 0], sizes = [1, 8, 1], strides = [1, 1, 1]} : vector<9x8x1xf32> to vector<1x8x1xf32>
    %712 = vector.shape_cast %711 : vector<1x8x1xf32> to vector<8x1xf32>
    %713 = vector.shape_cast %712 : vector<8x1xf32> to vector<1x8x1xf32>
    %714 = vector.broadcast %713 : vector<1x8x1xf32> to vector<2x8x32xf32>
    %715 = arith.mulf %663, %714 : vector<2x8x32xf32>
    %716 = arith.addf %710, %715 : vector<2x8x32xf32>
    %cst_258 = arith.constant dense<0.000000e+00> : vector<2x32xf32>
    %717 = vector.multi_reduction <add>, %716, %cst_258 [1] : vector<2x8x32xf32> to vector<2x32xf32>
    %718 = vector.shape_cast %717 : vector<2x32xf32> to vector<2x1x32xf32>
    %c0_259 = arith.constant 0 : index
    %c0_260 = arith.constant 0 : index
    %c0_261 = arith.constant 0 : index
    %719 = vector.load %arg7[%c0_259, %c0_260, %c0_261] : memref<2x1x32xf32, #tpu.memory_space<vmem>>, vector<2x1x32xf32>
    tpu.vector_store %arg7[%c0_259, %c0_260, %c0_261], %718 {strides = array<i32>} : memref<2x1x32xf32, #tpu.memory_space<vmem>>, vector<2x1x32xf32>,
    %c0_262 = arith.constant 0 : index
    %c0_263 = arith.constant 0 : index
    %c0_264 = arith.constant 0 : index
    %720 = vector.load %arg4[%c0_262, %c0_263, %c0_264] : memref<9x8x1xf32, #tpu.memory_space<vmem>>, vector<9x8x1xf32>
    %721 = arith.negf %718 : vector<2x1x32xf32>
    %722 = math.exp %721 : vector<2x1x32xf32>
    %cst_265 = arith.constant 1.000000e+00 : f32
    %723 = vector.broadcast %cst_265 : f32 to vector<2x1x32xf32>
    %724 = arith.addf %723, %722 : vector<2x1x32xf32>
    %725 = arith.divf %723, %724 : vector<2x1x32xf32>
    %726 = arith.mulf %718, %725 : vector<2x1x32xf32>
    %cst_266 = arith.constant -2.200000e+00 : f32
    %727 = vector.broadcast %cst_266 : f32 to vector<2x1x32xf32>
    %728 = arith.subf %718, %727 : vector<2x1x32xf32>
    %cst_267 = arith.constant 2.500000e+00 : f32
    %729 = vector.broadcast %cst_267 : f32 to vector<2x1x32xf32>
    %730 = arith.mulf %728, %729 : vector<2x1x32xf32>
    %cst_268 = arith.constant 0.000000e+00 : f32
    %731 = vector.broadcast %cst_268 : f32 to vector<2x1x32xf32>
    %732 = arith.cmpf oge, %730, %731 : vector<2x1x32xf32>
    %cst_269 = arith.constant 1.000000e+00 : f32
    %733 = vector.broadcast %cst_269 : f32 to vector<2x1x32xf32>
    %734 = arith.cmpf olt, %730, %733 : vector<2x1x32xf32>
    %735 = arith.andi %732, %734 : vector<2x1x32xi1>
    %cst_270 = arith.constant 1.000000e+00 : f32
    %cst_271 = arith.constant 0.000000e+00 : f32
    %736 = vector.broadcast %cst_270 : f32 to vector<2x1x32xf32>
    %737 = vector.broadcast %cst_271 : f32 to vector<2x1x32xf32>
    %738 = arith.select %735, %736, %737 : vector<2x1x32xi1>, vector<2x1x32xf32>
    %cst_272 = arith.constant 1.000000e+00 : f32
    %739 = vector.broadcast %cst_272 : f32 to vector<2x1x32xf32>
    %740 = arith.cmpf oge, %730, %739 : vector<2x1x32xf32>
    %cst_273 = arith.constant 2.000000e+00 : f32
    %741 = vector.broadcast %cst_273 : f32 to vector<2x1x32xf32>
    %742 = arith.cmpf olt, %730, %741 : vector<2x1x32xf32>
    %743 = arith.andi %740, %742 : vector<2x1x32xi1>
    %cst_274 = arith.constant 1.000000e+00 : f32
    %cst_275 = arith.constant 0.000000e+00 : f32
    %744 = vector.broadcast %cst_274 : f32 to vector<2x1x32xf32>
    %745 = vector.broadcast %cst_275 : f32 to vector<2x1x32xf32>
    %746 = arith.select %743, %744, %745 : vector<2x1x32xi1>, vector<2x1x32xf32>
    %cst_276 = arith.constant 2.000000e+00 : f32
    %747 = vector.broadcast %cst_276 : f32 to vector<2x1x32xf32>
    %748 = arith.cmpf oge, %730, %747 : vector<2x1x32xf32>
    %cst_277 = arith.constant 3.000000e+00 : f32
    %749 = vector.broadcast %cst_277 : f32 to vector<2x1x32xf32>
    %750 = arith.cmpf olt, %730, %749 : vector<2x1x32xf32>
    %751 = arith.andi %748, %750 : vector<2x1x32xi1>
    %cst_278 = arith.constant 1.000000e+00 : f32
    %cst_279 = arith.constant 0.000000e+00 : f32
    %752 = vector.broadcast %cst_278 : f32 to vector<2x1x32xf32>
    %753 = vector.broadcast %cst_279 : f32 to vector<2x1x32xf32>
    %754 = arith.select %751, %752, %753 : vector<2x1x32xi1>, vector<2x1x32xf32>
    %cst_280 = arith.constant 3.000000e+00 : f32
    %755 = vector.broadcast %cst_280 : f32 to vector<2x1x32xf32>
    %756 = arith.cmpf oge, %730, %755 : vector<2x1x32xf32>
    %cst_281 = arith.constant 4.000000e+00 : f32
    %757 = vector.broadcast %cst_281 : f32 to vector<2x1x32xf32>
    %758 = arith.cmpf olt, %730, %757 : vector<2x1x32xf32>
    %759 = arith.andi %756, %758 : vector<2x1x32xi1>
    %cst_282 = arith.constant 1.000000e+00 : f32
    %cst_283 = arith.constant 0.000000e+00 : f32
    %760 = vector.broadcast %cst_282 : f32 to vector<2x1x32xf32>
    %761 = vector.broadcast %cst_283 : f32 to vector<2x1x32xf32>
    %762 = arith.select %759, %760, %761 : vector<2x1x32xi1>, vector<2x1x32xf32>
    %cst_284 = arith.constant 4.000000e+00 : f32
    %763 = vector.broadcast %cst_284 : f32 to vector<2x1x32xf32>
    %764 = arith.cmpf oge, %730, %763 : vector<2x1x32xf32>
    %cst_285 = arith.constant 5.000000e+00 : f32
    %765 = vector.broadcast %cst_285 : f32 to vector<2x1x32xf32>
    %766 = arith.cmpf olt, %730, %765 : vector<2x1x32xf32>
    %767 = arith.andi %764, %766 : vector<2x1x32xi1>
    %cst_286 = arith.constant 1.000000e+00 : f32
    %cst_287 = arith.constant 0.000000e+00 : f32
    %768 = vector.broadcast %cst_286 : f32 to vector<2x1x32xf32>
    %769 = vector.broadcast %cst_287 : f32 to vector<2x1x32xf32>
    %770 = arith.select %767, %768, %769 : vector<2x1x32xi1>, vector<2x1x32xf32>
    %cst_288 = arith.constant 5.000000e+00 : f32
    %771 = vector.broadcast %cst_288 : f32 to vector<2x1x32xf32>
    %772 = arith.cmpf oge, %730, %771 : vector<2x1x32xf32>
    %cst_289 = arith.constant 6.000000e+00 : f32
    %773 = vector.broadcast %cst_289 : f32 to vector<2x1x32xf32>
    %774 = arith.cmpf olt, %730, %773 : vector<2x1x32xf32>
    %775 = arith.andi %772, %774 : vector<2x1x32xi1>
    %cst_290 = arith.constant 1.000000e+00 : f32
    %cst_291 = arith.constant 0.000000e+00 : f32
    %776 = vector.broadcast %cst_290 : f32 to vector<2x1x32xf32>
    %777 = vector.broadcast %cst_291 : f32 to vector<2x1x32xf32>
    %778 = arith.select %775, %776, %777 : vector<2x1x32xi1>, vector<2x1x32xf32>
    %cst_292 = arith.constant 6.000000e+00 : f32
    %779 = vector.broadcast %cst_292 : f32 to vector<2x1x32xf32>
    %780 = arith.cmpf oge, %730, %779 : vector<2x1x32xf32>
    %cst_293 = arith.constant 7.000000e+00 : f32
    %781 = vector.broadcast %cst_293 : f32 to vector<2x1x32xf32>
    %782 = arith.cmpf olt, %730, %781 : vector<2x1x32xf32>
    %783 = arith.andi %780, %782 : vector<2x1x32xi1>
    %cst_294 = arith.constant 1.000000e+00 : f32
    %cst_295 = arith.constant 0.000000e+00 : f32
    %784 = vector.broadcast %cst_294 : f32 to vector<2x1x32xf32>
    %785 = vector.broadcast %cst_295 : f32 to vector<2x1x32xf32>
    %786 = arith.select %783, %784, %785 : vector<2x1x32xi1>, vector<2x1x32xf32>
    %cst_296 = arith.constant 7.000000e+00 : f32
    %787 = vector.broadcast %cst_296 : f32 to vector<2x1x32xf32>
    %788 = arith.cmpf oge, %730, %787 : vector<2x1x32xf32>
    %cst_297 = arith.constant 8.000000e+00 : f32
    %789 = vector.broadcast %cst_297 : f32 to vector<2x1x32xf32>
    %790 = arith.cmpf olt, %730, %789 : vector<2x1x32xf32>
    %791 = arith.andi %788, %790 : vector<2x1x32xi1>
    %cst_298 = arith.constant 1.000000e+00 : f32
    %cst_299 = arith.constant 0.000000e+00 : f32
    %792 = vector.broadcast %cst_298 : f32 to vector<2x1x32xf32>
    %793 = vector.broadcast %cst_299 : f32 to vector<2x1x32xf32>
    %794 = arith.select %791, %792, %793 : vector<2x1x32xi1>, vector<2x1x32xf32>
    %cst_300 = arith.constant 8.000000e+00 : f32
    %795 = vector.broadcast %cst_300 : f32 to vector<2x1x32xf32>
    %796 = arith.cmpf oge, %730, %795 : vector<2x1x32xf32>
    %cst_301 = arith.constant 9.000000e+00 : f32
    %797 = vector.broadcast %cst_301 : f32 to vector<2x1x32xf32>
    %798 = arith.cmpf olt, %730, %797 : vector<2x1x32xf32>
    %799 = arith.andi %796, %798 : vector<2x1x32xi1>
    %cst_302 = arith.constant 1.000000e+00 : f32
    %cst_303 = arith.constant 0.000000e+00 : f32
    %800 = vector.broadcast %cst_302 : f32 to vector<2x1x32xf32>
    %801 = vector.broadcast %cst_303 : f32 to vector<2x1x32xf32>
    %802 = arith.select %799, %800, %801 : vector<2x1x32xi1>, vector<2x1x32xf32>
    %cst_304 = arith.constant 9.000000e+00 : f32
    %803 = vector.broadcast %cst_304 : f32 to vector<2x1x32xf32>
    %804 = arith.cmpf oge, %730, %803 : vector<2x1x32xf32>
    %cst_305 = arith.constant 1.000000e+01 : f32
    %805 = vector.broadcast %cst_305 : f32 to vector<2x1x32xf32>
    %806 = arith.cmpf olt, %730, %805 : vector<2x1x32xf32>
    %807 = arith.andi %804, %806 : vector<2x1x32xi1>
    %cst_306 = arith.constant 1.000000e+00 : f32
    %cst_307 = arith.constant 0.000000e+00 : f32
    %808 = vector.broadcast %cst_306 : f32 to vector<2x1x32xf32>
    %809 = vector.broadcast %cst_307 : f32 to vector<2x1x32xf32>
    %810 = arith.select %807, %808, %809 : vector<2x1x32xi1>, vector<2x1x32xf32>
    %cst_308 = arith.constant 1.000000e+01 : f32
    %811 = vector.broadcast %cst_308 : f32 to vector<2x1x32xf32>
    %812 = arith.cmpf oge, %730, %811 : vector<2x1x32xf32>
    %cst_309 = arith.constant 1.100000e+01 : f32
    %813 = vector.broadcast %cst_309 : f32 to vector<2x1x32xf32>
    %814 = arith.cmpf olt, %730, %813 : vector<2x1x32xf32>
    %815 = arith.andi %812, %814 : vector<2x1x32xi1>
    %cst_310 = arith.constant 1.000000e+00 : f32
    %cst_311 = arith.constant 0.000000e+00 : f32
    %816 = vector.broadcast %cst_310 : f32 to vector<2x1x32xf32>
    %817 = vector.broadcast %cst_311 : f32 to vector<2x1x32xf32>
    %818 = arith.select %815, %816, %817 : vector<2x1x32xi1>, vector<2x1x32xf32>
    %cst_312 = arith.constant 0.000000e+00 : f32
    %819 = vector.broadcast %cst_312 : f32 to vector<2x1x32xf32>
    %820 = arith.subf %730, %819 : vector<2x1x32xf32>
    %821 = arith.mulf %820, %738 : vector<2x1x32xf32>
    %cst_313 = arith.constant 2.000000e+00 : f32
    %822 = vector.broadcast %cst_313 : f32 to vector<2x1x32xf32>
    %823 = arith.subf %730, %822 : vector<2x1x32xf32>
    %824 = arith.mulf %823, %746 : vector<2x1x32xf32>
    %825 = arith.subf %821, %824 : vector<2x1x32xf32>
    %cst_314 = arith.constant 1.000000e+00 : f32
    %826 = vector.broadcast %cst_314 : f32 to vector<2x1x32xf32>
    %827 = arith.subf %730, %826 : vector<2x1x32xf32>
    %828 = arith.mulf %827, %746 : vector<2x1x32xf32>
    %cst_315 = arith.constant 3.000000e+00 : f32
    %829 = vector.broadcast %cst_315 : f32 to vector<2x1x32xf32>
    %830 = arith.subf %730, %829 : vector<2x1x32xf32>
    %831 = arith.mulf %830, %754 : vector<2x1x32xf32>
    %832 = arith.subf %828, %831 : vector<2x1x32xf32>
    %cst_316 = arith.constant 2.000000e+00 : f32
    %833 = vector.broadcast %cst_316 : f32 to vector<2x1x32xf32>
    %834 = arith.subf %730, %833 : vector<2x1x32xf32>
    %835 = arith.mulf %834, %754 : vector<2x1x32xf32>
    %cst_317 = arith.constant 4.000000e+00 : f32
    %836 = vector.broadcast %cst_317 : f32 to vector<2x1x32xf32>
    %837 = arith.subf %730, %836 : vector<2x1x32xf32>
    %838 = arith.mulf %837, %762 : vector<2x1x32xf32>
    %839 = arith.subf %835, %838 : vector<2x1x32xf32>
    %cst_318 = arith.constant 3.000000e+00 : f32
    %840 = vector.broadcast %cst_318 : f32 to vector<2x1x32xf32>
    %841 = arith.subf %730, %840 : vector<2x1x32xf32>
    %842 = arith.mulf %841, %762 : vector<2x1x32xf32>
    %cst_319 = arith.constant 5.000000e+00 : f32
    %843 = vector.broadcast %cst_319 : f32 to vector<2x1x32xf32>
    %844 = arith.subf %730, %843 : vector<2x1x32xf32>
    %845 = arith.mulf %844, %770 : vector<2x1x32xf32>
    %846 = arith.subf %842, %845 : vector<2x1x32xf32>
    %cst_320 = arith.constant 4.000000e+00 : f32
    %847 = vector.broadcast %cst_320 : f32 to vector<2x1x32xf32>
    %848 = arith.subf %730, %847 : vector<2x1x32xf32>
    %849 = arith.mulf %848, %770 : vector<2x1x32xf32>
    %cst_321 = arith.constant 6.000000e+00 : f32
    %850 = vector.broadcast %cst_321 : f32 to vector<2x1x32xf32>
    %851 = arith.subf %730, %850 : vector<2x1x32xf32>
    %852 = arith.mulf %851, %778 : vector<2x1x32xf32>
    %853 = arith.subf %849, %852 : vector<2x1x32xf32>
    %cst_322 = arith.constant 5.000000e+00 : f32
    %854 = vector.broadcast %cst_322 : f32 to vector<2x1x32xf32>
    %855 = arith.subf %730, %854 : vector<2x1x32xf32>
    %856 = arith.mulf %855, %778 : vector<2x1x32xf32>
    %cst_323 = arith.constant 7.000000e+00 : f32
    %857 = vector.broadcast %cst_323 : f32 to vector<2x1x32xf32>
    %858 = arith.subf %730, %857 : vector<2x1x32xf32>
    %859 = arith.mulf %858, %786 : vector<2x1x32xf32>
    %860 = arith.subf %856, %859 : vector<2x1x32xf32>
    %cst_324 = arith.constant 6.000000e+00 : f32
    %861 = vector.broadcast %cst_324 : f32 to vector<2x1x32xf32>
    %862 = arith.subf %730, %861 : vector<2x1x32xf32>
    %863 = arith.mulf %862, %786 : vector<2x1x32xf32>
    %cst_325 = arith.constant 8.000000e+00 : f32
    %864 = vector.broadcast %cst_325 : f32 to vector<2x1x32xf32>
    %865 = arith.subf %730, %864 : vector<2x1x32xf32>
    %866 = arith.mulf %865, %794 : vector<2x1x32xf32>
    %867 = arith.subf %863, %866 : vector<2x1x32xf32>
    %cst_326 = arith.constant 7.000000e+00 : f32
    %868 = vector.broadcast %cst_326 : f32 to vector<2x1x32xf32>
    %869 = arith.subf %730, %868 : vector<2x1x32xf32>
    %870 = arith.mulf %869, %794 : vector<2x1x32xf32>
    %cst_327 = arith.constant 9.000000e+00 : f32
    %871 = vector.broadcast %cst_327 : f32 to vector<2x1x32xf32>
    %872 = arith.subf %730, %871 : vector<2x1x32xf32>
    %873 = arith.mulf %872, %802 : vector<2x1x32xf32>
    %874 = arith.subf %870, %873 : vector<2x1x32xf32>
    %cst_328 = arith.constant 8.000000e+00 : f32
    %875 = vector.broadcast %cst_328 : f32 to vector<2x1x32xf32>
    %876 = arith.subf %730, %875 : vector<2x1x32xf32>
    %877 = arith.mulf %876, %802 : vector<2x1x32xf32>
    %cst_329 = arith.constant 1.000000e+01 : f32
    %878 = vector.broadcast %cst_329 : f32 to vector<2x1x32xf32>
    %879 = arith.subf %730, %878 : vector<2x1x32xf32>
    %880 = arith.mulf %879, %810 : vector<2x1x32xf32>
    %881 = arith.subf %877, %880 : vector<2x1x32xf32>
    %cst_330 = arith.constant 9.000000e+00 : f32
    %882 = vector.broadcast %cst_330 : f32 to vector<2x1x32xf32>
    %883 = arith.subf %730, %882 : vector<2x1x32xf32>
    %884 = arith.mulf %883, %810 : vector<2x1x32xf32>
    %cst_331 = arith.constant 1.100000e+01 : f32
    %885 = vector.broadcast %cst_331 : f32 to vector<2x1x32xf32>
    %886 = arith.subf %730, %885 : vector<2x1x32xf32>
    %887 = arith.mulf %886, %818 : vector<2x1x32xf32>
    %888 = arith.subf %884, %887 : vector<2x1x32xf32>
    %cst_332 = arith.constant 0.000000e+00 : f32
    %889 = vector.broadcast %cst_332 : f32 to vector<2x1x32xf32>
    %890 = arith.subf %730, %889 : vector<2x1x32xf32>
    %891 = arith.mulf %890, %825 : vector<2x1x32xf32>
    %cst_333 = arith.constant 3.000000e+00 : f32
    %892 = vector.broadcast %cst_333 : f32 to vector<2x1x32xf32>
    %893 = arith.subf %730, %892 : vector<2x1x32xf32>
    %894 = arith.mulf %893, %832 : vector<2x1x32xf32>
    %895 = arith.subf %891, %894 : vector<2x1x32xf32>
    %cst_334 = arith.constant 5.000000e-01 : f32
    %896 = vector.broadcast %cst_334 : f32 to vector<2x1x32xf32>
    %897 = arith.mulf %895, %896 : vector<2x1x32xf32>
    %cst_335 = arith.constant 1.000000e+00 : f32
    %898 = vector.broadcast %cst_335 : f32 to vector<2x1x32xf32>
    %899 = arith.subf %730, %898 : vector<2x1x32xf32>
    %900 = arith.mulf %899, %832 : vector<2x1x32xf32>
    %cst_336 = arith.constant 4.000000e+00 : f32
    %901 = vector.broadcast %cst_336 : f32 to vector<2x1x32xf32>
    %902 = arith.subf %730, %901 : vector<2x1x32xf32>
    %903 = arith.mulf %902, %839 : vector<2x1x32xf32>
    %904 = arith.subf %900, %903 : vector<2x1x32xf32>
    %cst_337 = arith.constant 5.000000e-01 : f32
    %905 = vector.broadcast %cst_337 : f32 to vector<2x1x32xf32>
    %906 = arith.mulf %904, %905 : vector<2x1x32xf32>
    %cst_338 = arith.constant 2.000000e+00 : f32
    %907 = vector.broadcast %cst_338 : f32 to vector<2x1x32xf32>
    %908 = arith.subf %730, %907 : vector<2x1x32xf32>
    %909 = arith.mulf %908, %839 : vector<2x1x32xf32>
    %cst_339 = arith.constant 5.000000e+00 : f32
    %910 = vector.broadcast %cst_339 : f32 to vector<2x1x32xf32>
    %911 = arith.subf %730, %910 : vector<2x1x32xf32>
    %912 = arith.mulf %911, %846 : vector<2x1x32xf32>
    %913 = arith.subf %909, %912 : vector<2x1x32xf32>
    %cst_340 = arith.constant 5.000000e-01 : f32
    %914 = vector.broadcast %cst_340 : f32 to vector<2x1x32xf32>
    %915 = arith.mulf %913, %914 : vector<2x1x32xf32>
    %cst_341 = arith.constant 3.000000e+00 : f32
    %916 = vector.broadcast %cst_341 : f32 to vector<2x1x32xf32>
    %917 = arith.subf %730, %916 : vector<2x1x32xf32>
    %918 = arith.mulf %917, %846 : vector<2x1x32xf32>
    %cst_342 = arith.constant 6.000000e+00 : f32
    %919 = vector.broadcast %cst_342 : f32 to vector<2x1x32xf32>
    %920 = arith.subf %730, %919 : vector<2x1x32xf32>
    %921 = arith.mulf %920, %853 : vector<2x1x32xf32>
    %922 = arith.subf %918, %921 : vector<2x1x32xf32>
    %cst_343 = arith.constant 5.000000e-01 : f32
    %923 = vector.broadcast %cst_343 : f32 to vector<2x1x32xf32>
    %924 = arith.mulf %922, %923 : vector<2x1x32xf32>
    %cst_344 = arith.constant 4.000000e+00 : f32
    %925 = vector.broadcast %cst_344 : f32 to vector<2x1x32xf32>
    %926 = arith.subf %730, %925 : vector<2x1x32xf32>
    %927 = arith.mulf %926, %853 : vector<2x1x32xf32>
    %cst_345 = arith.constant 7.000000e+00 : f32
    %928 = vector.broadcast %cst_345 : f32 to vector<2x1x32xf32>
    %929 = arith.subf %730, %928 : vector<2x1x32xf32>
    %930 = arith.mulf %929, %860 : vector<2x1x32xf32>
    %931 = arith.subf %927, %930 : vector<2x1x32xf32>
    %cst_346 = arith.constant 5.000000e-01 : f32
    %932 = vector.broadcast %cst_346 : f32 to vector<2x1x32xf32>
    %933 = arith.mulf %931, %932 : vector<2x1x32xf32>
    %cst_347 = arith.constant 5.000000e+00 : f32
    %934 = vector.broadcast %cst_347 : f32 to vector<2x1x32xf32>
    %935 = arith.subf %730, %934 : vector<2x1x32xf32>
    %936 = arith.mulf %935, %860 : vector<2x1x32xf32>
    %cst_348 = arith.constant 8.000000e+00 : f32
    %937 = vector.broadcast %cst_348 : f32 to vector<2x1x32xf32>
    %938 = arith.subf %730, %937 : vector<2x1x32xf32>
    %939 = arith.mulf %938, %867 : vector<2x1x32xf32>
    %940 = arith.subf %936, %939 : vector<2x1x32xf32>
    %cst_349 = arith.constant 5.000000e-01 : f32
    %941 = vector.broadcast %cst_349 : f32 to vector<2x1x32xf32>
    %942 = arith.mulf %940, %941 : vector<2x1x32xf32>
    %cst_350 = arith.constant 6.000000e+00 : f32
    %943 = vector.broadcast %cst_350 : f32 to vector<2x1x32xf32>
    %944 = arith.subf %730, %943 : vector<2x1x32xf32>
    %945 = arith.mulf %944, %867 : vector<2x1x32xf32>
    %cst_351 = arith.constant 9.000000e+00 : f32
    %946 = vector.broadcast %cst_351 : f32 to vector<2x1x32xf32>
    %947 = arith.subf %730, %946 : vector<2x1x32xf32>
    %948 = arith.mulf %947, %874 : vector<2x1x32xf32>
    %949 = arith.subf %945, %948 : vector<2x1x32xf32>
    %cst_352 = arith.constant 5.000000e-01 : f32
    %950 = vector.broadcast %cst_352 : f32 to vector<2x1x32xf32>
    %951 = arith.mulf %949, %950 : vector<2x1x32xf32>
    %cst_353 = arith.constant 7.000000e+00 : f32
    %952 = vector.broadcast %cst_353 : f32 to vector<2x1x32xf32>
    %953 = arith.subf %730, %952 : vector<2x1x32xf32>
    %954 = arith.mulf %953, %874 : vector<2x1x32xf32>
    %cst_354 = arith.constant 1.000000e+01 : f32
    %955 = vector.broadcast %cst_354 : f32 to vector<2x1x32xf32>
    %956 = arith.subf %730, %955 : vector<2x1x32xf32>
    %957 = arith.mulf %956, %881 : vector<2x1x32xf32>
    %958 = arith.subf %954, %957 : vector<2x1x32xf32>
    %cst_355 = arith.constant 5.000000e-01 : f32
    %959 = vector.broadcast %cst_355 : f32 to vector<2x1x32xf32>
    %960 = arith.mulf %958, %959 : vector<2x1x32xf32>
    %cst_356 = arith.constant 8.000000e+00 : f32
    %961 = vector.broadcast %cst_356 : f32 to vector<2x1x32xf32>
    %962 = arith.subf %730, %961 : vector<2x1x32xf32>
    %963 = arith.mulf %962, %881 : vector<2x1x32xf32>
    %cst_357 = arith.constant 1.100000e+01 : f32
    %964 = vector.broadcast %cst_357 : f32 to vector<2x1x32xf32>
    %965 = arith.subf %730, %964 : vector<2x1x32xf32>
    %966 = arith.mulf %965, %888 : vector<2x1x32xf32>
    %967 = arith.subf %963, %966 : vector<2x1x32xf32>
    %cst_358 = arith.constant 5.000000e-01 : f32
    %968 = vector.broadcast %cst_358 : f32 to vector<2x1x32xf32>
    %969 = arith.mulf %967, %968 : vector<2x1x32xf32>
    %cst_359 = arith.constant 0.000000e+00 : f32
    %970 = vector.broadcast %cst_359 : f32 to vector<2x1x32xf32>
    %971 = arith.subf %730, %970 : vector<2x1x32xf32>
    %972 = arith.mulf %971, %897 : vector<2x1x32xf32>
    %cst_360 = arith.constant 4.000000e+00 : f32
    %973 = vector.broadcast %cst_360 : f32 to vector<2x1x32xf32>
    %974 = arith.subf %730, %973 : vector<2x1x32xf32>
    %975 = arith.mulf %974, %906 : vector<2x1x32xf32>
    %976 = arith.subf %972, %975 : vector<2x1x32xf32>
    %cst_361 = arith.constant 0.333333343 : f32
    %977 = vector.broadcast %cst_361 : f32 to vector<2x1x32xf32>
    %978 = arith.mulf %976, %977 : vector<2x1x32xf32>
    %cst_362 = arith.constant 1.000000e+00 : f32
    %979 = vector.broadcast %cst_362 : f32 to vector<2x1x32xf32>
    %980 = arith.subf %730, %979 : vector<2x1x32xf32>
    %981 = arith.mulf %980, %906 : vector<2x1x32xf32>
    %cst_363 = arith.constant 5.000000e+00 : f32
    %982 = vector.broadcast %cst_363 : f32 to vector<2x1x32xf32>
    %983 = arith.subf %730, %982 : vector<2x1x32xf32>
    %984 = arith.mulf %983, %915 : vector<2x1x32xf32>
    %985 = arith.subf %981, %984 : vector<2x1x32xf32>
    %cst_364 = arith.constant 0.333333343 : f32
    %986 = vector.broadcast %cst_364 : f32 to vector<2x1x32xf32>
    %987 = arith.mulf %985, %986 : vector<2x1x32xf32>
    %cst_365 = arith.constant 2.000000e+00 : f32
    %988 = vector.broadcast %cst_365 : f32 to vector<2x1x32xf32>
    %989 = arith.subf %730, %988 : vector<2x1x32xf32>
    %990 = arith.mulf %989, %915 : vector<2x1x32xf32>
    %cst_366 = arith.constant 6.000000e+00 : f32
    %991 = vector.broadcast %cst_366 : f32 to vector<2x1x32xf32>
    %992 = arith.subf %730, %991 : vector<2x1x32xf32>
    %993 = arith.mulf %992, %924 : vector<2x1x32xf32>
    %994 = arith.subf %990, %993 : vector<2x1x32xf32>
    %cst_367 = arith.constant 0.333333343 : f32
    %995 = vector.broadcast %cst_367 : f32 to vector<2x1x32xf32>
    %996 = arith.mulf %994, %995 : vector<2x1x32xf32>
    %cst_368 = arith.constant 3.000000e+00 : f32
    %997 = vector.broadcast %cst_368 : f32 to vector<2x1x32xf32>
    %998 = arith.subf %730, %997 : vector<2x1x32xf32>
    %999 = arith.mulf %998, %924 : vector<2x1x32xf32>
    %cst_369 = arith.constant 7.000000e+00 : f32
    %1000 = vector.broadcast %cst_369 : f32 to vector<2x1x32xf32>
    %1001 = arith.subf %730, %1000 : vector<2x1x32xf32>
    %1002 = arith.mulf %1001, %933 : vector<2x1x32xf32>
    %1003 = arith.subf %999, %1002 : vector<2x1x32xf32>
    %cst_370 = arith.constant 0.333333343 : f32
    %1004 = vector.broadcast %cst_370 : f32 to vector<2x1x32xf32>
    %1005 = arith.mulf %1003, %1004 : vector<2x1x32xf32>
    %cst_371 = arith.constant 4.000000e+00 : f32
    %1006 = vector.broadcast %cst_371 : f32 to vector<2x1x32xf32>
    %1007 = arith.subf %730, %1006 : vector<2x1x32xf32>
    %1008 = arith.mulf %1007, %933 : vector<2x1x32xf32>
    %cst_372 = arith.constant 8.000000e+00 : f32
    %1009 = vector.broadcast %cst_372 : f32 to vector<2x1x32xf32>
    %1010 = arith.subf %730, %1009 : vector<2x1x32xf32>
    %1011 = arith.mulf %1010, %942 : vector<2x1x32xf32>
    %1012 = arith.subf %1008, %1011 : vector<2x1x32xf32>
    %cst_373 = arith.constant 0.333333343 : f32
    %1013 = vector.broadcast %cst_373 : f32 to vector<2x1x32xf32>
    %1014 = arith.mulf %1012, %1013 : vector<2x1x32xf32>
    %cst_374 = arith.constant 5.000000e+00 : f32
    %1015 = vector.broadcast %cst_374 : f32 to vector<2x1x32xf32>
    %1016 = arith.subf %730, %1015 : vector<2x1x32xf32>
    %1017 = arith.mulf %1016, %942 : vector<2x1x32xf32>
    %cst_375 = arith.constant 9.000000e+00 : f32
    %1018 = vector.broadcast %cst_375 : f32 to vector<2x1x32xf32>
    %1019 = arith.subf %730, %1018 : vector<2x1x32xf32>
    %1020 = arith.mulf %1019, %951 : vector<2x1x32xf32>
    %1021 = arith.subf %1017, %1020 : vector<2x1x32xf32>
    %cst_376 = arith.constant 0.333333343 : f32
    %1022 = vector.broadcast %cst_376 : f32 to vector<2x1x32xf32>
    %1023 = arith.mulf %1021, %1022 : vector<2x1x32xf32>
    %cst_377 = arith.constant 6.000000e+00 : f32
    %1024 = vector.broadcast %cst_377 : f32 to vector<2x1x32xf32>
    %1025 = arith.subf %730, %1024 : vector<2x1x32xf32>
    %1026 = arith.mulf %1025, %951 : vector<2x1x32xf32>
    %cst_378 = arith.constant 1.000000e+01 : f32
    %1027 = vector.broadcast %cst_378 : f32 to vector<2x1x32xf32>
    %1028 = arith.subf %730, %1027 : vector<2x1x32xf32>
    %1029 = arith.mulf %1028, %960 : vector<2x1x32xf32>
    %1030 = arith.subf %1026, %1029 : vector<2x1x32xf32>
    %cst_379 = arith.constant 0.333333343 : f32
    %1031 = vector.broadcast %cst_379 : f32 to vector<2x1x32xf32>
    %1032 = arith.mulf %1030, %1031 : vector<2x1x32xf32>
    %cst_380 = arith.constant 7.000000e+00 : f32
    %1033 = vector.broadcast %cst_380 : f32 to vector<2x1x32xf32>
    %1034 = arith.subf %730, %1033 : vector<2x1x32xf32>
    %1035 = arith.mulf %1034, %960 : vector<2x1x32xf32>
    %cst_381 = arith.constant 1.100000e+01 : f32
    %1036 = vector.broadcast %cst_381 : f32 to vector<2x1x32xf32>
    %1037 = arith.subf %730, %1036 : vector<2x1x32xf32>
    %1038 = arith.mulf %1037, %969 : vector<2x1x32xf32>
    %1039 = arith.subf %1035, %1038 : vector<2x1x32xf32>
    %cst_382 = arith.constant 0.333333343 : f32
    %1040 = vector.broadcast %cst_382 : f32 to vector<2x1x32xf32>
    %1041 = arith.mulf %1039, %1040 : vector<2x1x32xf32>
    %1042 = vector.extract_strided_slice %720 {offsets = [0, 0, 0], sizes = [1, 8, 1], strides = [1, 1, 1]} : vector<9x8x1xf32> to vector<1x8x1xf32>
    %1043 = vector.shape_cast %1042 : vector<1x8x1xf32> to vector<8x1xf32>
    %1044 = vector.shape_cast %1043 : vector<8x1xf32> to vector<1x8x1xf32>
    %1045 = vector.broadcast %726 : vector<2x1x32xf32> to vector<2x8x32xf32>
    %1046 = vector.broadcast %1044 : vector<1x8x1xf32> to vector<2x8x32xf32>
    %1047 = arith.mulf %1045, %1046 : vector<2x8x32xf32>
    %1048 = vector.extract_strided_slice %720 {offsets = [1, 0, 0], sizes = [1, 8, 1], strides = [1, 1, 1]} : vector<9x8x1xf32> to vector<1x8x1xf32>
    %1049 = vector.shape_cast %1048 : vector<1x8x1xf32> to vector<8x1xf32>
    %1050 = vector.shape_cast %1049 : vector<8x1xf32> to vector<1x8x1xf32>
    %1051 = vector.broadcast %978 : vector<2x1x32xf32> to vector<2x8x32xf32>
    %1052 = vector.broadcast %1050 : vector<1x8x1xf32> to vector<2x8x32xf32>
    %1053 = arith.mulf %1051, %1052 : vector<2x8x32xf32>
    %1054 = arith.addf %1047, %1053 : vector<2x8x32xf32>
    %1055 = vector.extract_strided_slice %720 {offsets = [2, 0, 0], sizes = [1, 8, 1], strides = [1, 1, 1]} : vector<9x8x1xf32> to vector<1x8x1xf32>
    %1056 = vector.shape_cast %1055 : vector<1x8x1xf32> to vector<8x1xf32>
    %1057 = vector.shape_cast %1056 : vector<8x1xf32> to vector<1x8x1xf32>
    %1058 = vector.broadcast %987 : vector<2x1x32xf32> to vector<2x8x32xf32>
    %1059 = vector.broadcast %1057 : vector<1x8x1xf32> to vector<2x8x32xf32>
    %1060 = arith.mulf %1058, %1059 : vector<2x8x32xf32>
    %1061 = arith.addf %1054, %1060 : vector<2x8x32xf32>
    %1062 = vector.extract_strided_slice %720 {offsets = [3, 0, 0], sizes = [1, 8, 1], strides = [1, 1, 1]} : vector<9x8x1xf32> to vector<1x8x1xf32>
    %1063 = vector.shape_cast %1062 : vector<1x8x1xf32> to vector<8x1xf32>
    %1064 = vector.shape_cast %1063 : vector<8x1xf32> to vector<1x8x1xf32>
    %1065 = vector.broadcast %996 : vector<2x1x32xf32> to vector<2x8x32xf32>
    %1066 = vector.broadcast %1064 : vector<1x8x1xf32> to vector<2x8x32xf32>
    %1067 = arith.mulf %1065, %1066 : vector<2x8x32xf32>
    %1068 = arith.addf %1061, %1067 : vector<2x8x32xf32>
    %1069 = vector.extract_strided_slice %720 {offsets = [4, 0, 0], sizes = [1, 8, 1], strides = [1, 1, 1]} : vector<9x8x1xf32> to vector<1x8x1xf32>
    %1070 = vector.shape_cast %1069 : vector<1x8x1xf32> to vector<8x1xf32>
    %1071 = vector.shape_cast %1070 : vector<8x1xf32> to vector<1x8x1xf32>
    %1072 = vector.broadcast %1005 : vector<2x1x32xf32> to vector<2x8x32xf32>
    %1073 = vector.broadcast %1071 : vector<1x8x1xf32> to vector<2x8x32xf32>
    %1074 = arith.mulf %1072, %1073 : vector<2x8x32xf32>
    %1075 = arith.addf %1068, %1074 : vector<2x8x32xf32>
    %1076 = vector.extract_strided_slice %720 {offsets = [5, 0, 0], sizes = [1, 8, 1], strides = [1, 1, 1]} : vector<9x8x1xf32> to vector<1x8x1xf32>
    %1077 = vector.shape_cast %1076 : vector<1x8x1xf32> to vector<8x1xf32>
    %1078 = vector.shape_cast %1077 : vector<8x1xf32> to vector<1x8x1xf32>
    %1079 = vector.broadcast %1014 : vector<2x1x32xf32> to vector<2x8x32xf32>
    %1080 = vector.broadcast %1078 : vector<1x8x1xf32> to vector<2x8x32xf32>
    %1081 = arith.mulf %1079, %1080 : vector<2x8x32xf32>
    %1082 = arith.addf %1075, %1081 : vector<2x8x32xf32>
    %1083 = vector.extract_strided_slice %720 {offsets = [6, 0, 0], sizes = [1, 8, 1], strides = [1, 1, 1]} : vector<9x8x1xf32> to vector<1x8x1xf32>
    %1084 = vector.shape_cast %1083 : vector<1x8x1xf32> to vector<8x1xf32>
    %1085 = vector.shape_cast %1084 : vector<8x1xf32> to vector<1x8x1xf32>
    %1086 = vector.broadcast %1023 : vector<2x1x32xf32> to vector<2x8x32xf32>
    %1087 = vector.broadcast %1085 : vector<1x8x1xf32> to vector<2x8x32xf32>
    %1088 = arith.mulf %1086, %1087 : vector<2x8x32xf32>
    %1089 = arith.addf %1082, %1088 : vector<2x8x32xf32>
    %1090 = vector.extract_strided_slice %720 {offsets = [7, 0, 0], sizes = [1, 8, 1], strides = [1, 1, 1]} : vector<9x8x1xf32> to vector<1x8x1xf32>
    %1091 = vector.shape_cast %1090 : vector<1x8x1xf32> to vector<8x1xf32>
    %1092 = vector.shape_cast %1091 : vector<8x1xf32> to vector<1x8x1xf32>
    %1093 = vector.broadcast %1032 : vector<2x1x32xf32> to vector<2x8x32xf32>
    %1094 = vector.broadcast %1092 : vector<1x8x1xf32> to vector<2x8x32xf32>
    %1095 = arith.mulf %1093, %1094 : vector<2x8x32xf32>
    %1096 = arith.addf %1089, %1095 : vector<2x8x32xf32>
    %1097 = vector.extract_strided_slice %720 {offsets = [8, 0, 0], sizes = [1, 8, 1], strides = [1, 1, 1]} : vector<9x8x1xf32> to vector<1x8x1xf32>
    %1098 = vector.shape_cast %1097 : vector<1x8x1xf32> to vector<8x1xf32>
    %1099 = vector.shape_cast %1098 : vector<8x1xf32> to vector<1x8x1xf32>
    %1100 = vector.broadcast %1041 : vector<2x1x32xf32> to vector<2x8x32xf32>
    %1101 = vector.broadcast %1099 : vector<1x8x1xf32> to vector<2x8x32xf32>
    %1102 = arith.mulf %1100, %1101 : vector<2x8x32xf32>
    %1103 = arith.addf %1096, %1102 : vector<2x8x32xf32>
    %cst_383 = arith.constant 0.000000e+00 : f32
    %1104 = vector.broadcast %cst_383 : f32 to vector<2x8x32xf32>
    %1105 = arith.cmpf oge, %1103, %1104 : vector<2x8x32xf32>
    %cst_384 = arith.constant 1.000000e-01 : f32
    %1106 = vector.broadcast %cst_384 : f32 to vector<2x8x32xf32>
    %1107 = arith.mulf %1106, %1103 : vector<2x8x32xf32>
    %1108 = arith.select %1105, %1103, %1107 : vector<2x8x32xi1>, vector<2x8x32xf32>
    %1109 = vector.shape_cast %1108 : vector<2x8x32xf32> to vector<16x32xf32>
    %c0_385 = arith.constant 0 : index
    %c0_386 = arith.constant 0 : index
    %1110 = vector.load %arg8[%c0_385, %c0_386] : memref<16x32xf32, #tpu.memory_space<vmem>>, vector<16x32xf32>
    tpu.vector_store %arg8[%c0_385, %c0_386], %1109 {strides = array<i32>} : memref<16x32xf32, #tpu.memory_space<vmem>>, vector<16x32xf32>,
    %1111 = arith.negf %1109 : vector<16x32xf32>
    %1112 = math.exp %1111 : vector<16x32xf32>
    %cst_387 = arith.constant 1.000000e+00 : f32
    %1113 = vector.broadcast %cst_387 : f32 to vector<16x32xf32>
    %1114 = arith.addf %1113, %1112 : vector<16x32xf32>
    %1115 = arith.divf %1113, %1114 : vector<16x32xf32>
    %1116 = arith.mulf %1109, %1115 : vector<16x32xf32>
    %c0_388 = arith.constant 0 : index
    %c0_389 = arith.constant 0 : index
    %1117 = vector.load %arg11[%c0_388, %c0_389] : memref<16x288xf32, #tpu.memory_space<vmem>>, vector<16x32xf32>
    tpu.vector_store %arg11[%c0_388, %c0_389], %1116 {strides = array<i32>} : memref<16x288xf32, #tpu.memory_space<vmem>>, vector<16x32xf32>,
    %cst_390 = arith.constant -2.200000e+00 : f32
    %1118 = vector.broadcast %cst_390 : f32 to vector<16x32xf32>
    %1119 = arith.subf %1109, %1118 : vector<16x32xf32>
    %cst_391 = arith.constant 2.500000e+00 : f32
    %1120 = vector.broadcast %cst_391 : f32 to vector<16x32xf32>
    %1121 = arith.mulf %1119, %1120 : vector<16x32xf32>
    %cst_392 = arith.constant 0.000000e+00 : f32
    %1122 = vector.broadcast %cst_392 : f32 to vector<16x32xf32>
    %1123 = arith.cmpf oge, %1121, %1122 : vector<16x32xf32>
    %cst_393 = arith.constant 1.000000e+00 : f32
    %1124 = vector.broadcast %cst_393 : f32 to vector<16x32xf32>
    %1125 = arith.cmpf olt, %1121, %1124 : vector<16x32xf32>
    %1126 = arith.andi %1123, %1125 : vector<16x32xi1>
    %cst_394 = arith.constant 1.000000e+00 : f32
    %cst_395 = arith.constant 0.000000e+00 : f32
    %1127 = vector.broadcast %cst_394 : f32 to vector<16x32xf32>
    %1128 = vector.broadcast %cst_395 : f32 to vector<16x32xf32>
    %1129 = arith.select %1126, %1127, %1128 : vector<16x32xi1>, vector<16x32xf32>
    %cst_396 = arith.constant 1.000000e+00 : f32
    %1130 = vector.broadcast %cst_396 : f32 to vector<16x32xf32>
    %1131 = arith.cmpf oge, %1121, %1130 : vector<16x32xf32>
    %cst_397 = arith.constant 2.000000e+00 : f32
    %1132 = vector.broadcast %cst_397 : f32 to vector<16x32xf32>
    %1133 = arith.cmpf olt, %1121, %1132 : vector<16x32xf32>
    %1134 = arith.andi %1131, %1133 : vector<16x32xi1>
    %cst_398 = arith.constant 1.000000e+00 : f32
    %cst_399 = arith.constant 0.000000e+00 : f32
    %1135 = vector.broadcast %cst_398 : f32 to vector<16x32xf32>
    %1136 = vector.broadcast %cst_399 : f32 to vector<16x32xf32>
    %1137 = arith.select %1134, %1135, %1136 : vector<16x32xi1>, vector<16x32xf32>
    %cst_400 = arith.constant 2.000000e+00 : f32
    %1138 = vector.broadcast %cst_400 : f32 to vector<16x32xf32>
    %1139 = arith.cmpf oge, %1121, %1138 : vector<16x32xf32>
    %cst_401 = arith.constant 3.000000e+00 : f32
    %1140 = vector.broadcast %cst_401 : f32 to vector<16x32xf32>
    %1141 = arith.cmpf olt, %1121, %1140 : vector<16x32xf32>
    %1142 = arith.andi %1139, %1141 : vector<16x32xi1>
    %cst_402 = arith.constant 1.000000e+00 : f32
    %cst_403 = arith.constant 0.000000e+00 : f32
    %1143 = vector.broadcast %cst_402 : f32 to vector<16x32xf32>
    %1144 = vector.broadcast %cst_403 : f32 to vector<16x32xf32>
    %1145 = arith.select %1142, %1143, %1144 : vector<16x32xi1>, vector<16x32xf32>
    %cst_404 = arith.constant 3.000000e+00 : f32
    %1146 = vector.broadcast %cst_404 : f32 to vector<16x32xf32>
    %1147 = arith.cmpf oge, %1121, %1146 : vector<16x32xf32>
    %cst_405 = arith.constant 4.000000e+00 : f32
    %1148 = vector.broadcast %cst_405 : f32 to vector<16x32xf32>
    %1149 = arith.cmpf olt, %1121, %1148 : vector<16x32xf32>
    %1150 = arith.andi %1147, %1149 : vector<16x32xi1>
    %cst_406 = arith.constant 1.000000e+00 : f32
    %cst_407 = arith.constant 0.000000e+00 : f32
    %1151 = vector.broadcast %cst_406 : f32 to vector<16x32xf32>
    %1152 = vector.broadcast %cst_407 : f32 to vector<16x32xf32>
    %1153 = arith.select %1150, %1151, %1152 : vector<16x32xi1>, vector<16x32xf32>
    %cst_408 = arith.constant 4.000000e+00 : f32
    %1154 = vector.broadcast %cst_408 : f32 to vector<16x32xf32>
    %1155 = arith.cmpf oge, %1121, %1154 : vector<16x32xf32>
    %cst_409 = arith.constant 5.000000e+00 : f32
    %1156 = vector.broadcast %cst_409 : f32 to vector<16x32xf32>
    %1157 = arith.cmpf olt, %1121, %1156 : vector<16x32xf32>
    %1158 = arith.andi %1155, %1157 : vector<16x32xi1>
    %cst_410 = arith.constant 1.000000e+00 : f32
    %cst_411 = arith.constant 0.000000e+00 : f32
    %1159 = vector.broadcast %cst_410 : f32 to vector<16x32xf32>
    %1160 = vector.broadcast %cst_411 : f32 to vector<16x32xf32>
    %1161 = arith.select %1158, %1159, %1160 : vector<16x32xi1>, vector<16x32xf32>
    %cst_412 = arith.constant 5.000000e+00 : f32
    %1162 = vector.broadcast %cst_412 : f32 to vector<16x32xf32>
    %1163 = arith.cmpf oge, %1121, %1162 : vector<16x32xf32>
    %cst_413 = arith.constant 6.000000e+00 : f32
    %1164 = vector.broadcast %cst_413 : f32 to vector<16x32xf32>
    %1165 = arith.cmpf olt, %1121, %1164 : vector<16x32xf32>
    %1166 = arith.andi %1163, %1165 : vector<16x32xi1>
    %cst_414 = arith.constant 1.000000e+00 : f32
    %cst_415 = arith.constant 0.000000e+00 : f32
    %1167 = vector.broadcast %cst_414 : f32 to vector<16x32xf32>
    %1168 = vector.broadcast %cst_415 : f32 to vector<16x32xf32>
    %1169 = arith.select %1166, %1167, %1168 : vector<16x32xi1>, vector<16x32xf32>
    %cst_416 = arith.constant 6.000000e+00 : f32
    %1170 = vector.broadcast %cst_416 : f32 to vector<16x32xf32>
    %1171 = arith.cmpf oge, %1121, %1170 : vector<16x32xf32>
    %cst_417 = arith.constant 7.000000e+00 : f32
    %1172 = vector.broadcast %cst_417 : f32 to vector<16x32xf32>
    %1173 = arith.cmpf olt, %1121, %1172 : vector<16x32xf32>
    %1174 = arith.andi %1171, %1173 : vector<16x32xi1>
    %cst_418 = arith.constant 1.000000e+00 : f32
    %cst_419 = arith.constant 0.000000e+00 : f32
    %1175 = vector.broadcast %cst_418 : f32 to vector<16x32xf32>
    %1176 = vector.broadcast %cst_419 : f32 to vector<16x32xf32>
    %1177 = arith.select %1174, %1175, %1176 : vector<16x32xi1>, vector<16x32xf32>
    %cst_420 = arith.constant 7.000000e+00 : f32
    %1178 = vector.broadcast %cst_420 : f32 to vector<16x32xf32>
    %1179 = arith.cmpf oge, %1121, %1178 : vector<16x32xf32>
    %cst_421 = arith.constant 8.000000e+00 : f32
    %1180 = vector.broadcast %cst_421 : f32 to vector<16x32xf32>
    %1181 = arith.cmpf olt, %1121, %1180 : vector<16x32xf32>
    %1182 = arith.andi %1179, %1181 : vector<16x32xi1>
    %cst_422 = arith.constant 1.000000e+00 : f32
    %cst_423 = arith.constant 0.000000e+00 : f32
    %1183 = vector.broadcast %cst_422 : f32 to vector<16x32xf32>
    %1184 = vector.broadcast %cst_423 : f32 to vector<16x32xf32>
    %1185 = arith.select %1182, %1183, %1184 : vector<16x32xi1>, vector<16x32xf32>
    %cst_424 = arith.constant 8.000000e+00 : f32
    %1186 = vector.broadcast %cst_424 : f32 to vector<16x32xf32>
    %1187 = arith.cmpf oge, %1121, %1186 : vector<16x32xf32>
    %cst_425 = arith.constant 9.000000e+00 : f32
    %1188 = vector.broadcast %cst_425 : f32 to vector<16x32xf32>
    %1189 = arith.cmpf olt, %1121, %1188 : vector<16x32xf32>
    %1190 = arith.andi %1187, %1189 : vector<16x32xi1>
    %cst_426 = arith.constant 1.000000e+00 : f32
    %cst_427 = arith.constant 0.000000e+00 : f32
    %1191 = vector.broadcast %cst_426 : f32 to vector<16x32xf32>
    %1192 = vector.broadcast %cst_427 : f32 to vector<16x32xf32>
    %1193 = arith.select %1190, %1191, %1192 : vector<16x32xi1>, vector<16x32xf32>
    %cst_428 = arith.constant 9.000000e+00 : f32
    %1194 = vector.broadcast %cst_428 : f32 to vector<16x32xf32>
    %1195 = arith.cmpf oge, %1121, %1194 : vector<16x32xf32>
    %cst_429 = arith.constant 1.000000e+01 : f32
    %1196 = vector.broadcast %cst_429 : f32 to vector<16x32xf32>
    %1197 = arith.cmpf olt, %1121, %1196 : vector<16x32xf32>
    %1198 = arith.andi %1195, %1197 : vector<16x32xi1>
    %cst_430 = arith.constant 1.000000e+00 : f32
    %cst_431 = arith.constant 0.000000e+00 : f32
    %1199 = vector.broadcast %cst_430 : f32 to vector<16x32xf32>
    %1200 = vector.broadcast %cst_431 : f32 to vector<16x32xf32>
    %1201 = arith.select %1198, %1199, %1200 : vector<16x32xi1>, vector<16x32xf32>
    %cst_432 = arith.constant 1.000000e+01 : f32
    %1202 = vector.broadcast %cst_432 : f32 to vector<16x32xf32>
    %1203 = arith.cmpf oge, %1121, %1202 : vector<16x32xf32>
    %cst_433 = arith.constant 1.100000e+01 : f32
    %1204 = vector.broadcast %cst_433 : f32 to vector<16x32xf32>
    %1205 = arith.cmpf olt, %1121, %1204 : vector<16x32xf32>
    %1206 = arith.andi %1203, %1205 : vector<16x32xi1>
    %cst_434 = arith.constant 1.000000e+00 : f32
    %cst_435 = arith.constant 0.000000e+00 : f32
    %1207 = vector.broadcast %cst_434 : f32 to vector<16x32xf32>
    %1208 = vector.broadcast %cst_435 : f32 to vector<16x32xf32>
    %1209 = arith.select %1206, %1207, %1208 : vector<16x32xi1>, vector<16x32xf32>
    %cst_436 = arith.constant 0.000000e+00 : f32
    %1210 = vector.broadcast %cst_436 : f32 to vector<16x32xf32>
    %1211 = arith.subf %1121, %1210 : vector<16x32xf32>
    %1212 = arith.mulf %1211, %1129 : vector<16x32xf32>
    %cst_437 = arith.constant 2.000000e+00 : f32
    %1213 = vector.broadcast %cst_437 : f32 to vector<16x32xf32>
    %1214 = arith.subf %1121, %1213 : vector<16x32xf32>
    %1215 = arith.mulf %1214, %1137 : vector<16x32xf32>
    %1216 = arith.subf %1212, %1215 : vector<16x32xf32>
    %cst_438 = arith.constant 1.000000e+00 : f32
    %1217 = vector.broadcast %cst_438 : f32 to vector<16x32xf32>
    %1218 = arith.subf %1121, %1217 : vector<16x32xf32>
    %1219 = arith.mulf %1218, %1137 : vector<16x32xf32>
    %cst_439 = arith.constant 3.000000e+00 : f32
    %1220 = vector.broadcast %cst_439 : f32 to vector<16x32xf32>
    %1221 = arith.subf %1121, %1220 : vector<16x32xf32>
    %1222 = arith.mulf %1221, %1145 : vector<16x32xf32>
    %1223 = arith.subf %1219, %1222 : vector<16x32xf32>
    %cst_440 = arith.constant 2.000000e+00 : f32
    %1224 = vector.broadcast %cst_440 : f32 to vector<16x32xf32>
    %1225 = arith.subf %1121, %1224 : vector<16x32xf32>
    %1226 = arith.mulf %1225, %1145 : vector<16x32xf32>
    %cst_441 = arith.constant 4.000000e+00 : f32
    %1227 = vector.broadcast %cst_441 : f32 to vector<16x32xf32>
    %1228 = arith.subf %1121, %1227 : vector<16x32xf32>
    %1229 = arith.mulf %1228, %1153 : vector<16x32xf32>
    %1230 = arith.subf %1226, %1229 : vector<16x32xf32>
    %cst_442 = arith.constant 3.000000e+00 : f32
    %1231 = vector.broadcast %cst_442 : f32 to vector<16x32xf32>
    %1232 = arith.subf %1121, %1231 : vector<16x32xf32>
    %1233 = arith.mulf %1232, %1153 : vector<16x32xf32>
    %cst_443 = arith.constant 5.000000e+00 : f32
    %1234 = vector.broadcast %cst_443 : f32 to vector<16x32xf32>
    %1235 = arith.subf %1121, %1234 : vector<16x32xf32>
    %1236 = arith.mulf %1235, %1161 : vector<16x32xf32>
    %1237 = arith.subf %1233, %1236 : vector<16x32xf32>
    %cst_444 = arith.constant 4.000000e+00 : f32
    %1238 = vector.broadcast %cst_444 : f32 to vector<16x32xf32>
    %1239 = arith.subf %1121, %1238 : vector<16x32xf32>
    %1240 = arith.mulf %1239, %1161 : vector<16x32xf32>
    %cst_445 = arith.constant 6.000000e+00 : f32
    %1241 = vector.broadcast %cst_445 : f32 to vector<16x32xf32>
    %1242 = arith.subf %1121, %1241 : vector<16x32xf32>
    %1243 = arith.mulf %1242, %1169 : vector<16x32xf32>
    %1244 = arith.subf %1240, %1243 : vector<16x32xf32>
    %cst_446 = arith.constant 5.000000e+00 : f32
    %1245 = vector.broadcast %cst_446 : f32 to vector<16x32xf32>
    %1246 = arith.subf %1121, %1245 : vector<16x32xf32>
    %1247 = arith.mulf %1246, %1169 : vector<16x32xf32>
    %cst_447 = arith.constant 7.000000e+00 : f32
    %1248 = vector.broadcast %cst_447 : f32 to vector<16x32xf32>
    %1249 = arith.subf %1121, %1248 : vector<16x32xf32>
    %1250 = arith.mulf %1249, %1177 : vector<16x32xf32>
    %1251 = arith.subf %1247, %1250 : vector<16x32xf32>
    %cst_448 = arith.constant 6.000000e+00 : f32
    %1252 = vector.broadcast %cst_448 : f32 to vector<16x32xf32>
    %1253 = arith.subf %1121, %1252 : vector<16x32xf32>
    %1254 = arith.mulf %1253, %1177 : vector<16x32xf32>
    %cst_449 = arith.constant 8.000000e+00 : f32
    %1255 = vector.broadcast %cst_449 : f32 to vector<16x32xf32>
    %1256 = arith.subf %1121, %1255 : vector<16x32xf32>
    %1257 = arith.mulf %1256, %1185 : vector<16x32xf32>
    %1258 = arith.subf %1254, %1257 : vector<16x32xf32>
    %cst_450 = arith.constant 7.000000e+00 : f32
    %1259 = vector.broadcast %cst_450 : f32 to vector<16x32xf32>
    %1260 = arith.subf %1121, %1259 : vector<16x32xf32>
    %1261 = arith.mulf %1260, %1185 : vector<16x32xf32>
    %cst_451 = arith.constant 9.000000e+00 : f32
    %1262 = vector.broadcast %cst_451 : f32 to vector<16x32xf32>
    %1263 = arith.subf %1121, %1262 : vector<16x32xf32>
    %1264 = arith.mulf %1263, %1193 : vector<16x32xf32>
    %1265 = arith.subf %1261, %1264 : vector<16x32xf32>
    %cst_452 = arith.constant 8.000000e+00 : f32
    %1266 = vector.broadcast %cst_452 : f32 to vector<16x32xf32>
    %1267 = arith.subf %1121, %1266 : vector<16x32xf32>
    %1268 = arith.mulf %1267, %1193 : vector<16x32xf32>
    %cst_453 = arith.constant 1.000000e+01 : f32
    %1269 = vector.broadcast %cst_453 : f32 to vector<16x32xf32>
    %1270 = arith.subf %1121, %1269 : vector<16x32xf32>
    %1271 = arith.mulf %1270, %1201 : vector<16x32xf32>
    %1272 = arith.subf %1268, %1271 : vector<16x32xf32>
    %cst_454 = arith.constant 9.000000e+00 : f32
    %1273 = vector.broadcast %cst_454 : f32 to vector<16x32xf32>
    %1274 = arith.subf %1121, %1273 : vector<16x32xf32>
    %1275 = arith.mulf %1274, %1201 : vector<16x32xf32>
    %cst_455 = arith.constant 1.100000e+01 : f32
    %1276 = vector.broadcast %cst_455 : f32 to vector<16x32xf32>
    %1277 = arith.subf %1121, %1276 : vector<16x32xf32>
    %1278 = arith.mulf %1277, %1209 : vector<16x32xf32>
    %1279 = arith.subf %1275, %1278 : vector<16x32xf32>
    %cst_456 = arith.constant 0.000000e+00 : f32
    %1280 = vector.broadcast %cst_456 : f32 to vector<16x32xf32>
    %1281 = arith.subf %1121, %1280 : vector<16x32xf32>
    %1282 = arith.mulf %1281, %1216 : vector<16x32xf32>
    %cst_457 = arith.constant 3.000000e+00 : f32
    %1283 = vector.broadcast %cst_457 : f32 to vector<16x32xf32>
    %1284 = arith.subf %1121, %1283 : vector<16x32xf32>
    %1285 = arith.mulf %1284, %1223 : vector<16x32xf32>
    %1286 = arith.subf %1282, %1285 : vector<16x32xf32>
    %cst_458 = arith.constant 5.000000e-01 : f32
    %1287 = vector.broadcast %cst_458 : f32 to vector<16x32xf32>
    %1288 = arith.mulf %1286, %1287 : vector<16x32xf32>
    %cst_459 = arith.constant 1.000000e+00 : f32
    %1289 = vector.broadcast %cst_459 : f32 to vector<16x32xf32>
    %1290 = arith.subf %1121, %1289 : vector<16x32xf32>
    %1291 = arith.mulf %1290, %1223 : vector<16x32xf32>
    %cst_460 = arith.constant 4.000000e+00 : f32
    %1292 = vector.broadcast %cst_460 : f32 to vector<16x32xf32>
    %1293 = arith.subf %1121, %1292 : vector<16x32xf32>
    %1294 = arith.mulf %1293, %1230 : vector<16x32xf32>
    %1295 = arith.subf %1291, %1294 : vector<16x32xf32>
    %cst_461 = arith.constant 5.000000e-01 : f32
    %1296 = vector.broadcast %cst_461 : f32 to vector<16x32xf32>
    %1297 = arith.mulf %1295, %1296 : vector<16x32xf32>
    %cst_462 = arith.constant 2.000000e+00 : f32
    %1298 = vector.broadcast %cst_462 : f32 to vector<16x32xf32>
    %1299 = arith.subf %1121, %1298 : vector<16x32xf32>
    %1300 = arith.mulf %1299, %1230 : vector<16x32xf32>
    %cst_463 = arith.constant 5.000000e+00 : f32
    %1301 = vector.broadcast %cst_463 : f32 to vector<16x32xf32>
    %1302 = arith.subf %1121, %1301 : vector<16x32xf32>
    %1303 = arith.mulf %1302, %1237 : vector<16x32xf32>
    %1304 = arith.subf %1300, %1303 : vector<16x32xf32>
    %cst_464 = arith.constant 5.000000e-01 : f32
    %1305 = vector.broadcast %cst_464 : f32 to vector<16x32xf32>
    %1306 = arith.mulf %1304, %1305 : vector<16x32xf32>
    %cst_465 = arith.constant 3.000000e+00 : f32
    %1307 = vector.broadcast %cst_465 : f32 to vector<16x32xf32>
    %1308 = arith.subf %1121, %1307 : vector<16x32xf32>
    %1309 = arith.mulf %1308, %1237 : vector<16x32xf32>
    %cst_466 = arith.constant 6.000000e+00 : f32
    %1310 = vector.broadcast %cst_466 : f32 to vector<16x32xf32>
    %1311 = arith.subf %1121, %1310 : vector<16x32xf32>
    %1312 = arith.mulf %1311, %1244 : vector<16x32xf32>
    %1313 = arith.subf %1309, %1312 : vector<16x32xf32>
    %cst_467 = arith.constant 5.000000e-01 : f32
    %1314 = vector.broadcast %cst_467 : f32 to vector<16x32xf32>
    %1315 = arith.mulf %1313, %1314 : vector<16x32xf32>
    %cst_468 = arith.constant 4.000000e+00 : f32
    %1316 = vector.broadcast %cst_468 : f32 to vector<16x32xf32>
    %1317 = arith.subf %1121, %1316 : vector<16x32xf32>
    %1318 = arith.mulf %1317, %1244 : vector<16x32xf32>
    %cst_469 = arith.constant 7.000000e+00 : f32
    %1319 = vector.broadcast %cst_469 : f32 to vector<16x32xf32>
    %1320 = arith.subf %1121, %1319 : vector<16x32xf32>
    %1321 = arith.mulf %1320, %1251 : vector<16x32xf32>
    %1322 = arith.subf %1318, %1321 : vector<16x32xf32>
    %cst_470 = arith.constant 5.000000e-01 : f32
    %1323 = vector.broadcast %cst_470 : f32 to vector<16x32xf32>
    %1324 = arith.mulf %1322, %1323 : vector<16x32xf32>
    %cst_471 = arith.constant 5.000000e+00 : f32
    %1325 = vector.broadcast %cst_471 : f32 to vector<16x32xf32>
    %1326 = arith.subf %1121, %1325 : vector<16x32xf32>
    %1327 = arith.mulf %1326, %1251 : vector<16x32xf32>
    %cst_472 = arith.constant 8.000000e+00 : f32
    %1328 = vector.broadcast %cst_472 : f32 to vector<16x32xf32>
    %1329 = arith.subf %1121, %1328 : vector<16x32xf32>
    %1330 = arith.mulf %1329, %1258 : vector<16x32xf32>
    %1331 = arith.subf %1327, %1330 : vector<16x32xf32>
    %cst_473 = arith.constant 5.000000e-01 : f32
    %1332 = vector.broadcast %cst_473 : f32 to vector<16x32xf32>
    %1333 = arith.mulf %1331, %1332 : vector<16x32xf32>
    %cst_474 = arith.constant 6.000000e+00 : f32
    %1334 = vector.broadcast %cst_474 : f32 to vector<16x32xf32>
    %1335 = arith.subf %1121, %1334 : vector<16x32xf32>
    %1336 = arith.mulf %1335, %1258 : vector<16x32xf32>
    %cst_475 = arith.constant 9.000000e+00 : f32
    %1337 = vector.broadcast %cst_475 : f32 to vector<16x32xf32>
    %1338 = arith.subf %1121, %1337 : vector<16x32xf32>
    %1339 = arith.mulf %1338, %1265 : vector<16x32xf32>
    %1340 = arith.subf %1336, %1339 : vector<16x32xf32>
    %cst_476 = arith.constant 5.000000e-01 : f32
    %1341 = vector.broadcast %cst_476 : f32 to vector<16x32xf32>
    %1342 = arith.mulf %1340, %1341 : vector<16x32xf32>
    %cst_477 = arith.constant 7.000000e+00 : f32
    %1343 = vector.broadcast %cst_477 : f32 to vector<16x32xf32>
    %1344 = arith.subf %1121, %1343 : vector<16x32xf32>
    %1345 = arith.mulf %1344, %1265 : vector<16x32xf32>
    %cst_478 = arith.constant 1.000000e+01 : f32
    %1346 = vector.broadcast %cst_478 : f32 to vector<16x32xf32>
    %1347 = arith.subf %1121, %1346 : vector<16x32xf32>
    %1348 = arith.mulf %1347, %1272 : vector<16x32xf32>
    %1349 = arith.subf %1345, %1348 : vector<16x32xf32>
    %cst_479 = arith.constant 5.000000e-01 : f32
    %1350 = vector.broadcast %cst_479 : f32 to vector<16x32xf32>
    %1351 = arith.mulf %1349, %1350 : vector<16x32xf32>
    %cst_480 = arith.constant 8.000000e+00 : f32
    %1352 = vector.broadcast %cst_480 : f32 to vector<16x32xf32>
    %1353 = arith.subf %1121, %1352 : vector<16x32xf32>
    %1354 = arith.mulf %1353, %1272 : vector<16x32xf32>
    %cst_481 = arith.constant 1.100000e+01 : f32
    %1355 = vector.broadcast %cst_481 : f32 to vector<16x32xf32>
    %1356 = arith.subf %1121, %1355 : vector<16x32xf32>
    %1357 = arith.mulf %1356, %1279 : vector<16x32xf32>
    %1358 = arith.subf %1354, %1357 : vector<16x32xf32>
    %cst_482 = arith.constant 5.000000e-01 : f32
    %1359 = vector.broadcast %cst_482 : f32 to vector<16x32xf32>
    %1360 = arith.mulf %1358, %1359 : vector<16x32xf32>
    %cst_483 = arith.constant 0.000000e+00 : f32
    %1361 = vector.broadcast %cst_483 : f32 to vector<16x32xf32>
    %1362 = arith.subf %1121, %1361 : vector<16x32xf32>
    %1363 = arith.mulf %1362, %1288 : vector<16x32xf32>
    %cst_484 = arith.constant 4.000000e+00 : f32
    %1364 = vector.broadcast %cst_484 : f32 to vector<16x32xf32>
    %1365 = arith.subf %1121, %1364 : vector<16x32xf32>
    %1366 = arith.mulf %1365, %1297 : vector<16x32xf32>
    %1367 = arith.subf %1363, %1366 : vector<16x32xf32>
    %cst_485 = arith.constant 0.333333343 : f32
    %1368 = vector.broadcast %cst_485 : f32 to vector<16x32xf32>
    %1369 = arith.mulf %1367, %1368 : vector<16x32xf32>
    %cst_486 = arith.constant 1.000000e+00 : f32
    %1370 = vector.broadcast %cst_486 : f32 to vector<16x32xf32>
    %1371 = arith.subf %1121, %1370 : vector<16x32xf32>
    %1372 = arith.mulf %1371, %1297 : vector<16x32xf32>
    %cst_487 = arith.constant 5.000000e+00 : f32
    %1373 = vector.broadcast %cst_487 : f32 to vector<16x32xf32>
    %1374 = arith.subf %1121, %1373 : vector<16x32xf32>
    %1375 = arith.mulf %1374, %1306 : vector<16x32xf32>
    %1376 = arith.subf %1372, %1375 : vector<16x32xf32>
    %cst_488 = arith.constant 0.333333343 : f32
    %1377 = vector.broadcast %cst_488 : f32 to vector<16x32xf32>
    %1378 = arith.mulf %1376, %1377 : vector<16x32xf32>
    %cst_489 = arith.constant 2.000000e+00 : f32
    %1379 = vector.broadcast %cst_489 : f32 to vector<16x32xf32>
    %1380 = arith.subf %1121, %1379 : vector<16x32xf32>
    %1381 = arith.mulf %1380, %1306 : vector<16x32xf32>
    %cst_490 = arith.constant 6.000000e+00 : f32
    %1382 = vector.broadcast %cst_490 : f32 to vector<16x32xf32>
    %1383 = arith.subf %1121, %1382 : vector<16x32xf32>
    %1384 = arith.mulf %1383, %1315 : vector<16x32xf32>
    %1385 = arith.subf %1381, %1384 : vector<16x32xf32>
    %cst_491 = arith.constant 0.333333343 : f32
    %1386 = vector.broadcast %cst_491 : f32 to vector<16x32xf32>
    %1387 = arith.mulf %1385, %1386 : vector<16x32xf32>
    %cst_492 = arith.constant 3.000000e+00 : f32
    %1388 = vector.broadcast %cst_492 : f32 to vector<16x32xf32>
    %1389 = arith.subf %1121, %1388 : vector<16x32xf32>
    %1390 = arith.mulf %1389, %1315 : vector<16x32xf32>
    %cst_493 = arith.constant 7.000000e+00 : f32
    %1391 = vector.broadcast %cst_493 : f32 to vector<16x32xf32>
    %1392 = arith.subf %1121, %1391 : vector<16x32xf32>
    %1393 = arith.mulf %1392, %1324 : vector<16x32xf32>
    %1394 = arith.subf %1390, %1393 : vector<16x32xf32>
    %cst_494 = arith.constant 0.333333343 : f32
    %1395 = vector.broadcast %cst_494 : f32 to vector<16x32xf32>
    %1396 = arith.mulf %1394, %1395 : vector<16x32xf32>
    %cst_495 = arith.constant 4.000000e+00 : f32
    %1397 = vector.broadcast %cst_495 : f32 to vector<16x32xf32>
    %1398 = arith.subf %1121, %1397 : vector<16x32xf32>
    %1399 = arith.mulf %1398, %1324 : vector<16x32xf32>
    %cst_496 = arith.constant 8.000000e+00 : f32
    %1400 = vector.broadcast %cst_496 : f32 to vector<16x32xf32>
    %1401 = arith.subf %1121, %1400 : vector<16x32xf32>
    %1402 = arith.mulf %1401, %1333 : vector<16x32xf32>
    %1403 = arith.subf %1399, %1402 : vector<16x32xf32>
    %cst_497 = arith.constant 0.333333343 : f32
    %1404 = vector.broadcast %cst_497 : f32 to vector<16x32xf32>
    %1405 = arith.mulf %1403, %1404 : vector<16x32xf32>
    %cst_498 = arith.constant 5.000000e+00 : f32
    %1406 = vector.broadcast %cst_498 : f32 to vector<16x32xf32>
    %1407 = arith.subf %1121, %1406 : vector<16x32xf32>
    %1408 = arith.mulf %1407, %1333 : vector<16x32xf32>
    %cst_499 = arith.constant 9.000000e+00 : f32
    %1409 = vector.broadcast %cst_499 : f32 to vector<16x32xf32>
    %1410 = arith.subf %1121, %1409 : vector<16x32xf32>
    %1411 = arith.mulf %1410, %1342 : vector<16x32xf32>
    %1412 = arith.subf %1408, %1411 : vector<16x32xf32>
    %cst_500 = arith.constant 0.333333343 : f32
    %1413 = vector.broadcast %cst_500 : f32 to vector<16x32xf32>
    %1414 = arith.mulf %1412, %1413 : vector<16x32xf32>
    %cst_501 = arith.constant 6.000000e+00 : f32
    %1415 = vector.broadcast %cst_501 : f32 to vector<16x32xf32>
    %1416 = arith.subf %1121, %1415 : vector<16x32xf32>
    %1417 = arith.mulf %1416, %1342 : vector<16x32xf32>
    %cst_502 = arith.constant 1.000000e+01 : f32
    %1418 = vector.broadcast %cst_502 : f32 to vector<16x32xf32>
    %1419 = arith.subf %1121, %1418 : vector<16x32xf32>
    %1420 = arith.mulf %1419, %1351 : vector<16x32xf32>
    %1421 = arith.subf %1417, %1420 : vector<16x32xf32>
    %cst_503 = arith.constant 0.333333343 : f32
    %1422 = vector.broadcast %cst_503 : f32 to vector<16x32xf32>
    %1423 = arith.mulf %1421, %1422 : vector<16x32xf32>
    %cst_504 = arith.constant 7.000000e+00 : f32
    %1424 = vector.broadcast %cst_504 : f32 to vector<16x32xf32>
    %1425 = arith.subf %1121, %1424 : vector<16x32xf32>
    %1426 = arith.mulf %1425, %1351 : vector<16x32xf32>
    %cst_505 = arith.constant 1.100000e+01 : f32
    %1427 = vector.broadcast %cst_505 : f32 to vector<16x32xf32>
    %1428 = arith.subf %1121, %1427 : vector<16x32xf32>
    %1429 = arith.mulf %1428, %1360 : vector<16x32xf32>
    %1430 = arith.subf %1426, %1429 : vector<16x32xf32>
    %cst_506 = arith.constant 0.333333343 : f32
    %1431 = vector.broadcast %cst_506 : f32 to vector<16x32xf32>
    %1432 = arith.mulf %1430, %1431 : vector<16x32xf32>
    %c0_507 = arith.constant 0 : index
    %c32_508 = arith.constant 32 : index
    %1433 = vector.load %arg11[%c0_507, %c32_508] : memref<16x288xf32, #tpu.memory_space<vmem>>, vector<16x32xf32>
    tpu.vector_store %arg11[%c0_507, %c32_508], %1369 {strides = array<i32>} : memref<16x288xf32, #tpu.memory_space<vmem>>, vector<16x32xf32>,
    %c0_509 = arith.constant 0 : index
    %c64_510 = arith.constant 64 : index
    %1434 = vector.load %arg11[%c0_509, %c64_510] : memref<16x288xf32, #tpu.memory_space<vmem>>, vector<16x32xf32>
    tpu.vector_store %arg11[%c0_509, %c64_510], %1378 {strides = array<i32>} : memref<16x288xf32, #tpu.memory_space<vmem>>, vector<16x32xf32>,
    %c0_511 = arith.constant 0 : index
    %c96_512 = arith.constant 96 : index
    %1435 = vector.load %arg11[%c0_511, %c96_512] : memref<16x288xf32, #tpu.memory_space<vmem>>, vector<16x32xf32>
    tpu.vector_store %arg11[%c0_511, %c96_512], %1387 {strides = array<i32>} : memref<16x288xf32, #tpu.memory_space<vmem>>, vector<16x32xf32>,
    %c0_513 = arith.constant 0 : index
    %c128_514 = arith.constant 128 : index
    %1436 = vector.load %arg11[%c0_513, %c128_514] : memref<16x288xf32, #tpu.memory_space<vmem>>, vector<16x32xf32>
    tpu.vector_store %arg11[%c0_513, %c128_514], %1396 {strides = array<i32>} : memref<16x288xf32, #tpu.memory_space<vmem>>, vector<16x32xf32>,
    %c0_515 = arith.constant 0 : index
    %c160 = arith.constant 160 : index
    %1437 = vector.load %arg11[%c0_515, %c160] : memref<16x288xf32, #tpu.memory_space<vmem>>, vector<16x32xf32>
    tpu.vector_store %arg11[%c0_515, %c160], %1405 {strides = array<i32>} : memref<16x288xf32, #tpu.memory_space<vmem>>, vector<16x32xf32>,
    %c0_516 = arith.constant 0 : index
    %c192 = arith.constant 192 : index
    %1438 = vector.load %arg11[%c0_516, %c192] : memref<16x288xf32, #tpu.memory_space<vmem>>, vector<16x32xf32>
    tpu.vector_store %arg11[%c0_516, %c192], %1414 {strides = array<i32>} : memref<16x288xf32, #tpu.memory_space<vmem>>, vector<16x32xf32>,
    %c0_517 = arith.constant 0 : index
    %c224 = arith.constant 224 : index
    %1439 = vector.load %arg11[%c0_517, %c224] : memref<16x288xf32, #tpu.memory_space<vmem>>, vector<16x32xf32>
    tpu.vector_store %arg11[%c0_517, %c224], %1423 {strides = array<i32>} : memref<16x288xf32, #tpu.memory_space<vmem>>, vector<16x32xf32>,
    %c0_518 = arith.constant 0 : index
    %c256 = arith.constant 256 : index
    %1440 = vector.load %arg11[%c0_518, %c256] : memref<16x288xf32, #tpu.memory_space<vmem>>, vector<16x32xf32>
    tpu.vector_store %arg11[%c0_518, %c256], %1432 {strides = array<i32>} : memref<16x288xf32, #tpu.memory_space<vmem>>, vector<16x32xf32>,
    %c0_519 = arith.constant 0 : index
    %c0_520 = arith.constant 0 : index
    %1441 = vector.load %arg11[%c0_519, %c0_520] : memref<16x288xf32, #tpu.memory_space<vmem>>, vector<16x288xf32>
    %1442 = arith.truncf %1441 : vector<16x288xf32> to vector<16x288xbf16>
    %c0_521 = arith.constant 0 : index
    %c0_522 = arith.constant 0 : index
    %1443 = vector.load %arg5[%c0_521, %c0_522] : memref<288x16xbf16, #tpu.memory_space<vmem>>, vector<288x16xbf16>
    %cst_523 = arith.constant dense<0.000000e+00> : vector<16x16xf32>
    %1444 = tpu.matmul %1442, %1443, %cst_523 {dimension_numbers = #tpu.dot_dimension_numbers<[1], [0], [0], [1], [0, 0, 1, 1], [], []>} : vector<16x288xbf16>, vector<288x16xbf16>, vector<16x16xf32> -> vector<16x16xf32>
    %c0_524 = arith.constant 0 : index
    %c0_525 = arith.constant 0 : index
    %1445 = vector.load %arg9[%c0_524, %c0_525] : memref<16x16xf32, #tpu.memory_space<vmem>>, vector<16x16xf32>
    tpu.vector_store %arg9[%c0_524, %c0_525], %1444 {strides = array<i32>} : memref<16x16xf32, #tpu.memory_space<vmem>>, vector<16x16xf32>,
    return
  }
  func.func @transform_0(%arg0: i32) -> (i32, i32) {
    %c0_i32 = arith.constant 0 : i32
    %c0_i32_0 = arith.constant 0 : i32
    return %arg0, %c0_i32 : i32, i32
  }
  func.func @transform_1(%arg0: i32) -> (i32, i32) {
    %c0_i32 = arith.constant 0 : i32
    %c0_i32_0 = arith.constant 0 : i32
    %c0_i32_1 = arith.constant 0 : i32
    return %c0_i32, %c0_i32_0 : i32, i32
  }
  func.func @transform_2(%arg0: i32) -> (i32, i32, i32) {
    %c0_i32 = arith.constant 0 : i32
    %c0_i32_0 = arith.constant 0 : i32
    %c0_i32_1 = arith.constant 0 : i32
    %c0_i32_2 = arith.constant 0 : i32
    return %c0_i32, %c0_i32_0, %c0_i32_1 : i32, i32, i32
  }
  func.func @transform_3(%arg0: i32) -> (i32, i32, i32) {
    %c0_i32 = arith.constant 0 : i32
    %c0_i32_0 = arith.constant 0 : i32
    %c0_i32_1 = arith.constant 0 : i32
    %c0_i32_2 = arith.constant 0 : i32
    return %c0_i32, %c0_i32_0, %c0_i32_1 : i32, i32, i32
  }
  func.func @transform_4(%arg0: i32) -> (i32, i32) {
    %c0_i32 = arith.constant 0 : i32
    %c0_i32_0 = arith.constant 0 : i32
    %c0_i32_1 = arith.constant 0 : i32
    return %c0_i32, %c0_i32_0 : i32, i32
  }
  func.func @transform_5(%arg0: i32) -> (i32, i32) {
    %c0_i32 = arith.constant 0 : i32
    %c0_i32_0 = arith.constant 0 : i32
    return %arg0, %c0_i32 : i32, i32
  }
  func.func @transform_6(%arg0: i32) -> (i32, i32, i32) {
    %c0_i32 = arith.constant 0 : i32
    %c0_i32_0 = arith.constant 0 : i32
    %c0_i32_1 = arith.constant 0 : i32
    return %arg0, %c0_i32, %c0_i32_0 : i32, i32, i32
  }
  func.func @transform_7(%arg0: i32) -> (i32, i32) {
    %c0_i32 = arith.constant 0 : i32
    %c0_i32_0 = arith.constant 0 : i32
    return %arg0, %c0_i32 : i32, i32
  }
  func.func @transform_8(%arg0: i32) -> (i32, i32) {
    %c0_i32 = arith.constant 0 : i32
    %c0_i32_0 = arith.constant 0 : i32
    return %arg0, %c0_i32 : i32, i32
  }
}

</mosaic_0001>

<bundles_post_ra>
// kernel: kan_embedding_forward.1
= control target key start
LH: loop header
LB: loop body
LE: loop exit
PB: predicated region body
PF: predicated region fallthrough
CT: control target
= control target key end

     0   :  { %14 = vsyncpa [#allocation5], 0  ;;  %s3799_s0 = inlined_call_operand.vmem [shape: f32[16,16], index: 0, kind: input, shape index: {}]   ;;  %s3800_s1 = inlined_call_operand.vmem [shape: bf16[144,32], index: 1, kind: input, shape index: {}]   ;;  %s3801_s2 = inlined_call_operand.vmem [shape: f32[9,8,1], index: 2, kind: input, shape index: {}]   ;;  %s3802_s3 = inlined_call_operand.vmem [shape: f32[9,8,1], index: 3, kind: input, shape index: {}]   ;;  %s3803_s4 = inlined_call_operand.vmem [shape: bf16[288,16], index: 4, kind: input, shape index: {}]   ;;  %s3804_s5 = inlined_call_operand.hbm [shape: f32[16,32], index: 5, kind: output, shape index: {0}]   ;;  %s3805_s6 = inlined_call_operand.hbm [shape: f32[2,1,32], index: 6, kind: output, shape index: {1}]   ;;  %s3806_s7 = inlined_call_operand.hbm [shape: f32[16,32], index: 7, kind: output, shape index: {2}]   ;;  %s3807_s8 = inlined_call_operand.hbm [shape: f32[16,16], index: 8, kind: output, shape index: {3}]  }
   0x1   :  { %15 = vsyncpa [#allocation7], 0  ;;  %v2507_v0 = vld [vmem:[%s3799_s0] sm:$0xff]  ;;  %v2512_v1 = vld [vmem:[%s3799_s0 + $0x8] sm:$0xff]  ;;  %v2442_v4 = vmov 0   ;;  %v2443_v8 = vmov 0.0  }
   0x2   :  { %v2114_v2 = vadd.f32 2.2, %v2507_v0  ;;  %v2115_v3 = vadd.f32 2.2, %v2512_v1  ;;  %517 = vmatprep.subr.bf16.mxu0 %v2442_v4  ;;  %2296 = vset.pattern.permute.xlu1 %v2442_v4  ;;  %v2297_v7 = vld [vmem:[%s3800_s1 + $0x38] sm:$0xff]   ;;  %v2298_v38 = vld [vmem:[%s3800_s1 + $0x30] sm:$0xff]  }
   0x3   :  { %2295 = vset.pattern.permute.xlu0 %v2442_v4  ;;  %518 = vmatpush1.bf16.msra.mxu0 %v2297_v7  ;;  %s2444_s12 = smov 32   ;;  %s2445_s15 = smov 16  }
   0x4   :  { %v2519_v5 = vmul.f32 2.5, %v2114_v2  ;;  %v2521_v6 = vmul.f32 2.5, %v2115_v3  ;;  %519 = vmatprep.subr.bf16.mxu0 %v2442_v4 }
   0x6   :  { %vm59_vm0 = vcmp.ge.f32.partialorder %v2519_v5, 1.0  ;;  %vm61_vm1 = vcmp.lt.f32.partialorder %v2519_v5, 2.0  ;;  %vm67_vm2 = vcmp.ge.f32.partialorder %v2519_v5, 2.0  ;;  %vm69_vm3 = vcmp.lt.f32.partialorder %v2519_v5, 3.0 }
   0x7   :  { %vm63_vm4 = vmand %vm59_vm0, %vm61_vm1  ;;  %vm75_vm5 = vcmp.ge.f32.partialorder %v2519_v5, 3.0  ;;  %vm77_vm6 = vcmp.lt.f32.partialorder %v2519_v5, 4.0  ;;  %vm83_vm7 = vcmp.ge.f32.partialorder %v2519_v5, 4.0  ;;  %vm85_vm8 = vcmp.lt.f32.partialorder %v2519_v5, 5.0  ;;  %520 = vmatpush1.bf16.msra.mxu0 %v2298_v38 }
   0x8   :  { %v65_v9 = vsel %vm63_vm4, 1.0, %v2443_v8  ;;  %vm71_vm9 = vmand %vm67_vm2, %vm69_vm3  ;;  %v2537_v10 = vadd.f32 -2.0, %v2519_v5  ;;  %v2118_v11 = vadd.f32 -1.0, %v2519_v5  ;;  %v2541_v12 = vadd.f32 -3.0, %v2519_v5  ;;  %521 = vmatprep.subr.bf16.mxu0 %v2442_v4 }
   0x9   :  { %v73_v13 = vsel %vm71_vm9, 1.0, %v2443_v8  ;;  %vm79_vm10 = vmand %vm75_vm5, %vm77_vm6  ;;  %v2545_v14 = vadd.f32 -4.0, %v2519_v5  ;;  %v2548_v15 = vadd.f32 -5.0, %v2519_v5  ;;  %vm51_vm11 = vcmp.ge.f32.partialorder %v2519_v5, 0.0 }
   0xa   :  { %v81_v16 = vsel %vm79_vm10, 1.0, %v2443_v8  ;;  %vm87_vm12 = vmand %vm83_vm7, %vm85_vm8  ;;  %v149_v17 = vmul.f32 %v2118_v11, %v65_v9  ;;  %v153_v18 = vmul.f32 %v2541_v12, %v73_v13  ;;  %v157_v19 = vmul.f32 %v2537_v10, %v73_v13 }
   0xb   :  { %v2557_v20 = vsel %vm87_vm12, 1.0, %v2443_v8  ;;  %v161_v21 = vmul.f32 %v2545_v14, %v81_v16  ;;  %v165_v22 = vmul.f32 %v2541_v12, %v81_v16  ;;  %vm53_vm13 = vcmp.lt.f32.partialorder %v2519_v5, 1.0 }
   0xc   :  { %v155_v23 = vsub.f32 %v149_v17, %v153_v18  ;;  %v169_v24 = vmul.f32 %v2548_v15, %v2557_v20  ;;  %vm55_vm14 = vmand %vm51_vm11, %vm53_vm13  ;;  %v143_v25 = vmul.f32 %v2537_v10, %v65_v9  ;;  %vm60_vm15 = vcmp.ge.f32.partialorder %v2521_v6, 1.0 }
   0xd   :  { %v163_v26 = vsub.f32 %v157_v19, %v161_v21  ;;  %v57_v27 = vsel %vm55_vm14, 1.0, %v2443_v8  ;;  %vm62_vm0 = vcmp.lt.f32.partialorder %v2521_v6, 2.0  ;;  %vm68_vm2 = vcmp.ge.f32.partialorder %v2521_v6, 2.0 }
   0xe   :  { %v2568_v28 = vsub.f32 %v165_v22, %v169_v24  ;;  %v229_v29 = vmul.f32 %v2118_v11, %v155_v23  ;;  %v139_v30 = vmul.f32 %v57_v27, %v2519_v5  ;;  %v223_v31 = vmul.f32 %v2541_v12, %v155_v23  ;;  %vm64_vm1 = vmand %vm60_vm15, %vm62_vm0 }
   0xf   :  { %v231_v32 = vmul.f32 %v2545_v14, %v163_v26  ;;  %v237_v33 = vmul.f32 %v2537_v10, %v163_v26  ;;  %v66_v34 = vsel %vm64_vm1, 1.0, %v2443_v8  ;;  %vm70_vm3 = vcmp.lt.f32.partialorder %v2521_v6, 3.0 }
  0x10   :  { %v239_v35 = vmul.f32 %v2548_v15, %v2568_v28  ;;  %v145_v36 = vsub.f32 %v139_v30, %v143_v25  ;;  %vm76_vm4 = vcmp.ge.f32.partialorder %v2521_v6, 3.0  ;;  %vm72_vm5 = vmand %vm68_vm2, %vm70_vm3  ;;  %vm78_vm6 = vcmp.lt.f32.partialorder %v2521_v6, 4.0  ;;  %v2299_v30 = vld [vmem:[%s3800_s1 + $0x28] sm:$0xff]  }
  0x11   :  { %v233_v37 = vsub.f32 %v229_v29, %v231_v32  ;;  %vm84_vm7 = vcmp.ge.f32.partialorder %v2521_v6, 4.0  ;;  %vm86_vm8 = vcmp.lt.f32.partialorder %v2521_v6, 5.0  ;;  %v74_v41 = vsel %vm72_vm5, 1.0, %v2443_v8  ;;  %vm80_vm9 = vmand %vm76_vm4, %vm78_vm6  ;;  %522 = vmatpush1.bf16.msra.mxu0 %v2299_v30 }
  0x12   :  { %v241_v39 = vsub.f32 %v237_v33, %v239_v35  ;;  %v221_v40 = vmul.f32 %v145_v36, %v2519_v5  ;;  %v2589_v42 = vadd.f32 -2.0, %v2521_v6  ;;  %v82_v44 = vsel %vm80_vm9, 1.0, %v2443_v8  ;;  %vm88_vm10 = vmand %vm84_vm7, %vm86_vm8  ;;  %523 = vmatprep.subr.bf16.mxu0 %v2442_v4 }
  0x13   :  { %v235_v43 = vmul.f32 0.5, %v233_v37  ;;  %v2593_v45 = vadd.f32 -1.0, %v2521_v6  ;;  %v2596_v46 = vadd.f32 -3.0, %v2521_v6  ;;  %v90_v49 = vsel %vm88_vm10, 1.0, %v2443_v8 }
  0x14   :  { %v2598_v47 = vmul.f32 0.5, %v241_v39  ;;  %v225_v48 = vsub.f32 %v221_v40, %v223_v31  ;;  %v158_v50 = vmul.f32 %v2589_v42, %v74_v41  ;;  %v2609_v57 = vadd.f32 -4.0, %v2521_v6 }
  0x15   :  { %v301_v51 = vmul.f32 %v2118_v11, %v235_v43  ;;  %v295_v52 = vmul.f32 %v2545_v14, %v235_v43  ;;  %v150_v53 = vmul.f32 %v2593_v45, %v66_v34  ;;  %v154_v54 = vmul.f32 %v2596_v46, %v74_v41 }
  0x16   :  { %v303_v55 = vmul.f32 %v2548_v15, %v2598_v47  ;;  %v227_v56 = vmul.f32 0.5, %v225_v48  ;;  %v166_v58 = vmul.f32 %v2596_v46, %v82_v44  ;;  %v2613_v60 = vadd.f32 -5.0, %v2521_v6 }
  0x17   :  { %v156_v59 = vsub.f32 %v150_v53, %v154_v54  ;;  %vm52_vm11 = vcmp.ge.f32.partialorder %v2521_v6, 0.0  ;;  %vm54_vm12 = vcmp.lt.f32.partialorder %v2521_v6, 1.0  ;;  %v162_v63 = vmul.f32 %v2609_v57, %v82_v44 }
  0x18   :  { %v305_v61 = vsub.f32 %v301_v51, %v303_v55  ;;  %v293_v62 = vmul.f32 %v227_v56, %v2519_v5  ;;  %vm56_vm13 = vmand %vm52_vm11, %vm54_vm12  ;;  %v144_v2 = vmul.f32 %v2589_v42, %v66_v34  ;;  %v173_v3 = vmul.f32 %v2545_v14, %v2557_v20 }
  0x19   :  { %v170_v7 = vmul.f32 %v2613_v60, %v90_v49  ;;  %v230_v9 = vmul.f32 %v2593_v45, %v156_v59  ;;  %v58_v11 = vsel %vm56_vm13, 1.0, %v2443_v8  ;;  %v164_v17 = vsub.f32 %v158_v50, %v162_v63 }
  0x1a   :  { %v307_v13 = vmul.f32 0.33333334, %v305_v61  ;;  %v297_v16 = vsub.f32 %v293_v62, %v295_v52  ;;  %v140_v18 = vmul.f32 %v58_v11, %v2521_v6  ;;  %v224_v21 = vmul.f32 %v2596_v46, %v156_v59 }
  0x1b   :  { %v172_v19 = vsub.f32 %v166_v58, %v170_v7  ;;  %vm92_vm14 = vcmp.ge.f32.partialorder %v2521_v6, 5.0  ;;  %vm94_vm15 = vcmp.lt.f32.partialorder %v2521_v6, 6.0  ;;  %v232_v22 = vmul.f32 %v2609_v57, %v164_v17 }
  0x1c   :  { %370 = vrot.lane.b32.xlu1 %v307_v13, %s2444_s12  ;;  %v299_v20 = vmul.f32 0.33333334, %v297_v16  ;;  %v238_v23 = vmul.f32 %v2589_v42, %v164_v17  ;;  %v146_v24 = vsub.f32 %v140_v18, %v144_v2  ;;  %vm96_vm0 = vmand %vm92_vm14, %vm94_vm15  ;;  %v174_v27 = vmul.f32 %v2609_v57, %v90_v49 }
  0x1d   :  { %v240_v25 = vmul.f32 %v2613_v60, %v172_v19  ;;  %v98_v26 = vsel %vm96_vm0, 1.0, %v2443_v8  ;;  %v2636_v29 = vadd.f32 -6.0, %v2521_v6  ;;  %v234_v31 = vsub.f32 %v230_v9, %v232_v22 }
  0x1e   :  { %359 = vrot.lane.b32.xlu0 %v299_v20, %s2445_s15  ;;  %v222_v32 = vmul.f32 %v146_v24, %v2521_v6  ;;  %vm91_vm1 = vcmp.ge.f32.partialorder %v2519_v5, 5.0  ;;  %vm93_vm2 = vcmp.lt.f32.partialorder %v2519_v5, 6.0  ;;  %v246_v35 = vmul.f32 %v2596_v46, %v172_v19 }
  0x1f   :  { %v242_v33 = vsub.f32 %v238_v23, %v240_v25  ;;  %v178_v34 = vmul.f32 %v2636_v29, %v98_v26  ;;  %vm95_vm3 = vmand %vm91_vm1, %vm93_vm2  ;;  %v2648_v36 = vadd.f32 -6.0, %v2519_v5  ;;  %v236_v37 = vmul.f32 0.5, %v234_v31 }
  0x20   :  { %v226_v38 = vsub.f32 %v222_v32, %v224_v21  ;;  %v97_v39 = vsel %vm95_vm3, 1.0, %v2443_v8  ;;  %v245_v40 = vmul.f32 %v2541_v12, %v2568_v28  ;;  %vm100_vm4 = vcmp.ge.f32.partialorder %v2521_v6, 6.0 }
  0x21   :  { %v244_v41 = vmul.f32 0.5, %v242_v33  ;;  %v180_v43 = vsub.f32 %v174_v27, %v178_v34  ;;  %v177_v44 = vmul.f32 %v2648_v36, %v97_v39  ;;  %v302_v48 = vmul.f32 %v2593_v45, %v236_v37 }
  0x22   :  { %v228_v49 = vmul.f32 0.5, %v226_v38  ;;  %v296_v50 = vmul.f32 %v2609_v57, %v236_v37  ;;  %vm102_vm5 = vcmp.lt.f32.partialorder %v2521_v6, 7.0 }
  0x23   :  { %16 = vsyncpa [#allocation10], 0  ;;  %v304_v51 = vmul.f32 %v2613_v60, %v244_v41  ;;  %v248_v28 = vmul.f32 %v2636_v29, %v180_v43  ;;  %v310_v52 = vmul.f32 %v2589_v42, %v244_v41  ;;  %v179_v53 = vsub.f32 %v173_v3, %v177_v44  ;;  %v2300_v58 = vld [vmem:[%s3800_s1 + $0x20] sm:$0xff]   ;;  %s2446_s20 = smov 48   ;;  %s2447_s23 = smov 64  }
  0x24   :  { %vm104_vm6 = vmand %vm100_vm4, %vm102_vm5  ;;  %v294_v54 = vmul.f32 %v228_v49, %v2521_v6  ;;  %v182_v45 = vmul.f32 %v2613_v60, %v98_v26  ;;  %v2666_v56 = vadd.f32 -7.0, %v2521_v6  ;;  %v254_v42 = vmul.f32 %v2609_v57, %v180_v43  ;;  %524 = vmatpush1.bf16.msra.mxu0 %v2300_v58  ;;  %s2448_s26 = smov 80   ;;  %s2449_s27 = smov 96  }
  0x25   :  { %v106_v55 = vsel %vm104_vm6, 1.0, %v2443_v8  ;;  %v306_v59 = vsub.f32 %v302_v48, %v304_v51  ;;  %v250_v61 = vsub.f32 %v246_v35, %v248_v28  ;;  %v247_v62 = vmul.f32 %v2648_v36, %v179_v53  ;;  %525 = vmatprep.subr.bf16.mxu0 %v2442_v4  ;;  %v2301_v35 = vld [vmem:[%s3800_s1 + $0x18] sm:$0xff]   ;;  %s2450_s10 = smov 112   ;;  %s2452_s14 = smov [#allocation6]  }
  0x26   :  { %v298_v63 = vsub.f32 %v294_v54, %v296_v50  ;;  %v186_v2 = vmul.f32 %v2666_v56, %v106_v55  ;;  %vm99_vm7 = vcmp.ge.f32.partialorder %v2519_v5, 6.0  ;;  %vm101_vm8 = vcmp.lt.f32.partialorder %v2519_v5, 7.0  ;;  %s2066_s16 = sshll.u32 %s2452_s14, 4  ;;  %s2453_s17 = smov [#allocation4]   ;;  %s2067_s16 = int_to_ptr.vmem [resolvable:$true] %s2066_s16 }
  0x27   :  { %v308_v3 = vmul.f32 0.33333334, %v306_v59  ;;  %v252_v7 = vmul.f32 0.5, %v250_v61  ;;  %v249_v9 = vsub.f32 %v245_v40, %v247_v62  ;;  %vm103_vm9 = vmand %vm99_vm7, %vm101_vm8  ;;  %v181_v11 = vmul.f32 %v2548_v15, %v97_v39  ;;  %s2054_s18 = sshll.u32 %s2453_s17, 4  ;;  %s2356_s19 = scalar_lea.vmem %s2067_s16, 32  ;;  %s2055_s18 = int_to_ptr.vmem [resolvable:$true] %s2054_s18 }
  0x28   :  { %v300_v13 = vmul.f32 0.33333334, %v298_v63  ;;  %v188_v16 = vsub.f32 %v182_v45, %v186_v2  ;;  %v105_v17 = vsel %vm103_vm9, 1.0, %v2443_v8  ;;  %v2680_v18 = vadd.f32 -7.0, %v2519_v5  ;;  %526 = vmatpush1.bf16.msra.mxu0 %v2301_v35  ;;  %p2357_p0 = scmp.ne.s32.totalorder %s2067_s16, %s2356_s19  ;;  %p2361_p1 = scmp.lt.s32.totalorder %s2067_s16, %s2067_s16 }
  0x29   :  { %372 = vrot.lane.b32.xlu1 %v308_v3, %s2444_s12  ;;  %v312_v19 = vmul.f32 %v2636_v29, %v252_v7  ;;  %v251_v21 = vmul.f32 0.5, %v249_v9  ;;  %v309_v20 = vmul.f32 %v2537_v10, %v2598_v47  ;;  %v318_v22 = vmul.f32 %v2596_v46, %v252_v7  ;;  %527 = vmatprep.subr.bf16.mxu0 %v2442_v4  ;;  %v2302_v7 = vld [vmem:[%s3800_s1 + $0x10] sm:$0xff]   ;;  %p2362_p2 = scmp.lt.s32.totalorder %s2356_s19, %s2356_s19 }
  0x2a   :  { %361 = vrot.lane.b32.xlu0 %v300_v13, %s2445_s15  ;;  %v256_v23 = vmul.f32 %v2666_v56, %v188_v16  ;;  %v185_v24 = vmul.f32 %v2680_v18, %v105_v17  ;;  %vm108_vm10 = vcmp.ge.f32.partialorder %v2521_v6, 7.0  ;;  %vm110_vm11 = vcmp.lt.f32.partialorder %v2521_v6, 8.0 }
  0x2b   :  { %v314_v25 = vsub.f32 %v310_v52, %v312_v19  ;;  %v311_v26 = vmul.f32 %v2648_v36, %v251_v21  ;;  %v253_v27 = vmul.f32 %v2545_v14, %v179_v53  ;;  %vm112_vm12 = vmand %vm108_vm10, %vm110_vm11  ;;  %v190_v10 = vmul.f32 %v2636_v29, %v106_v55  ;;  %p2363_p3 = por %p2362_p2, %p2361_p1 }
  0x2c   :  { %v258_v47 = vsub.f32 %v254_v42, %v256_v23  ;;  %v187_v46 = vsub.f32 %v181_v11, %v185_v24  ;;  %v114_v30 = vsel %vm112_vm12, 1.0, %v2443_v8  ;;  %v2697_v31 = vadd.f32 -8.0, %v2521_v6  ;;  %528 = vmatpush1.bf16.msra.mxu0 %v2302_v7 }
  0x2d   :  { %v316_v32 = vmul.f32 0.33333334, %v314_v25  ;;  %v313_v33 = vsub.f32 %v309_v20, %v311_v26  ;;  %v317_v34 = vmul.f32 %v2541_v12, %v251_v21  ;;  %vm107_vm13 = vcmp.ge.f32.partialorder %v2519_v5, 7.0  ;;  %529 = vmatprep.subr.bf16.mxu0 %v2442_v4  ;;  %p2364_p4 = pnand %p2363_p3, %p2357_p0 }
  0x2e   :  { %v260_v37 = vmul.f32 0.5, %v258_v47  ;;  %v255_v38 = vmul.f32 %v2680_v18, %v187_v46  ;;  %v194_v39 = vmul.f32 %v2697_v31, %v114_v30  ;;  %vm109_vm14 = vcmp.lt.f32.partialorder %v2519_v5, 8.0 }
  0x2f   :  { %383 = vrot.lane.b32.xlu1 %v316_v32, %s2446_s20  ;;  %v315_v40 = vmul.f32 0.33333334, %v313_v33  ;;  %v262_v41 = vmul.f32 %v2613_v60, %v188_v16  ;;  %vm111_vm15 = vmand %vm107_vm13, %vm109_vm14  ;;  %v189_v12 = vmul.f32 %v2648_v36, %v105_v17  ;;  %v2710_v43 = vadd.f32 -8.0, %v2519_v5 }
  0x30   :  { %v320_v44 = vmul.f32 %v2666_v56, %v260_v37  ;;  %v257_v48 = vsub.f32 %v253_v27, %v255_v38  ;;  %v196_v49 = vsub.f32 %v190_v10, %v194_v39  ;;  %v261_v50 = vmul.f32 %v2548_v15, %v187_v46  ;;  %v2303_v38 = vld [vmem:[%s3800_s1 + $0x8] sm:$0xff]  }
  0x31   :  { %381 = vrot.lane.b32.xlu0 %v315_v40, %s2446_s20  ;;  %v326_v51 = vmul.f32 %v2609_v57, %v260_v37  ;;  %v113_v28 = vsel %vm111_vm15, 1.0, %v2443_v8  ;;  %vm116_vm0 = vcmp.ge.f32.partialorder %v2521_v6, 8.0  ;;  %vm118_vm1 = vcmp.lt.f32.partialorder %v2521_v6, 9.0  ;;  %530 = vmatpush1.bf16.msra.mxu0 %v2303_v38 }
  0x32   :  { %v322_v52 = vsub.f32 %v318_v22, %v320_v44  ;;  %v259_v53 = vmul.f32 0.5, %v257_v48  ;;  %v264_v54 = vmul.f32 %v2697_v31, %v196_v49  ;;  %v193_v55 = vmul.f32 %v2710_v43, %v113_v28  ;;  %vm120_vm2 = vmand %vm116_vm0, %vm118_vm1  ;;  %531 = vmatprep.subr.bf16.mxu0 %v2442_v4 }
  0x33   :  { %v122_v45 = vsel %vm120_vm2, 1.0, %v2443_v8  ;;  %v198_v58 = vmul.f32 %v2666_v56, %v114_v30  ;;  %v2133_v59 = vadd.f32 -9.0, %v2521_v6  ;;  %vm115_vm3 = vcmp.ge.f32.partialorder %v2519_v5, 8.0 }
  0x34   :  { %v324_v57 = vmul.f32 0.33333334, %v322_v52  ;;  %v319_v61 = vmul.f32 %v2680_v18, %v259_v53  ;;  %v266_v62 = vsub.f32 %v262_v41, %v264_v54  ;;  %v195_v42 = vsub.f32 %v189_v12, %v193_v55 }
  0x35   :  { %v325_v63 = vmul.f32 %v2545_v14, %v259_v53  ;;  %v202_v2 = vmul.f32 %v2133_v59, %v122_v45  ;;  %v270_v3 = vmul.f32 %v2636_v29, %v196_v49  ;;  %vm117_vm4 = vcmp.lt.f32.partialorder %v2519_v5, 9.0 }
  0x36   :  { %394 = vrot.lane.b32.xlu1 %v324_v57, %s2447_s23  ;;  %v321_v9 = vsub.f32 %v317_v34, %v319_v61  ;;  %v268_v11 = vmul.f32 0.5, %v266_v62  ;;  %v263_v13 = vmul.f32 %v2710_v43, %v195_v42  ;;  %vm119_vm5 = vmand %vm115_vm3, %vm117_vm4  ;;  %v2737_v14 = vadd.f32 -9.0, %v2519_v5 }
  0x37   :  { %v204_v16 = vsub.f32 %v198_v58, %v202_v2  ;;  %v121_v17 = vsel %vm119_vm5, 1.0, %v2443_v8  ;;  %v197_v19 = vmul.f32 %v2680_v18, %v113_v28  ;;  %vm124_vm6 = vcmp.ge.f32.partialorder %v2521_v6, 9.0 }
  0x38   :  { %v323_v21 = vmul.f32 0.33333334, %v321_v9  ;;  %v328_v20 = vmul.f32 %v2697_v31, %v268_v11  ;;  %v265_v22 = vsub.f32 %v261_v50, %v263_v13  ;;  %v269_v23 = vmul.f32 %v2648_v36, %v195_v42 }
  0x39   :  { %v272_v24 = vmul.f32 %v2133_v59, %v204_v16  ;;  %v201_v25 = vmul.f32 %v2737_v14, %v121_v17  ;;  %vm126_vm7 = vcmp.lt.f32.partialorder %v2521_v6, 10.0  ;;  %vm132_vm8 = vcmp.ge.f32.partialorder %v2521_v6, 10.0 }
  0x3a   :  { %392 = vrot.lane.b32.xlu0 %v323_v21, %s2447_s23  ;;  %v330_v26 = vsub.f32 %v326_v51, %v328_v20  ;;  %v267_v27 = vmul.f32 0.5, %v265_v22  ;;  %vm128_vm9 = vmand %vm124_vm6, %vm126_vm7  ;;  %vm134_vm10 = vcmp.lt.f32.partialorder %v2521_v6, 11.0  ;;  %v206_v10 = vmul.f32 %v2697_v31, %v122_v45 }
  0x3b   :  { %v274_v47 = vsub.f32 %v270_v3, %v272_v24  ;;  %v203_v46 = vsub.f32 %v197_v19, %v201_v25  ;;  %v130_v30 = vsel %vm128_vm9, 1.0, %v2443_v8  ;;  %vm136_vm11 = vmand %vm132_vm8, %vm134_vm10  ;;  %v2135_v32 = vadd.f32 -10.0, %v2521_v6  ;;  %v2304_v25 = vld [vmem:[%s3800_s1] sm:$0xff]  }
  0x3c   :  { %v332_v33 = vmul.f32 0.33333334, %v330_v26  ;;  %v327_v34 = vmul.f32 %v2710_v43, %v267_v27  ;;  %v334_v35 = vmul.f32 %v2613_v60, %v268_v11  ;;  %v333_v37 = vmul.f32 %v2548_v15, %v267_v27  ;;  %532 = vmatpush1.bf16.msra.mxu0 %v2304_v25 }
  0x3d   :  { %v276_v39 = vmul.f32 0.5, %v274_v47  ;;  %v271_v40 = vmul.f32 %v2737_v14, %v203_v46  ;;  %v138_v41 = vsel %vm136_vm11, 1.0, %v2443_v8  ;;  %v210_v12 = vmul.f32 %v2135_v32, %v130_v30  ;;  %547 = vmatprep.subr.bf16.mxu0 %v2442_v4  ;;  %v568_v4 = vld [vmem:[%s3801_s2 + $0x8] sm:$0xff] }
  0x3e   :  { %405 = vrot.lane.b32.xlu1 %v332_v33, %s2448_s26  ;;  %v329_v44 = vsub.f32 %v325_v63, %v327_v34  ;;  %v214_v48 = vmul.f32 %v2133_v59, %v130_v30  ;;  %v2137_v49 = vadd.f32 -11.0, %v2521_v6  ;;  %vm123_vm12 = vcmp.ge.f32.partialorder %v2519_v5, 9.0 }
  0x3f   :  { %v336_v15 = vmul.f32 %v2133_v59, %v276_v39  ;;  %v273_v60 = vsub.f32 %v269_v23, %v271_v40  ;;  %v212_v50 = vsub.f32 %v206_v10, %v210_v12  ;;  %v278_v51 = vmul.f32 %v2666_v56, %v204_v16 }
  0x40   :  { %v331_v28 = vmul.f32 0.33333334, %v329_v44  ;;  %v218_v52 = vmul.f32 %v2137_v49, %v138_v41  ;;  %vm125_vm13 = vcmp.lt.f32.partialorder %v2519_v5, 10.0  ;;  %vm131_vm14 = vcmp.ge.f32.partialorder %v2519_v5, 10.0 }
  0x41   :  { %v338_v53 = vsub.f32 %v334_v35, %v336_v15  ;;  %v275_v54 = vmul.f32 0.5, %v273_v60  ;;  %v280_v55 = vmul.f32 %v2135_v32, %v212_v50  ;;  %v286_v6 = vmul.f32 %v2697_v31, %v212_v50  ;;  %vm127_vm15 = vmand %vm123_vm12, %vm125_vm13 }
  0x42   :  { %403 = vrot.lane.b32.xlu0 %v331_v28, %s2448_s26  ;;  %v220_v45 = vsub.f32 %v214_v48, %v218_v52  ;;  %v129_v58 = vsel %vm127_vm15, 1.0, %v2443_v8  ;;  %vm133_vm0 = vcmp.lt.f32.partialorder %v2519_v5, 11.0  ;;  %v205_v59 = vmul.f32 %v2710_v43, %v121_v17  ;;  %v570_v52 = vld [vmem:[%s3801_s2 + $0x18] sm:$0xff] }
  0x43   :  { %v340_v57 = vmul.f32 0.33333334, %v338_v53  ;;  %v335_v61 = vmul.f32 %v2737_v14, %v275_v54  ;;  %v282_v62 = vsub.f32 %v278_v51, %v280_v55  ;;  %vm135_vm1 = vmand %vm131_vm14, %vm133_vm0  ;;  %v2134_v42 = vadd.f32 -10.0, %v2519_v5  ;;  %v571_v51 = vld [vmem:[%s3801_s2 + $0x20] sm:$0xff] }
  0x44   :  { %v288_v63 = vmul.f32 %v2137_v49, %v220_v45  ;;  %v137_v31 = vsel %vm135_vm1, 1.0, %v2443_v8  ;;  %v213_v2 = vmul.f32 %v2737_v14, %v129_v58  ;;  %v2136_v3 = vadd.f32 -11.0, %v2519_v5  ;;  %v572_v45 = vld [vmem:[%s3801_s2 + $0x28] sm:$0xff] }
  0x45   :  { %416 = vrot.lane.b32.xlu1 %v340_v57, %s2449_s27  ;;  %v337_v7 = vsub.f32 %v333_v37, %v335_v61  ;;  %v284_v9 = vmul.f32 0.5, %v282_v62  ;;  %v342_v11 = vmul.f32 %v2636_v29, %v276_v39  ;;  %v209_v13 = vmul.f32 %v2134_v42, %v129_v58  ;;  %v575_v58 = vld [vmem:[%s3801_s2 + $0x40] sm:$0xff]  ;;  %v997_v57 = vld [vmem:[%s3802_s3 + $0x8] sm:$0xff] }
  0x46   :  { %v290_v16 = vsub.f32 %v286_v6, %v288_v63  ;;  %v217_v17 = vmul.f32 %v2136_v3, %v137_v31  ;;  %v277_v22 = vmul.f32 %v2680_v18, %v203_v46  ;;  %v2112_v5 = vmul.f32 -1.442695, %v2507_v0  ;;  %v996_v61 = vld [vmem:[%s3802_s3] sm:$0xff]  ;;  %v999_v31 = vld [vmem:[%s3802_s3 + $0x18] sm:$0xff] }
  0x47   :  { %v339_v19 = vmul.f32 0.33333334, %v337_v7  ;;  %v344_v21 = vmul.f32 %v2135_v32, %v284_v9  ;;  %v211_v20 = vsub.f32 %v205_v59, %v209_v13  ;;  %v350_v14 = vmul.f32 %v2666_v56, %v284_v9  ;;  %v2305_v56 = vld [vmem:[%s3800_s1 + $0x40] sm:$0xff]   ;;  %v574_v59 = vld [vmem:[%s3801_s2 + $0x38] sm:$0xff]  ;;  %v1002_v9 = vld [vmem:[%s3802_s3 + $0x30] sm:$0xff] }
  0x48   :  { %v292_v23 = vmul.f32 0.5, %v290_v16  ;;  %v219_v24 = vsub.f32 %v213_v2, %v217_v17  ;;  %v2113_v10 = vmul.f32 -1.442695, %v2512_v1  ;;  %2324 = vpow2.f32 %v2112_v5  ;;  %548 = vmatpush2.bf16.msra.mxu0 %v2305_v56  ;;  %v1000_v7 = vld [vmem:[%s3802_s3 + $0x20] sm:$0xff] }
  0x49   :  { %414 = vrot.lane.b32.xlu0 %v339_v19, %s2449_s27  ;;  %v346_v29 = vsub.f32 %v342_v11, %v344_v21  ;;  %v279_v26 = vmul.f32 %v2134_v42, %v211_v20  ;;  %v285_v27 = vmul.f32 %v2710_v43, %v211_v20  ;;  %v341_v35 = vmul.f32 %v2648_v36, %v275_v54  ;;  %v569_v36 = vld [vmem:[%s3801_s2 + $0x10] sm:$0xff]  ;;  %v1004_v11 = vld [vmem:[%s3802_s3 + $0x40] sm:$0xff] }
  0x4a   :  { %v352_v47 = vmul.f32 %v2137_v49, %v292_v23  ;;  %v287_v46 = vmul.f32 %v2136_v3, %v219_v24  ;;  %2326 = vpow2.f32 %v2113_v10  ;;  %vm3808_vm2 = vcmask 130048   ;;  %v573_v54 = vld [vmem:[%s3801_s2 + $0x30] sm:$0xff] }
  0x4b   :  { %v348_v30 = vmul.f32 0.33333334, %v346_v29  ;;  %v281_v32 = vsub.f32 %v277_v22, %v279_v26  ;;  %vm365_vm3 = vcmask 261248   ;;  %vm376_vm4 = vcmask 392448  }
  0x4c   :  { %v354_v33 = vsub.f32 %v350_v14, %v352_v47  ;;  %v289_v34 = vsub.f32 %v285_v27, %v287_v46  ;;  %vm387_vm5 = vcmask 523648   ;;  %vm398_vm6 = vcmask 654848  }
  0x4d   :  { %427 = vrot.lane.b32.xlu1 %v348_v30, %s2450_s10  ;;  %v283_v43 = vmul.f32 0.5, %v281_v32  ;;  %vm409_vm7 = vcmask 786048   ;;  %vm420_vm8 = vcmask 917248   ;;  %vm431_vm9 = vcmask 1048448  }
  0x4e   :  { %v356_v37 = vmul.f32 0.33333334, %v354_v33  ;;  %v291_v38 = vmul.f32 0.5, %v289_v34  ;;  %vm3809_vm11 = vcmask 261120  }
  0x4f   :  { %v343_v39 = vmul.f32 %v2134_v42, %v283_v43  ;;  %v349_v40 = vmul.f32 %v2680_v18, %v283_v43  ;;  %v567_v18 = vld [vmem:[%s3801_s2] sm:$0xff] }
  0x50   :  { %v351_v41 = vmul.f32 %v2136_v3, %v291_v38  ;;  %435 = vst.msk [vmem:[#allocation2 + $0x18] sm:$0xff] %vm3808_vm2, %v356_v37  ;;  %v998_v3 = vld [vmem:[%s3802_s3 + $0x10] sm:$0xff] }
  0x51   :  { %v345_v12 = vsub.f32 %v341_v35, %v343_v39  ;;  %909 = vperm.xlu1 %2296, %v568_v4  }
  0x52   :  { %v353_v44 = vsub.f32 %v349_v40, %v351_v41 }
  0x53   :  { %v347_v48 = vmul.f32 0.33333334, %v345_v12 }
  0x54   :  { %v355_v49 = vmul.f32 0.33333334, %v353_v44 }
  0x55   :  { %425 = vrot.lane.b32.xlu0 %v347_v48, %s2450_s10  ;;  %v2325_v15 = vpop.eup %2324  ;;  %918 = vperm.xlu1 %2296, %v569_v36  }
  0x56   :  { %434 = vst.msk [vmem:[#allocation2 + $0x8] sm:$0xff] %vm3808_vm2, %v355_v49  ;;  %v36_v50 = vadd.f32 1.0, %v2325_v15 }
  0x57   :  { %v2327_v60 = vpop.eup %2326  ;;  %v439_v53 = vld [vmem:[#allocation2 + $0x18] sm:$0xff] }
  0x58   :  { %v37_v28 = vadd.f32 1.0, %v2327_v60  ;;  %2328 = vrcp.f32 %v36_v50 }
  0x59   :  { %902 = vperm.xlu0 %2295, %v567_v18   ;;  %936 = vperm.xlu1 %2296, %v571_v51  }
  0x5a   :  { %2330 = vrcp.f32 %v37_v28 }
  0x5d   :  { %v437_v55 = vld [vmem:[#allocation2 + $0x8] sm:$0xff]  ;;  %927 = vperm.xlu0 %2295, %v570_v52   ;;  %954 = vperm.xlu1 %2296, %v573_v54  }
  0x5e   :  { %v441_v6 = vpack.c.bf16 %v439_v53, %v437_v55 }
  0x60   :  { %2147 = vmatprep.mubr.msk.bf16.mxu0 %vm3808_vm2, %v441_v6 }
  0x61   :  { %945 = vperm.xlu0 %2295, %v572_v45   ;;  %972 = vperm.xlu1 %2296, %v575_v58  }
  0x65   :  { %963 = vperm.xlu0 %2295, %v574_v59   ;;  %v2329_v62 = vpop.eup %2328  ;;  %1338 = vperm.xlu1 %2296, %v997_v57  }
  0x66   :  { %v42_v63 = vmul.f32 %v2329_v62, %v2507_v0  ;;  %v1001_v0 = vld [vmem:[%s3802_s3 + $0x28] sm:$0xff] }
  0x67   :  { %v2331_v42 = vpop.eup %2330 }
  0x68   :  { %v43_v2 = vmul.f32 %v2331_v42, %v2512_v1  ;;  %45 = vst.msk [vmem:[#allocation2] sm:$0xff] %vm3808_vm2, %v42_v63  ;;  %v1003_v1 = vld [vmem:[%s3802_s3 + $0x38] sm:$0xff] }
  0x69   :  { %1331 = vperm.xlu0 %2295, %v996_v61   ;;  %1356 = vperm.xlu1 %2296, %v999_v31  }
  0x6a   :  { %46 = vst.msk [vmem:[#allocation2 + $0x10] sm:$0xff] %vm3808_vm2, %v43_v2 }
  0x6d   :  { %1347 = vperm.xlu0 %2295, %v998_v3   ;;  %1374 = vperm.xlu1 %2296, %v1001_v0  }
  0x71   :  { %1365 = vperm.xlu0 %2295, %v1000_v7   ;;  %1392 = vperm.xlu1 %2296, %v1003_v1  }
  0x75   :  { %1383 = vperm.xlu0 %2295, %v1002_v9  }
  0x79   :  { %1401 = vperm.xlu0 %2295, %v1004_v11  }
  0x8e   :  { %v371_v13 = vpop.permute.xlu1 %370 }
  0x90   :  { %v360_v16 = vpop.permute.xlu0 %359 }
  0x91   :  { %366 = vst.msk [vmem:[#allocation2] sm:$0xff] %vm365_vm3, %v360_v16 }
  0x92   :  { %377 = vst.msk [vmem:[#allocation2] sm:$0xff] %vm376_vm4, %v371_v13 }
  0x9b   :  { %v373_v17 = vpop.permute.xlu1 %372 }
  0x9c   :  { %v362_v19 = vpop.permute.xlu0 %361 }
  0x9d   :  { %367 = vst.msk [vmem:[#allocation2 + $0x10] sm:$0xff] %vm365_vm3, %v362_v19 }
  0x9e   :  { %378 = vst.msk [vmem:[#allocation2 + $0x10] sm:$0xff] %vm376_vm4, %v373_v17 }
  0xa1   :  { %v384_v21 = vpop.permute.xlu1 %383 }
  0xa2   :  { %389 = vst.msk [vmem:[#allocation2 + $0x10] sm:$0xff] %vm387_vm5, %v384_v21 }
  0xa3   :  { %v382_v20 = vpop.permute.xlu0 %381 }
  0xa4   :  { %388 = vst.msk [vmem:[#allocation2] sm:$0xff] %vm387_vm5, %v382_v20 }
  0xa8   :  { %v395_v22 = vpop.permute.xlu1 %394 }
  0xa9   :  { %400 = vst.msk [vmem:[#allocation2 + $0x10] sm:$0xff] %vm398_vm6, %v395_v22 }
  0xac   :  { %v393_v23 = vpop.permute.xlu0 %392 }
  0xad   :  { %399 = vst.msk [vmem:[#allocation2] sm:$0xff] %vm398_vm6, %v393_v23 }
  0xb0   :  { %v406_v14 = vpop.permute.xlu1 %405 }
  0xb1   :  { %411 = vst.msk [vmem:[#allocation2 + $0x10] sm:$0xff] %vm409_vm7, %v406_v14 }
  0xb4   :  { %v404_v24 = vpop.permute.xlu0 %403 }
  0xb5   :  { %410 = vst.msk [vmem:[#allocation2] sm:$0xff] %vm409_vm7, %v404_v24 }
  0xb7   :  { %v417_v5 = vpop.permute.xlu1 %416 }
  0xb8   :  { %422 = vst.msk [vmem:[#allocation2 + $0x10] sm:$0xff] %vm420_vm8, %v417_v5 }
  0xbb   :  { %v415_v25 = vpop.permute.xlu0 %414 }
  0xbc   :  { %421 = vst.msk [vmem:[#allocation2] sm:$0xff] %vm420_vm8, %v415_v25 }
  0xbf   :  { %v428_v29 = vpop.permute.xlu1 %427 }
  0xc0   :  { %433 = vst.msk [vmem:[#allocation2 + $0x10] sm:$0xff] %vm431_vm9, %v428_v29 }
  0xc7   :  { %v426_v26 = vpop.permute.xlu0 %425  ;;  %v438_v27 = vld [vmem:[#allocation2 + $0x10] sm:$0xff] }
  0xc8   :  { %432 = vst.msk [vmem:[#allocation2] sm:$0xff] %vm431_vm9, %v426_v26 }
  0xcf   :  { %v436_v10 = vld [vmem:[#allocation2] sm:$0xff] }
  0xd0   :  { %v440_v47 = vpack.c.bf16 %v438_v27, %v436_v10 }
  0xd2   :  { %550 = vmatmul.mubr.bf16.vlgmr.msra.gmra.mxu0 %v440_v47 }
 0x192   :  { %v551_v46 = vpop.f32.mrf.mxu0 }
 0x193   :  { %vm558_vm10 = vcmp.ge.f32.partialorder %v551_v46, 0.0  ;;  %v560_v56 = vmul.f32 0.1, %v551_v46 }
 0x194   :  { %v553_v30 = vpop.f32.mrf.mxu0 }
 0x195   :  { %v2856_v32 = vsel %vm558_vm10, %v551_v46, %v560_v56 }
 0x196   :  { %v2148_v33 = vmul.f32 -1.442695, %v2856_v32  ;;  %v2150_v34 = vadd.f32 2.2, %v2856_v32  ;;  %v554_v43 = vpop.f32.mrf.mxu0  ;;  %565 = vst.msk [vmem:[#allocation4] sm:$0xff] %vm3809_vm11, %v2856_v32 }
 0x197   :  { %vm559_vm12 = vcmp.ge.f32.partialorder %v554_v43, 0.0  ;;  %v561_v35 = vmul.f32 0.1, %v554_v43 }
 0x198   :  { %2332 = vpow2.f32 %v2148_v33  ;;  %v2862_v37 = vmul.f32 2.5, %v2150_v34  ;;  %v556_v38 = vpop.f32.mrf.mxu0 }
 0x199   :  { %v2864_v39 = vsel %vm559_vm12, %v554_v43, %v561_v35 }
 0x19a   :  { %v2149_v40 = vmul.f32 -1.442695, %v2864_v39  ;;  %v2151_v41 = vadd.f32 2.2, %v2864_v39  ;;  %vm594_vm13 = vcmp.ge.f32.partialorder %v2862_v37, 0.0  ;;  %vm596_vm14 = vcmp.lt.f32.partialorder %v2862_v37, 1.0 }
 0x19b   :  { %566 = vst.msk [vmem:[#allocation4 + $0x8] sm:$0xff] %vm3809_vm11, %v2864_v39  ;;  %vm598_vm15 = vmand %vm594_vm13, %vm596_vm14  ;;  %vm602_vm0 = vcmp.ge.f32.partialorder %v2862_v37, 1.0  ;;  %vm604_vm1 = vcmp.lt.f32.partialorder %v2862_v37, 2.0  ;;  %vm610_vm3 = vcmp.ge.f32.partialorder %v2862_v37, 2.0  ;;  %vm612_vm4 = vcmp.lt.f32.partialorder %v2862_v37, 3.0 }
 0x19c   :  { %2334 = vpow2.f32 %v2149_v40  ;;  %v2876_v12 = vmul.f32 2.5, %v2151_v41  ;;  %v600_v44 = vsel %vm598_vm15, 1.0, %v2443_v8  ;;  %vm606_vm5 = vmand %vm602_vm0, %vm604_vm1  ;;  %vm618_vm6 = vcmp.ge.f32.partialorder %v2862_v37, 3.0 }
 0x19d   :  { %v608_v4 = vsel %vm606_vm5, 1.0, %v2443_v8  ;;  %vm614_vm7 = vmand %vm610_vm3, %vm612_vm4  ;;  %vm620_vm8 = vcmp.lt.f32.partialorder %v2862_v37, 4.0  ;;  %v682_v48 = vmul.f32 %v600_v44, %v2862_v37  ;;  %v2884_v49 = vadd.f32 -2.0, %v2862_v37 }
 0x19e   :  { %vm595_vm9 = vcmp.ge.f32.partialorder %v2876_v12, 0.0  ;;  %vm597_vm10 = vcmp.lt.f32.partialorder %v2876_v12, 1.0  ;;  %vm603_vm12 = vcmp.ge.f32.partialorder %v2876_v12, 1.0  ;;  %vm605_vm13 = vcmp.lt.f32.partialorder %v2876_v12, 2.0  ;;  %vm622_vm14 = vmand %vm618_vm6, %vm620_vm8 }
 0x19f   :  { %vm599_vm15 = vmand %vm595_vm9, %vm597_vm10  ;;  %vm611_vm0 = vcmp.ge.f32.partialorder %v2876_v12, 2.0  ;;  %vm613_vm1 = vcmp.lt.f32.partialorder %v2876_v12, 3.0  ;;  %v616_v36 = vsel %vm614_vm7, 1.0, %v2443_v8  ;;  %vm619_vm3 = vcmp.ge.f32.partialorder %v2876_v12, 3.0 }
 0x1a0   :  { %v601_v18 = vsel %vm599_vm15, 1.0, %v2443_v8  ;;  %vm607_vm4 = vmand %vm603_vm12, %vm605_vm13  ;;  %vm621_vm5 = vcmp.lt.f32.partialorder %v2876_v12, 4.0  ;;  %v624_v15 = vsel %vm622_vm14, 1.0, %v2443_v8  ;;  %v2898_v60 = vadd.f32 -2.0, %v2876_v12 }
 0x1a1   :  { %v609_v50 = vsel %vm607_vm4, 1.0, %v2443_v8  ;;  %vm615_vm6 = vmand %vm611_vm0, %vm613_vm1  ;;  %v683_v51 = vmul.f32 %v601_v18, %v2876_v12  ;;  %v686_v28 = vmul.f32 %v2884_v49, %v608_v4  ;;  %v2904_v52 = vadd.f32 -1.0, %v2862_v37 }
 0x1a2   :  { %v617_v53 = vsel %vm615_vm6, 1.0, %v2443_v8  ;;  %vm623_vm7 = vmand %vm619_vm3, %vm621_vm5  ;;  %v687_v54 = vmul.f32 %v2898_v60, %v609_v50  ;;  %v2909_v55 = vadd.f32 -1.0, %v2876_v12  ;;  %v2912_v6 = vadd.f32 -3.0, %v2862_v37 }
 0x1a3   :  { %v625_v45 = vsel %vm623_vm7, 1.0, %v2443_v8  ;;  %v688_v58 = vsub.f32 %v682_v48, %v686_v28  ;;  %v692_v59 = vmul.f32 %v2904_v52, %v608_v4  ;;  %v2917_v57 = vadd.f32 -3.0, %v2876_v12 }
 0x1a4   :  { %v689_v61 = vsub.f32 %v683_v51, %v687_v54  ;;  %v693_v62 = vmul.f32 %v2909_v55, %v609_v50  ;;  %v696_v42 = vmul.f32 %v2912_v6, %v616_v36  ;;  %v700_v63 = vmul.f32 %v2884_v49, %v616_v36 }
 0x1a5   :  { %v2333_v31 = vpop.eup %2332  ;;  %v697_v2 = vmul.f32 %v2917_v57, %v617_v53  ;;  %v701_v3 = vmul.f32 %v2898_v60, %v617_v53  ;;  %v2925_v0 = vadd.f32 -4.0, %v2862_v37  ;;  %v2928_v7 = vadd.f32 -4.0, %v2876_v12 }
 0x1a6   :  { %v582_v1 = vadd.f32 1.0, %v2333_v31  ;;  %v698_v9 = vsub.f32 %v692_v59, %v696_v42  ;;  %v764_v11 = vmul.f32 %v688_v58, %v2862_v37  ;;  %v765_v13 = vmul.f32 %v689_v61, %v2876_v12 }
 0x1a7   :  { %v699_v16 = vsub.f32 %v693_v62, %v697_v2  ;;  %v704_v17 = vmul.f32 %v2925_v0, %v624_v15  ;;  %v705_v19 = vmul.f32 %v2928_v7, %v625_v45  ;;  %vm626_vm8 = vcmp.ge.f32.partialorder %v2862_v37, 4.0 }
 0x1a8   :  { %2336 = vrcp.f32 %v582_v1  ;;  %v766_v21 = vmul.f32 %v2912_v6, %v698_v9  ;;  %v772_v20 = vmul.f32 %v2904_v52, %v698_v9  ;;  %vm627_vm9 = vcmp.ge.f32.partialorder %v2876_v12, 4.0 }
 0x1a9   :  { %v2335_v22 = vpop.eup %2334  ;;  %v706_v23 = vsub.f32 %v700_v63, %v704_v17  ;;  %v707_v14 = vsub.f32 %v701_v3, %v705_v19  ;;  %v767_v24 = vmul.f32 %v2917_v57, %v699_v16  ;;  %v773_v5 = vmul.f32 %v2909_v55, %v699_v16 }
 0x1aa   :  { %v768_v25 = vsub.f32 %v764_v11, %v766_v21  ;;  %vm628_vm10 = vcmp.lt.f32.partialorder %v2862_v37, 5.0  ;;  %vm629_vm12 = vcmp.lt.f32.partialorder %v2876_v12, 5.0  ;;  %v583_v29 = vadd.f32 1.0, %v2335_v22 }
 0x1ab   :  { %v769_v26 = vsub.f32 %v765_v13, %v767_v24  ;;  %v774_v27 = vmul.f32 %v2925_v0, %v706_v23  ;;  %v775_v10 = vmul.f32 %v2928_v7, %v707_v14  ;;  %vm630_vm13 = vmand %vm626_vm8, %vm628_vm10  ;;  %v708_v34 = vmul.f32 %v2912_v6, %v624_v15 }
 0x1ac   :  { %v770_v47 = vmul.f32 0.5, %v768_v25  ;;  %vm631_vm14 = vmand %vm627_vm9, %vm629_vm12  ;;  %v632_v30 = vsel %vm630_vm13, 1.0, %v2443_v8  ;;  %v709_v43 = vmul.f32 %v2917_v57, %v625_v45  ;;  %v2953_v35 = vadd.f32 -5.0, %v2862_v37 }
 0x1ad   :  { %v776_v46 = vsub.f32 %v772_v20, %v774_v27  ;;  %v777_v56 = vsub.f32 %v773_v5, %v775_v10  ;;  %v633_v33 = vsel %vm631_vm14, 1.0, %v2443_v8  ;;  %v2956_v38 = vadd.f32 -5.0, %v2876_v12  ;;  %v910_v27 = vpop.permute.xlu1 %909 }
 0x1ae   :  { %2338 = vrcp.f32 %v583_v29  ;;  %v771_v40 = vmul.f32 0.5, %v769_v26  ;;  %v712_v4 = vmul.f32 %v2953_v35, %v632_v30  ;;  %vm634_vm15 = vcmp.ge.f32.partialorder %v2862_v37, 5.0  ;;  %v903_v26 = vpop.permute.xlu0 %902 }
 0x1af   :  { %v778_v41 = vmul.f32 0.5, %v776_v46  ;;  %v779_v44 = vmul.f32 0.5, %v777_v56  ;;  %v713_v48 = vmul.f32 %v2956_v38, %v633_v33  ;;  %v836_v36 = vmul.f32 %v770_v47, %v2862_v37 }
 0x1b0   :  { %v780_v15 = vmul.f32 %v2884_v49, %v706_v23  ;;  %vm635_vm0 = vcmp.ge.f32.partialorder %v2876_v12, 5.0  ;;  %v714_v50 = vsub.f32 %v708_v34, %v712_v4  ;;  %vm636_vm1 = vcmp.lt.f32.partialorder %v2862_v37, 6.0 }
 0x1b1   :  { %v838_v18 = vmul.f32 %v2925_v0, %v778_v41  ;;  %v715_v51 = vsub.f32 %v709_v43, %v713_v48  ;;  %vm637_vm3 = vcmp.lt.f32.partialorder %v2876_v12, 6.0  ;;  %v837_v28 = vmul.f32 %v771_v40, %v2876_v12  ;;  %vm638_vm4 = vmand %vm634_vm15, %vm636_vm1 }
 0x1b2   :  { %v839_v53 = vmul.f32 %v2928_v7, %v779_v44  ;;  %v781_v54 = vmul.f32 %v2898_v60, %v707_v14  ;;  %v782_v45 = vmul.f32 %v2953_v35, %v714_v50  ;;  %vm639_vm5 = vmand %vm635_vm0, %vm637_vm3  ;;  %v640_v58 = vsel %vm638_vm4, 1.0, %v2443_v8 }
 0x1b3   :  { %v716_v59 = vmul.f32 %v2925_v0, %v632_v30  ;;  %v2974_v61 = vadd.f32 -6.0, %v2862_v37  ;;  %v783_v42 = vmul.f32 %v2956_v38, %v715_v51  ;;  %v641_v63 = vsel %vm639_vm5, 1.0, %v2443_v8 }
 0x1b4   :  { %v717_v31 = vmul.f32 %v2928_v7, %v633_v33  ;;  %v2980_v2 = vadd.f32 -6.0, %v2876_v12  ;;  %v840_v3 = vsub.f32 %v836_v36, %v838_v18  ;;  %v784_v1 = vsub.f32 %v780_v15, %v782_v45 }
 0x1b5   :  { %v2337_v62 = vpop.eup %2336  ;;  %v720_v9 = vmul.f32 %v2974_v61, %v640_v58  ;;  %v841_v11 = vsub.f32 %v837_v28, %v839_v53  ;;  %v785_v19 = vsub.f32 %v781_v54, %v783_v42  ;;  %v788_v23 = vmul.f32 %v2912_v6, %v714_v50 }
 0x1b6   :  { %v721_v13 = vmul.f32 %v2980_v2, %v641_v63  ;;  %v588_v17 = vmul.f32 %v2337_v62, %v2856_v32  ;;  %v786_v21 = vmul.f32 0.5, %v784_v1  ;;  %v842_v22 = vmul.f32 0.33333334, %v840_v3 }
 0x1b7   :  { %v722_v16 = vsub.f32 %v716_v59, %v720_v9  ;;  %v789_v14 = vmul.f32 %v2917_v57, %v715_v51  ;;  %vm642_vm6 = vcmp.ge.f32.partialorder %v2862_v37, 6.0  ;;  %v843_v24 = vmul.f32 0.33333334, %v841_v11 }
 0x1b8   :  { %v723_v20 = vsub.f32 %v717_v31, %v721_v13  ;;  %vm643_vm7 = vcmp.ge.f32.partialorder %v2876_v12, 6.0  ;;  %v844_v32 = vmul.f32 %v2904_v52, %v778_v41  ;;  %vm644_vm8 = vcmp.lt.f32.partialorder %v2862_v37, 7.0 }
 0x1b9   :  { %v790_v5 = vmul.f32 %v2974_v61, %v722_v16  ;;  %v905_v10 = vmul.f32 %v903_v26, %v588_v17  ;;  %v787_v47 = vmul.f32 0.5, %v785_v19  ;;  %v846_v46 = vmul.f32 %v2953_v35, %v786_v21  ;;  %vm646_vm10 = vmand %vm642_vm6, %vm644_vm8  ;;  %v919_v17 = vpop.permute.xlu1 %918 }
 0x1ba   :  { %v791_v25 = vmul.f32 %v2980_v2, %v723_v20  ;;  %vm645_vm9 = vcmp.lt.f32.partialorder %v2876_v12, 7.0  ;;  %v912_v56 = vmul.f32 %v910_v27, %v842_v22  ;;  %v845_v30 = vmul.f32 %v2909_v55, %v779_v44 }
 0x1bb   :  { %v2339_v29 = vpop.eup %2338  ;;  %v792_v33 = vsub.f32 %v788_v23, %v790_v5  ;;  %vm647_vm12 = vmand %vm643_vm7, %vm645_vm9  ;;  %v913_v43 = vmul.f32 %v910_v27, %v843_v24  ;;  %v648_v40 = vsel %vm646_vm10, 1.0, %v2443_v8  ;;  %v724_v4 = vmul.f32 %v2953_v35, %v640_v58 }
 0x1bc   :  { %v793_v34 = vsub.f32 %v789_v14, %v791_v25  ;;  %v589_v52 = vmul.f32 %v2339_v29, %v2864_v39  ;;  %v649_v41 = vsel %vm647_vm12, 1.0, %v2443_v8  ;;  %v725_v48 = vmul.f32 %v2956_v38, %v641_v63 }
 0x1bd   :  { %v3004_v36 = vadd.f32 -7.0, %v2862_v37  ;;  %v3007_v55 = vadd.f32 -7.0, %v2876_v12  ;;  %v3009_v44 = vadd.f32 %v912_v56, %v905_v10  ;;  %v847_v18 = vmul.f32 %v2956_v38, %v787_v47 }
 0x1be   :  { %v848_v15 = vsub.f32 %v844_v32, %v846_v46  ;;  %v3013_v39 = vmul.f32 %v2884_v49, %v786_v21  ;;  %v794_v50 = vmul.f32 0.5, %v792_v33  ;;  %v795_v51 = vmul.f32 0.5, %v793_v34 }
 0x1bf   :  { %v728_v28 = vmul.f32 %v3004_v36, %v648_v40  ;;  %v729_v53 = vmul.f32 %v3007_v55, %v649_v41  ;;  %v906_v54 = vmul.f32 %v903_v26, %v589_v52  ;;  %v853_v45 = vmul.f32 %v2898_v60, %v787_v47 }
 0x1c0   :  { %v796_v58 = vmul.f32 %v2925_v0, %v722_v16  ;;  %v797_v59 = vmul.f32 %v2928_v7, %v723_v20  ;;  %vm650_vm13 = vcmp.ge.f32.partialorder %v2862_v37, 7.0  ;;  %vm651_vm14 = vcmp.ge.f32.partialorder %v2876_v12, 7.0 }
 0x1c1   :  { %v730_v62 = vsub.f32 %v724_v4, %v728_v28  ;;  %v731_v42 = vsub.f32 %v725_v48, %v729_v53  ;;  %v849_v49 = vsub.f32 %v845_v30, %v847_v18  ;;  %v850_v63 = vmul.f32 0.33333334, %v848_v15 }
 0x1c2   :  { %vm652_vm15 = vcmp.lt.f32.partialorder %v2862_v37, 8.0  ;;  %vm653_vm0 = vcmp.lt.f32.partialorder %v2876_v12, 8.0  ;;  %v854_v31 = vmul.f32 %v2974_v61, %v794_v50  ;;  %v855_v60 = vmul.f32 %v2980_v2, %v795_v51 }
 0x1c3   :  { %v798_v3 = vmul.f32 %v3004_v36, %v730_v62  ;;  %v799_v1 = vmul.f32 %v3007_v55, %v731_v42  ;;  %vm654_vm1 = vmand %vm650_vm13, %vm652_vm15  ;;  %v732_v11 = vmul.f32 %v2974_v61, %v648_v40  ;;  %v733_v13 = vmul.f32 %v2980_v2, %v649_v41 }
 0x1c4   :  { %vm655_vm3 = vmand %vm651_vm14, %vm653_vm0  ;;  %v656_v9 = vsel %vm654_vm1, 1.0, %v2443_v8  ;;  %v3032_v16 = vadd.f32 -8.0, %v2862_v37  ;;  %v3036_v22 = vadd.f32 -8.0, %v2876_v12  ;;  %v915_v23 = vadd.f32 %v913_v43, %v906_v54 }
 0x1c5   :  { %v800_v19 = vsub.f32 %v796_v58, %v798_v3  ;;  %v801_v21 = vsub.f32 %v797_v59, %v799_v1  ;;  %v657_v20 = vsel %vm655_vm3, 1.0, %v2443_v8  ;;  %v851_v14 = vmul.f32 0.33333334, %v849_v49 }
 0x1c6   :  { %v921_v24 = vmul.f32 %v919_v17, %v850_v63  ;;  %v736_v5 = vmul.f32 %v3032_v16, %v656_v9  ;;  %v737_v26 = vmul.f32 %v3036_v22, %v657_v20  ;;  %v804_v32 = vmul.f32 %v2953_v35, %v730_v62  ;;  %v928_v62 = vpop.permute.xlu0 %927 }
 0x1c7   :  { %v802_v25 = vmul.f32 0.5, %v800_v19  ;;  %v3039_v29 = vmul.f32 0.5, %v801_v21  ;;  %vm658_vm4 = vcmp.ge.f32.partialorder %v2862_v37, 8.0  ;;  %vm659_vm5 = vcmp.ge.f32.partialorder %v2876_v12, 8.0 }
 0x1c8   :  { %v738_v27 = vsub.f32 %v732_v11, %v736_v5  ;;  %vm660_vm6 = vcmp.lt.f32.partialorder %v2862_v37, 9.0  ;;  %v856_v10 = vsub.f32 %v3013_v39, %v854_v31  ;;  %v857_v47 = vsub.f32 %v853_v45, %v855_v60 }
 0x1c9   :  { %v860_v46 = vmul.f32 %v2912_v6, %v794_v50  ;;  %v739_v56 = vsub.f32 %v733_v13, %v737_v26  ;;  %vm662_vm7 = vmand %vm658_vm4, %vm660_vm6  ;;  %v861_v30 = vmul.f32 %v2917_v57, %v795_v51  ;;  %v805_v33 = vmul.f32 %v2956_v38, %v731_v42 }
 0x1ca   :  { %v806_v34 = vmul.f32 %v3032_v16, %v738_v27  ;;  %vm661_vm8 = vcmp.lt.f32.partialorder %v2876_v12, 9.0  ;;  %v862_v43 = vmul.f32 %v3004_v36, %v802_v25  ;;  %v863_v52 = vmul.f32 %v3007_v55, %v3039_v29 }
 0x1cb   :  { %v807_v40 = vmul.f32 %v3036_v22, %v739_v56  ;;  %vm663_vm9 = vmand %vm659_vm5, %vm661_vm8  ;;  %v664_v6 = vsel %vm662_vm7, 1.0, %v2443_v8  ;;  %v740_v57 = vmul.f32 %v3004_v36, %v656_v9  ;;  %v3060_v48 = vadd.f32 -9.0, %v2862_v37 }
 0x1cc   :  { %v808_v41 = vsub.f32 %v804_v32, %v806_v34  ;;  %v665_v4 = vsel %vm663_vm9, 1.0, %v2443_v8  ;;  %v922_v18 = vmul.f32 %v919_v17, %v851_v14  ;;  %v858_v15 = vmul.f32 0.33333334, %v856_v10 }
 0x1cd   :  { %v741_v39 = vmul.f32 %v3007_v55, %v657_v20  ;;  %v3064_v50 = vadd.f32 -9.0, %v2876_v12  ;;  %v923_v51 = vadd.f32 %v921_v24, %v3009_v44  ;;  %v859_v28 = vmul.f32 0.33333334, %v857_v47  ;;  %v937_v47 = vpop.permute.xlu1 %936 }
 0x1ce   :  { %v744_v53 = vmul.f32 %v3060_v48, %v664_v6  ;;  %v924_v54 = vadd.f32 %v922_v18, %v915_v23  ;;  %v864_v45 = vsub.f32 %v860_v46, %v862_v43  ;;  %v809_v58 = vsub.f32 %v805_v33, %v807_v40 }
 0x1cf   :  { %v745_v59 = vmul.f32 %v3064_v50, %v665_v4  ;;  %v865_v42 = vsub.f32 %v861_v30, %v863_v52  ;;  %v810_v49 = vmul.f32 0.5, %v808_v41  ;;  %v812_v31 = vmul.f32 %v2974_v61, %v738_v27 }
 0x1d0   :  { %v746_v63 = vsub.f32 %v740_v57, %v744_v53  ;;  %v930_v60 = vmul.f32 %v928_v62, %v858_v15  ;;  %v813_v1 = vmul.f32 %v2980_v2, %v739_v56  ;;  %vm666_vm10 = vcmp.ge.f32.partialorder %v2862_v37, 9.0 }
 0x1d1   :  { %v747_v3 = vsub.f32 %v741_v39, %v745_v59  ;;  %v931_v44 = vmul.f32 %v928_v62, %v859_v28  ;;  %v868_v9 = vmul.f32 %v2925_v0, %v802_v25  ;;  %vm667_vm12 = vcmp.ge.f32.partialorder %v2876_v12, 9.0 }
 0x1d2   :  { %v814_v11 = vmul.f32 %v3060_v48, %v746_v63  ;;  %v811_v13 = vmul.f32 0.5, %v809_v58  ;;  %vm668_vm13 = vcmp.lt.f32.partialorder %v2862_v37, 10.0  ;;  %vm669_vm14 = vcmp.lt.f32.partialorder %v2876_v12, 10.0 }
 0x1d3   :  { %v815_v17 = vmul.f32 %v3064_v50, %v747_v3  ;;  %v866_v19 = vmul.f32 0.33333334, %v864_v45  ;;  %v867_v21 = vmul.f32 0.33333334, %v865_v42  ;;  %v870_v20 = vmul.f32 %v3032_v16, %v810_v49  ;;  %vm670_vm15 = vmand %vm666_vm10, %vm668_vm13 }
 0x1d4   :  { %v816_v23 = vsub.f32 %v812_v31, %v814_v11  ;;  %vm671_vm0 = vmand %vm667_vm12, %vm669_vm14  ;;  %v672_v0 = vsel %vm670_vm15, 1.0, %v2443_v8  ;;  %v748_v24 = vmul.f32 %v3032_v16, %v664_v6  ;;  %v2170_v5 = vadd.f32 -10.0, %v2862_v37 }
 0x1d5   :  { %v817_v14 = vsub.f32 %v813_v1, %v815_v17  ;;  %v932_v25 = vadd.f32 %v930_v60, %v923_v51  ;;  %v673_v26 = vsel %vm671_vm0, 1.0, %v2443_v8  ;;  %v749_v32 = vmul.f32 %v3036_v22, %v665_v4 }
 0x1d6   :  { %v2171_v27 = vadd.f32 -10.0, %v2876_v12  ;;  %v933_v10 = vadd.f32 %v931_v44, %v924_v54  ;;  %v869_v46 = vmul.f32 %v2928_v7, %v3039_v29  ;;  %v871_v56 = vmul.f32 %v3036_v22, %v811_v13 }
 0x1d7   :  { %v752_v30 = vmul.f32 %v2170_v5, %v672_v0  ;;  %v939_v33 = vmul.f32 %v937_v47, %v866_v19  ;;  %v940_v34 = vmul.f32 %v937_v47, %v867_v21  ;;  %v818_v43 = vmul.f32 0.5, %v816_v23  ;;  %v946_v23 = vpop.permute.xlu0 %945 }
 0x1d8   :  { %v753_v52 = vmul.f32 %v2171_v27, %v673_v26  ;;  %v872_v40 = vsub.f32 %v868_v9, %v870_v20  ;;  %v819_v6 = vmul.f32 0.5, %v817_v14  ;;  %v820_v57 = vmul.f32 %v3004_v36, %v746_v63 }
 0x1d9   :  { %v754_v41 = vsub.f32 %v748_v24, %v752_v30  ;;  %v876_v4 = vmul.f32 %v2953_v35, %v810_v49  ;;  %v821_v15 = vmul.f32 %v3007_v55, %v747_v3  ;;  %vm674_vm1 = vcmp.ge.f32.partialorder %v2862_v37, 10.0 }
 0x1da   :  { %v755_v18 = vsub.f32 %v749_v32, %v753_v52  ;;  %v873_v7 = vsub.f32 %v869_v46, %v871_v56  ;;  %vm675_vm3 = vcmp.ge.f32.partialorder %v2876_v12, 10.0  ;;  %vm676_vm4 = vcmp.lt.f32.partialorder %v2862_v37, 11.0 }
 0x1db   :  { %v822_v29 = vmul.f32 %v2170_v5, %v754_v41  ;;  %v877_v39 = vmul.f32 %v2956_v38, %v811_v13  ;;  %v878_v51 = vmul.f32 %v3060_v48, %v818_v43  ;;  %vm677_vm5 = vcmp.lt.f32.partialorder %v2876_v12, 11.0  ;;  %vm678_vm6 = vmand %vm674_vm1, %vm676_vm4 }
 0x1dc   :  { %v823_v28 = vmul.f32 %v2171_v27, %v755_v18  ;;  %v874_v35 = vmul.f32 0.33333334, %v872_v40  ;;  %v879_v53 = vmul.f32 %v3064_v50, %v819_v6  ;;  %vm679_vm7 = vmand %vm675_vm3, %vm677_vm5  ;;  %v680_v45 = vsel %vm678_vm6, 1.0, %v2443_v8 }
 0x1dd   :  { %v824_v54 = vsub.f32 %v820_v57, %v822_v29  ;;  %v681_v59 = vsel %vm679_vm7, 1.0, %v2443_v8  ;;  %v756_v62 = vmul.f32 %v3060_v48, %v672_v0  ;;  %v2172_v38 = vadd.f32 -11.0, %v2862_v37  ;;  %v964_v57 = vpop.permute.xlu0 %963 }
 0x1de   :  { %v825_v58 = vsub.f32 %v821_v15, %v823_v28  ;;  %v875_v42 = vmul.f32 0.33333334, %v873_v7  ;;  %v757_v63 = vmul.f32 %v3064_v50, %v673_v26  ;;  %v2173_v31 = vadd.f32 -11.0, %v2876_v12 }
 0x1df   :  { %v826_v49 = vmul.f32 0.5, %v824_v54  ;;  %v880_v60 = vsub.f32 %v876_v4, %v878_v51  ;;  %v884_v1 = vmul.f32 %v2974_v61, %v818_v43  ;;  %v760_v44 = vmul.f32 %v2172_v38, %v680_v45 }
 0x1e0   :  { %v827_v3 = vmul.f32 0.5, %v825_v58  ;;  %v881_v9 = vsub.f32 %v877_v39, %v879_v53  ;;  %v885_v11 = vmul.f32 %v2980_v2, %v819_v6  ;;  %v761_v17 = vmul.f32 %v2173_v31, %v681_v59 }
 0x1e1   :  { %v886_v13 = vmul.f32 %v2170_v5, %v826_v49  ;;  %v941_v19 = vadd.f32 %v939_v33, %v932_v25  ;;  %v762_v21 = vsub.f32 %v756_v62, %v760_v44  ;;  %v828_v37 = vmul.f32 %v3032_v16, %v754_v41 }
 0x1e2   :  { %v887_v48 = vmul.f32 %v2171_v27, %v827_v3  ;;  %v942_v20 = vadd.f32 %v940_v34, %v933_v10  ;;  %v763_v50 = vsub.f32 %v757_v63, %v761_v17  ;;  %v829_v12 = vmul.f32 %v3036_v22, %v755_v18  ;;  %v955_v27 = vpop.permute.xlu1 %954 }
 0x1e3   :  { %v948_v14 = vmul.f32 %v946_v23, %v874_v35  ;;  %v882_v0 = vmul.f32 0.33333334, %v880_v60  ;;  %v888_v24 = vsub.f32 %v884_v1, %v886_v13  ;;  %v830_v61 = vmul.f32 %v2172_v38, %v762_v21 }
 0x1e4   :  { %v949_v26 = vmul.f32 %v946_v23, %v875_v42  ;;  %v883_v32 = vmul.f32 0.33333334, %v881_v9  ;;  %v889_v47 = vsub.f32 %v885_v11, %v887_v48  ;;  %v831_v2 = vmul.f32 %v2173_v31, %v763_v50 }
 0x1e5   :  { %v950_v5 = vadd.f32 %v948_v14, %v941_v19  ;;  %v832_v46 = vsub.f32 %v828_v37, %v830_v61  ;;  %v957_v30 = vmul.f32 %v955_v27, %v882_v0  ;;  %v890_v16 = vmul.f32 0.33333334, %v888_v24 }
 0x1e6   :  { %v951_v25 = vadd.f32 %v949_v26, %v942_v20  ;;  %v833_v56 = vsub.f32 %v829_v12, %v831_v2  ;;  %v892_v33 = vmul.f32 %v3004_v36, %v826_v49  ;;  %v958_v34 = vmul.f32 %v955_v27, %v883_v32  ;;  %v973_v35 = vpop.permute.xlu1 %972 }
 0x1e7   :  { %v834_v10 = vmul.f32 0.5, %v832_v46  ;;  %v891_v22 = vmul.f32 0.33333334, %v889_v47  ;;  %v893_v52 = vmul.f32 %v3007_v55, %v827_v3  ;;  %v959_v40 = vadd.f32 %v957_v30, %v950_v5 }
 0x1e8   :  { %v835_v43 = vmul.f32 0.5, %v833_v56  ;;  %v960_v41 = vadd.f32 %v958_v34, %v951_v25  ;;  %v966_v18 = vmul.f32 %v964_v57, %v890_v16  ;;  %vm993_vm8 = vcmask 253952  }
 0x1e9   :  { %v894_v6 = vmul.f32 %v2172_v38, %v834_v10  ;;  %v967_v7 = vmul.f32 %v964_v57, %v891_v22 }
 0x1ea   :  { %v895_v4 = vmul.f32 %v2173_v31, %v835_v43  ;;  %v968_v39 = vadd.f32 %v966_v18, %v959_v40 }
 0x1eb   :  { %v896_v15 = vsub.f32 %v892_v33, %v894_v6  ;;  %v969_v28 = vadd.f32 %v967_v7, %v960_v41 }
 0x1ec   :  { %v897_v29 = vsub.f32 %v893_v52, %v895_v4 }
 0x1ed   :  { %v898_v51 = vmul.f32 0.33333334, %v896_v15 }
 0x1ee   :  { %v899_v53 = vmul.f32 0.33333334, %v897_v29 }
 0x1ef   :  { %v975_v36 = vmul.f32 %v973_v35, %v898_v51 }
 0x1f0   :  { %v976_v54 = vmul.f32 %v973_v35, %v899_v53 }
 0x1f1   :  { %v977_v45 = vadd.f32 %v975_v36, %v968_v39 }
 0x1f2   :  { %v978_v58 = vadd.f32 %v976_v54, %v969_v28 }
 0x1f3   :  { %v979_v55 = vsel %vm3809_vm11, %v977_v45, 0.0 }
 0x1f4   :  { %v980_v59 = vrot.slane %v979_v55, 4  ;;  %v986_v62 = vsel %vm3809_vm11, %v978_v58, 0.0 }
 0x1f5   :  { %v987_v38 = vrot.slane %v986_v62, 4 }
 0x1f6   :  { %v981_v42 = vadd.f32 %v980_v59, %v979_v55 }
 0x1f7   :  { %v988_v49 = vadd.f32 %v987_v38, %v986_v62 }
 0x1f8   :  { %v982_v63 = vrot.slane %v981_v42, 2 }
 0x1f9   :  { %v989_v31 = vrot.slane %v988_v49, 2 }
 0x1fa   :  { %v983_v60 = vadd.f32 %v982_v63, %v981_v42 }
 0x1fb   :  { %v990_v3 = vadd.f32 %v989_v31, %v988_v49 }
 0x1fc   :  { %v984_v1 = vrot.slane %v983_v60, 1 }
 0x1fd   :  { %v991_v44 = vrot.slane %v990_v3, 1 }
 0x1fe   :  { %v3112_v9 = vadd.f32 %v984_v1, %v983_v60 }
 0x1ff   :  { %v3114_v11 = vadd.f32 %v991_v44, %v990_v3 }
 0x200   :  { %v2174_v13 = vmul.f32 -1.442695, %v3112_v9  ;;  %v2176_v17 = vadd.f32 2.2, %v3112_v9  ;;  %994 = vst.msk [vmem:[#allocation6] sm:$0x1] %vm993_vm8, %v3112_v9 }
 0x201   :  { %v2175_v19 = vmul.f32 -1.442695, %v3114_v11  ;;  %v2177_v48 = vadd.f32 2.2, %v3114_v11  ;;  %995 = vst.msk [vmem:[#allocation6 + $0x1] sm:$0x1] %vm993_vm8, %v3114_v11 }
 0x202   :  { %2340 = vpow2.f32 %v2174_v13  ;;  %v3122_v21 = vmul.f32 2.5, %v2176_v17 }
 0x203   :  { %2342 = vpow2.f32 %v2175_v19  ;;  %v3124_v37 = vmul.f32 2.5, %v2177_v48 }
 0x204   :  { %vm1023_vm9 = vcmp.ge.f32.partialorder %v3122_v21, 0.0  ;;  %vm1025_vm10 = vcmp.lt.f32.partialorder %v3122_v21, 1.0  ;;  %vm1031_vm12 = vcmp.ge.f32.partialorder %v3122_v21, 1.0  ;;  %vm1033_vm13 = vcmp.lt.f32.partialorder %v3122_v21, 2.0 }
 0x205   :  { %vm1024_vm14 = vcmp.ge.f32.partialorder %v3124_v37, 0.0  ;;  %vm1026_vm15 = vcmp.lt.f32.partialorder %v3124_v37, 1.0  ;;  %vm1027_vm0 = vmand %vm1023_vm9, %vm1025_vm10  ;;  %vm1032_vm1 = vcmp.ge.f32.partialorder %v3124_v37, 1.0  ;;  %vm1034_vm3 = vcmp.lt.f32.partialorder %v3124_v37, 2.0 }
 0x206   :  { %vm1028_vm4 = vmand %vm1024_vm14, %vm1026_vm15  ;;  %v1029_v20 = vsel %vm1027_vm0, 1.0, %v2443_v8  ;;  %vm1039_vm5 = vcmp.ge.f32.partialorder %v3122_v21, 2.0  ;;  %vm1040_vm6 = vcmp.ge.f32.partialorder %v3124_v37, 2.0  ;;  %vm1041_vm7 = vcmp.lt.f32.partialorder %v3122_v21, 3.0 }
 0x207   :  { %v1030_v23 = vsel %vm1028_vm4, 1.0, %v2443_v8  ;;  %vm1035_vm8 = vmand %vm1031_vm12, %vm1033_vm13  ;;  %vm1042_vm2 = vcmp.lt.f32.partialorder %v3124_v37, 3.0  ;;  %vm1047_vm9 = vcmp.ge.f32.partialorder %v3122_v21, 3.0  ;;  %vm1048_vm10 = vcmp.ge.f32.partialorder %v3124_v37, 3.0 }
 0x208   :  { %vm1036_vm11 = vmand %vm1032_vm1, %vm1034_vm3  ;;  %v1037_v50 = vsel %vm1035_vm8, 1.0, %v2443_v8  ;;  %vm1049_vm14 = vcmp.lt.f32.partialorder %v3122_v21, 4.0  ;;  %vm1050_vm15 = vcmp.lt.f32.partialorder %v3124_v37, 4.0  ;;  %v1111_v12 = vmul.f32 %v1029_v20, %v3122_v21 }
 0x209   :  { %v1038_v14 = vsel %vm1036_vm11, 1.0, %v2443_v8  ;;  %vm1043_vm0 = vmand %vm1039_vm5, %vm1041_vm7  ;;  %v1112_v0 = vmul.f32 %v1030_v23, %v3124_v37  ;;  %v3149_v24 = vadd.f32 -2.0, %v3122_v21  ;;  %v3152_v61 = vadd.f32 -2.0, %v3124_v37 }
 0x20a   :  { %vm1044_vm12 = vmand %vm1040_vm6, %vm1042_vm2  ;;  %v1045_v26 = vsel %vm1043_vm0, 1.0, %v2443_v8  ;;  %v3158_v32 = vadd.f32 -1.0, %v3122_v21  ;;  %v3161_v47 = vadd.f32 -1.0, %v3124_v37  ;;  %v3164_v2 = vadd.f32 -3.0, %v3122_v21 }
 0x20b   :  { %v1046_v5 = vsel %vm1044_vm12, 1.0, %v2443_v8  ;;  %vm1051_vm11 = vmand %vm1047_vm9, %vm1049_vm14  ;;  %v1115_v46 = vmul.f32 %v3149_v24, %v1037_v50  ;;  %v1116_v25 = vmul.f32 %v3152_v61, %v1038_v14  ;;  %v3172_v27 = vadd.f32 -3.0, %v3124_v37 }
 0x20c   :  { %vm1052_vm2 = vmand %vm1048_vm10, %vm1050_vm15  ;;  %v1053_v56 = vsel %vm1051_vm11, 1.0, %v2443_v8  ;;  %v1121_v30 = vmul.f32 %v3158_v32, %v1037_v50  ;;  %v1122_v16 = vmul.f32 %v3161_v47, %v1038_v14  ;;  %v1125_v10 = vmul.f32 %v3164_v2, %v1045_v26 }
 0x20d   :  { %v1054_v33 = vsel %vm1052_vm2, 1.0, %v2443_v8  ;;  %v1117_v34 = vsub.f32 %v1111_v12, %v1115_v46  ;;  %v1118_v22 = vsub.f32 %v1112_v0, %v1116_v25  ;;  %v1126_v43 = vmul.f32 %v3172_v27, %v1046_v5 }
 0x20e   :  { %v1127_v52 = vsub.f32 %v1121_v30, %v1125_v10  ;;  %v1129_v40 = vmul.f32 %v3149_v24, %v1045_v26  ;;  %v1130_v6 = vmul.f32 %v3152_v61, %v1046_v5  ;;  %v3187_v41 = vadd.f32 -4.0, %v3122_v21 }
 0x20f   :  { %v2341_v57 = vpop.eup %2340  ;;  %v1128_v4 = vsub.f32 %v1122_v16, %v1126_v43  ;;  %v3190_v18 = vadd.f32 -4.0, %v3124_v37  ;;  %v1193_v15 = vmul.f32 %v1117_v34, %v3122_v21  ;;  %v1194_v7 = vmul.f32 %v1118_v22, %v3124_v37 }
 0x210   :  { %v2343_v29 = vpop.eup %2342  ;;  %v1011_v39 = vadd.f32 1.0, %v2341_v57  ;;  %v1133_v51 = vmul.f32 %v3187_v41, %v1053_v56  ;;  %v1195_v28 = vmul.f32 %v3164_v2, %v1127_v52  ;;  %v1201_v35 = vmul.f32 %v3158_v32, %v1127_v52 }
 0x211   :  { %v1012_v53 = vadd.f32 1.0, %v2343_v29  ;;  %v1134_v36 = vmul.f32 %v3190_v18, %v1054_v33  ;;  %v1196_v54 = vmul.f32 %v3172_v27, %v1128_v4  ;;  %v1202_v45 = vmul.f32 %v3161_v47, %v1128_v4 }
 0x212   :  { %2344 = vrcp.f32 %v1011_v39  ;;  %v1135_v58 = vsub.f32 %v1129_v40, %v1133_v51  ;;  %v1197_v55 = vsub.f32 %v1193_v15, %v1195_v28  ;;  %vm1055_vm13 = vcmp.ge.f32.partialorder %v3122_v21, 4.0 }
 0x213   :  { %2346 = vrcp.f32 %v1012_v53  ;;  %v1136_v59 = vsub.f32 %v1130_v6, %v1134_v36  ;;  %v1198_v62 = vsub.f32 %v1194_v7, %v1196_v54  ;;  %vm1056_vm1 = vcmp.ge.f32.partialorder %v3124_v37, 4.0  ;;  %v1339_v7 = vpop.permute.xlu1 %1338 }
 0x214   :  { %v1199_v38 = vmul.f32 0.5, %v1197_v55  ;;  %v1203_v42 = vmul.f32 %v3187_v41, %v1135_v58  ;;  %vm1057_vm3 = vcmp.lt.f32.partialorder %v3122_v21, 5.0  ;;  %vm1058_vm4 = vcmp.lt.f32.partialorder %v3124_v37, 5.0 }
 0x215   :  { %v1200_v49 = vmul.f32 0.5, %v1198_v62  ;;  %v1204_v63 = vmul.f32 %v3190_v18, %v1136_v59  ;;  %vm1059_vm5 = vmand %vm1055_vm13, %vm1057_vm3  ;;  %v1137_v31 = vmul.f32 %v3164_v2, %v1053_v56  ;;  %v1138_v60 = vmul.f32 %v3172_v27, %v1054_v33 }
 0x216   :  { %v1205_v3 = vsub.f32 %v1201_v35, %v1203_v42  ;;  %v1265_v1 = vmul.f32 %v1199_v38, %v3122_v21  ;;  %vm1060_vm6 = vmand %vm1056_vm1, %vm1058_vm4  ;;  %v1061_v44 = vsel %vm1059_vm5, 1.0, %v2443_v8  ;;  %v3211_v13 = vadd.f32 -5.0, %v3122_v21 }
 0x217   :  { %v1206_v17 = vsub.f32 %v1202_v45, %v1204_v63  ;;  %v1266_v19 = vmul.f32 %v1200_v49, %v3124_v37  ;;  %v1062_v48 = vsel %vm1060_vm6, 1.0, %v2443_v8  ;;  %v3216_v20 = vadd.f32 -5.0, %v3124_v37 }
 0x218   :  { %v1207_v23 = vmul.f32 0.5, %v1205_v3  ;;  %v1141_v50 = vmul.f32 %v3211_v13, %v1061_v44  ;;  %v1209_v12 = vmul.f32 %v3149_v24, %v1135_v58  ;;  %v1210_v14 = vmul.f32 %v3152_v61, %v1136_v59  ;;  %v1332_v58 = vpop.permute.xlu0 %1331 }
 0x219   :  { %v1208_v0 = vmul.f32 0.5, %v1206_v17  ;;  %v1142_v26 = vmul.f32 %v3216_v20, %v1062_v48  ;;  %vm1063_vm7 = vcmp.ge.f32.partialorder %v3122_v21, 5.0  ;;  %vm1064_vm8 = vcmp.ge.f32.partialorder %v3124_v37, 5.0 }
 0x21a   :  { %v1267_v5 = vmul.f32 %v3187_v41, %v1207_v23  ;;  %v1143_v46 = vsub.f32 %v1137_v31, %v1141_v50  ;;  %v1273_v25 = vmul.f32 %v3158_v32, %v1207_v23  ;;  %vm1065_vm9 = vcmp.lt.f32.partialorder %v3122_v21, 6.0 }
 0x21b   :  { %v1268_v56 = vmul.f32 %v3190_v18, %v1208_v0  ;;  %v1144_v30 = vsub.f32 %v1138_v60, %v1142_v26  ;;  %v1274_v16 = vmul.f32 %v3161_v47, %v1208_v0  ;;  %vm1066_vm10 = vcmp.lt.f32.partialorder %v3124_v37, 6.0  ;;  %vm1067_vm14 = vmand %vm1063_vm7, %vm1065_vm9 }
 0x21c   :  { %v1269_v10 = vsub.f32 %v1265_v1, %v1267_v5  ;;  %v1211_v33 = vmul.f32 %v3211_v13, %v1143_v46  ;;  %vm1068_vm15 = vmand %vm1064_vm8, %vm1066_vm10  ;;  %v1069_v34 = vsel %vm1067_vm14, 1.0, %v2443_v8  ;;  %v1145_v22 = vmul.f32 %v3187_v41, %v1061_v44 }
 0x21d   :  { %v1270_v43 = vsub.f32 %v1266_v19, %v1268_v56  ;;  %v1212_v32 = vmul.f32 %v3216_v20, %v1144_v30  ;;  %v1070_v52 = vsel %vm1068_vm15, 1.0, %v2443_v8  ;;  %v1146_v40 = vmul.f32 %v3190_v18, %v1062_v48 }
 0x21e   :  { %v1271_v6 = vmul.f32 0.33333334, %v1269_v10  ;;  %v1213_v47 = vsub.f32 %v1209_v12, %v1211_v33  ;;  %v3237_v57 = vadd.f32 -6.0, %v3122_v21  ;;  %v3240_v4 = vadd.f32 -6.0, %v3124_v37  ;;  %v1348_v12 = vpop.permute.xlu0 %1347 }
 0x21f   :  { %v2345_v15 = vpop.eup %2344  ;;  %v1272_v29 = vmul.f32 0.33333334, %v1270_v43  ;;  %v1214_v39 = vsub.f32 %v1210_v14, %v1212_v32  ;;  %v1217_v51 = vmul.f32 %v3164_v2, %v1143_v46  ;;  %v1218_v28 = vmul.f32 %v3172_v27, %v1144_v30 }
 0x220   :  { %v2347_v35 = vpop.eup %2346  ;;  %v1017_v53 = vmul.f32 %v2345_v15, %v3112_v9  ;;  %v1341_v36 = vmul.f32 %v1339_v7, %v1271_v6  ;;  %v1215_v54 = vmul.f32 0.5, %v1213_v47  ;;  %v1149_v45 = vmul.f32 %v3237_v57, %v1069_v34 }
 0x221   :  { %v1018_v55 = vmul.f32 %v2347_v35, %v3114_v11  ;;  %v1342_v59 = vmul.f32 %v1339_v7, %v1272_v29  ;;  %v1216_v62 = vmul.f32 0.5, %v1214_v39  ;;  %v1150_v38 = vmul.f32 %v3240_v4, %v1070_v52 }
 0x222   :  { %v1334_v42 = vmul.f32 %v1332_v58, %v1017_v53  ;;  %v1275_v49 = vmul.f32 %v3211_v13, %v1215_v54  ;;  %v1151_v63 = vsub.f32 %v1145_v22, %v1149_v45  ;;  %v1281_v31 = vmul.f32 %v3149_v24, %v1215_v54  ;;  %v1357_v53 = vpop.permute.xlu1 %1356 }
 0x223   :  { %v1335_v60 = vmul.f32 %v1332_v58, %v1018_v55  ;;  %v1276_v9 = vmul.f32 %v3216_v20, %v1216_v62  ;;  %v1152_v3 = vsub.f32 %v1146_v40, %v1150_v38  ;;  %v1282_v1 = vmul.f32 %v3152_v61, %v1216_v62 }
 0x224   :  { %v1343_v44 = vadd.f32 %v1341_v36, %v1334_v42  ;;  %v1277_v17 = vsub.f32 %v1273_v25, %v1275_v49  ;;  %v1219_v11 = vmul.f32 %v3237_v57, %v1151_v63  ;;  %vm1071_vm0 = vcmp.ge.f32.partialorder %v3122_v21, 6.0 }
 0x225   :  { %v1344_v19 = vadd.f32 %v1342_v59, %v1335_v60  ;;  %v1278_v48 = vsub.f32 %v1274_v16, %v1276_v9  ;;  %v1220_v23 = vmul.f32 %v3240_v4, %v1152_v3  ;;  %vm1072_vm12 = vcmp.ge.f32.partialorder %v3124_v37, 6.0 }
 0x226   :  { %v1279_v50 = vmul.f32 0.33333334, %v1277_v17  ;;  %v1221_v24 = vsub.f32 %v1217_v51, %v1219_v11  ;;  %vm1073_vm11 = vcmp.lt.f32.partialorder %v3122_v21, 7.0  ;;  %vm1074_vm2 = vcmp.lt.f32.partialorder %v3124_v37, 7.0 }
 0x227   :  { %v1280_v61 = vmul.f32 0.33333334, %v1278_v48  ;;  %v1222_v14 = vsub.f32 %v1218_v28, %v1220_v23  ;;  %vm1075_vm13 = vmand %vm1071_vm0, %vm1073_vm11  ;;  %v1153_v0 = vmul.f32 %v3211_v13, %v1069_v34  ;;  %v1154_v26 = vmul.f32 %v3216_v20, %v1070_v52 }
 0x228   :  { %v1350_v5 = vmul.f32 %v1348_v12, %v1279_v50  ;;  %v1223_v46 = vmul.f32 0.5, %v1221_v24  ;;  %vm1076_vm1 = vmand %vm1072_vm12, %vm1074_vm2  ;;  %v1077_v25 = vsel %vm1075_vm13, 1.0, %v2443_v8  ;;  %v3262_v56 = vadd.f32 -7.0, %v3122_v21 }
 0x229   :  { %v1351_v30 = vmul.f32 %v1348_v12, %v1280_v61  ;;  %v1224_v16 = vmul.f32 0.5, %v1222_v14  ;;  %v1078_v10 = vsel %vm1076_vm1, 1.0, %v2443_v8  ;;  %v3266_v33 = vadd.f32 -7.0, %v3124_v37 }
 0x22a   :  { %v1352_v22 = vadd.f32 %v1350_v5, %v1343_v44  ;;  %v1283_v34 = vmul.f32 %v3237_v57, %v1223_v46  ;;  %v1157_v43 = vmul.f32 %v3262_v56, %v1077_v25  ;;  %v1225_v6 = vmul.f32 %v3187_v41, %v1151_v63 }
 0x22b   :  { %v1353_v32 = vadd.f32 %v1351_v30, %v1344_v19  ;;  %v1284_v52 = vmul.f32 %v3240_v4, %v1224_v16  ;;  %v1158_v40 = vmul.f32 %v3266_v33, %v1078_v10  ;;  %v1226_v7 = vmul.f32 %v3190_v18, %v1152_v3 }
 0x22c   :  { %v1285_v47 = vsub.f32 %v1281_v31, %v1283_v34  ;;  %v1159_v15 = vsub.f32 %v1153_v0, %v1157_v43  ;;  %v1289_v29 = vmul.f32 %v3164_v2, %v1223_v46  ;;  %vm1079_vm3 = vcmp.ge.f32.partialorder %v3122_v21, 7.0 }
 0x22d   :  { %v1286_v39 = vsub.f32 %v1282_v1, %v1284_v52  ;;  %v1160_v51 = vsub.f32 %v1154_v26, %v1158_v40  ;;  %vm1080_vm4 = vcmp.ge.f32.partialorder %v3124_v37, 7.0  ;;  %vm1081_vm5 = vcmp.lt.f32.partialorder %v3122_v21, 8.0 }
 0x22e   :  { %v1287_v28 = vmul.f32 0.33333334, %v1285_v47  ;;  %v1227_v35 = vmul.f32 %v3262_v56, %v1159_v15  ;;  %vm1082_vm6 = vcmp.lt.f32.partialorder %v3124_v37, 8.0  ;;  %vm1083_vm7 = vmand %vm1079_vm3, %vm1081_vm5  ;;  %v1161_v2 = vmul.f32 %v3237_v57, %v1077_v25 }
 0x22f   :  { %v1288_v36 = vmul.f32 0.33333334, %v1286_v39  ;;  %v1228_v54 = vmul.f32 %v3266_v33, %v1160_v51  ;;  %v1162_v45 = vmul.f32 %v3240_v4, %v1078_v10  ;;  %vm1084_vm8 = vmand %vm1080_vm4, %vm1082_vm6  ;;  %v1085_v59 = vsel %vm1083_vm7, 1.0, %v2443_v8 }
 0x230   :  { %v1359_v58 = vmul.f32 %v1357_v53, %v1287_v28  ;;  %v1229_v55 = vsub.f32 %v1225_v6, %v1227_v35  ;;  %v3285_v62 = vadd.f32 -8.0, %v3122_v21  ;;  %v1086_v49 = vsel %vm1084_vm8, 1.0, %v2443_v8 }
 0x231   :  { %v1360_v38 = vmul.f32 %v1357_v53, %v1288_v36  ;;  %v1230_v42 = vsub.f32 %v1226_v7, %v1228_v54  ;;  %v3289_v63 = vadd.f32 -8.0, %v3124_v37  ;;  %v1290_v9 = vmul.f32 %v3172_v27, %v1224_v16  ;;  %v1366_v16 = vpop.permute.xlu0 %1365 }
 0x232   :  { %v1361_v31 = vadd.f32 %v1359_v58, %v1352_v22  ;;  %v1231_v60 = vmul.f32 0.5, %v1229_v55  ;;  %v1165_v3 = vmul.f32 %v3285_v62, %v1085_v59  ;;  %v1233_v11 = vmul.f32 %v3211_v13, %v1159_v15 }
 0x233   :  { %v1362_v1 = vadd.f32 %v1360_v38, %v1353_v32  ;;  %v1232_v44 = vmul.f32 0.5, %v1230_v42  ;;  %v1166_v17 = vmul.f32 %v3289_v63, %v1086_v49  ;;  %v1234_v23 = vmul.f32 %v3216_v20, %v1160_v51 }
 0x234   :  { %v1291_v19 = vmul.f32 %v3262_v56, %v1231_v60  ;;  %v1167_v48 = vsub.f32 %v1161_v2, %v1165_v3  ;;  %vm1087_vm9 = vcmp.ge.f32.partialorder %v3122_v21, 8.0  ;;  %v1297_v27 = vmul.f32 %v3187_v41, %v1231_v60 }
 0x235   :  { %v1292_v50 = vmul.f32 %v3266_v33, %v1232_v44  ;;  %v1168_v24 = vsub.f32 %v1162_v45, %v1166_v17  ;;  %vm1088_vm10 = vcmp.ge.f32.partialorder %v3124_v37, 8.0  ;;  %vm1089_vm14 = vcmp.lt.f32.partialorder %v3122_v21, 9.0 }
 0x236   :  { %v1293_v12 = vsub.f32 %v1289_v29, %v1291_v19  ;;  %v1235_v61 = vmul.f32 %v3285_v62, %v1167_v48  ;;  %vm1090_vm15 = vcmp.lt.f32.partialorder %v3124_v37, 9.0  ;;  %vm1091_vm0 = vmand %vm1087_vm9, %vm1089_vm14  ;;  %v1169_v26 = vmul.f32 %v3262_v56, %v1085_v59 }
 0x237   :  { %v1294_v14 = vsub.f32 %v1290_v9, %v1292_v50  ;;  %v1236_v0 = vmul.f32 %v3289_v63, %v1168_v24  ;;  %v1170_v5 = vmul.f32 %v3266_v33, %v1086_v49  ;;  %vm1092_vm12 = vmand %vm1088_vm10, %vm1090_vm15  ;;  %v1093_v41 = vsel %vm1091_vm0, 1.0, %v2443_v8  ;;  %v1375_v49 = vpop.permute.xlu1 %1374 }
 0x238   :  { %v1295_v46 = vmul.f32 0.33333334, %v1293_v12  ;;  %v1237_v25 = vsub.f32 %v1233_v11, %v1235_v61  ;;  %v3309_v30 = vadd.f32 -9.0, %v3122_v21  ;;  %v1094_v34 = vsel %vm1092_vm12, 1.0, %v2443_v8 }
 0x239   :  { %v1296_v10 = vmul.f32 0.33333334, %v1294_v14  ;;  %v1238_v22 = vsub.f32 %v1234_v23, %v1236_v0  ;;  %v3313_v43 = vadd.f32 -9.0, %v3124_v37  ;;  %v1298_v40 = vmul.f32 %v3190_v18, %v1232_v44 }
 0x23a   :  { %v1368_v32 = vmul.f32 %v1366_v16, %v1295_v46  ;;  %v1239_v52 = vmul.f32 0.5, %v1237_v25  ;;  %v1173_v6 = vmul.f32 %v3309_v30, %v1093_v41  ;;  %v1241_v29 = vmul.f32 %v3237_v57, %v1167_v48 }
 0x23b   :  { %v1369_v47 = vmul.f32 %v1366_v16, %v1296_v10  ;;  %v1240_v15 = vmul.f32 0.5, %v1238_v22  ;;  %v1174_v7 = vmul.f32 %v3313_v43, %v1094_v34  ;;  %v1242_v35 = vmul.f32 %v3240_v4, %v1168_v24 }
 0x23c   :  { %v1370_v39 = vadd.f32 %v1368_v32, %v1361_v31  ;;  %v1299_v51 = vmul.f32 %v3285_v62, %v1239_v52  ;;  %v1175_v28 = vsub.f32 %v1169_v26, %v1173_v6  ;;  %v1305_v18 = vmul.f32 %v3211_v13, %v1239_v52 }
 0x23d   :  { %v1371_v53 = vadd.f32 %v1369_v47, %v1362_v1  ;;  %v1300_v36 = vmul.f32 %v3289_v63, %v1240_v15  ;;  %v1176_v54 = vsub.f32 %v1170_v5, %v1174_v7  ;;  %vm1095_vm11 = vcmp.ge.f32.partialorder %v3122_v21, 9.0 }
 0x23e   :  { %v1301_v2 = vsub.f32 %v1297_v27, %v1299_v51  ;;  %v1243_v45 = vmul.f32 %v3309_v30, %v1175_v28  ;;  %vm1096_vm2 = vcmp.ge.f32.partialorder %v3124_v37, 9.0  ;;  %vm1097_vm13 = vcmp.lt.f32.partialorder %v3122_v21, 10.0 }
 0x23f   :  { %v1302_v58 = vsub.f32 %v1298_v40, %v1300_v36  ;;  %v1244_v55 = vmul.f32 %v3313_v43, %v1176_v54  ;;  %vm1098_vm1 = vcmp.lt.f32.partialorder %v3124_v37, 10.0  ;;  %vm1099_vm3 = vmand %vm1095_vm11, %vm1097_vm13  ;;  %v1177_v42 = vmul.f32 %v3285_v62, %v1093_v41 }
 0x240   :  { %v1303_v59 = vmul.f32 0.33333334, %v1301_v2  ;;  %v1245_v38 = vsub.f32 %v1241_v29, %v1243_v45  ;;  %v1178_v13 = vmul.f32 %v3289_v63, %v1094_v34  ;;  %vm1100_vm4 = vmand %vm1096_vm2, %vm1098_vm1  ;;  %v1101_v9 = vsel %vm1099_vm3, 1.0, %v2443_v8  ;;  %v1384_v34 = vpop.permute.xlu0 %1383 }
 0x241   :  { %v1304_v31 = vmul.f32 0.33333334, %v1302_v58  ;;  %v1246_v60 = vsub.f32 %v1242_v35, %v1244_v55  ;;  %v2196_v3 = vadd.f32 -10.0, %v3122_v21  ;;  %v1102_v17 = vsel %vm1100_vm4, 1.0, %v2443_v8 }
 0x242   :  { %v1377_v1 = vmul.f32 %v1375_v49, %v1303_v59  ;;  %v1247_v44 = vmul.f32 0.5, %v1245_v38  ;;  %v2197_v11 = vadd.f32 -10.0, %v3124_v37  ;;  %v1306_v23 = vmul.f32 %v3216_v20, %v1240_v15 }
 0x243   :  { %v1378_v19 = vmul.f32 %v1375_v49, %v1304_v31  ;;  %v1248_v48 = vmul.f32 0.5, %v1246_v60  ;;  %v1181_v50 = vmul.f32 %v2196_v3, %v1101_v9  ;;  %v1249_v26 = vmul.f32 %v3262_v56, %v1175_v28  ;;  %v1393_v49 = vpop.permute.xlu1 %1392 }
 0x244   :  { %v1379_v24 = vadd.f32 %v1377_v1, %v1370_v39  ;;  %v1307_v27 = vmul.f32 %v3309_v30, %v1247_v44  ;;  %v1182_v12 = vmul.f32 %v2197_v11, %v1102_v17  ;;  %v1250_v25 = vmul.f32 %v3266_v33, %v1176_v54 }
 0x245   :  { %v1380_v61 = vadd.f32 %v1378_v19, %v1371_v53  ;;  %v1308_v14 = vmul.f32 %v3313_v43, %v1248_v48  ;;  %v1183_v0 = vsub.f32 %v1177_v42, %v1181_v50  ;;  %vm1103_vm5 = vcmp.ge.f32.partialorder %v3122_v21, 10.0 }
 0x246   :  { %v1309_v5 = vsub.f32 %v1305_v18, %v1307_v27  ;;  %v1184_v46 = vsub.f32 %v1178_v13, %v1182_v12  ;;  %vm1104_vm6 = vcmp.ge.f32.partialorder %v3124_v37, 10.0  ;;  %vm1105_vm7 = vcmp.lt.f32.partialorder %v3122_v21, 11.0  ;;  %v1402_v27 = vpop.permute.xlu0 %1401 }
 0x247   :  { %v1310_v41 = vsub.f32 %v1306_v23, %v1308_v14  ;;  %v1251_v16 = vmul.f32 %v2196_v3, %v1183_v0  ;;  %v1313_v22 = vmul.f32 %v3237_v57, %v1247_v44  ;;  %vm1106_vm8 = vcmp.lt.f32.partialorder %v3124_v37, 11.0  ;;  %vm1107_vm9 = vmand %vm1103_vm5, %vm1105_vm7 }
 0x248   :  { %v1311_v20 = vmul.f32 0.33333334, %v1309_v5  ;;  %v1252_v10 = vmul.f32 %v2197_v11, %v1184_v46  ;;  %vm1108_vm10 = vmand %vm1104_vm6, %vm1106_vm8  ;;  %v1109_v40 = vsel %vm1107_vm9, 1.0, %v2443_v8  ;;  %v1185_v6 = vmul.f32 %v3309_v30, %v1101_v9 }
 0x249   :  { %v1312_v32 = vmul.f32 0.33333334, %v1310_v41  ;;  %v1253_v52 = vsub.f32 %v1249_v26, %v1251_v16  ;;  %v1110_v7 = vsel %vm1108_vm10, 1.0, %v2443_v8  ;;  %v2198_v29 = vadd.f32 -11.0, %v3122_v21 }
 0x24a   :  { %v1386_v47 = vmul.f32 %v1384_v34, %v1311_v20  ;;  %v1254_v15 = vsub.f32 %v1250_v25, %v1252_v10  ;;  %v1186_v57 = vmul.f32 %v3313_v43, %v1102_v17  ;;  %v2199_v28 = vadd.f32 -11.0, %v3124_v37 }
 0x24b   :  { %v1387_v39 = vmul.f32 %v1384_v34, %v1312_v32  ;;  %v1255_v51 = vmul.f32 0.5, %v1253_v52  ;;  %v1314_v36 = vmul.f32 %v3240_v4, %v1248_v48  ;;  %v1189_v54 = vmul.f32 %v2198_v29, %v1109_v40 }
 0x24c   :  { %v1388_v35 = vadd.f32 %v1386_v47, %v1379_v24  ;;  %v1256_v53 = vmul.f32 0.5, %v1254_v15  ;;  %v1190_v30 = vmul.f32 %v2199_v28, %v1110_v7  ;;  %v1257_v55 = vmul.f32 %v3285_v62, %v1183_v0 }
 0x24d   :  { %v1389_v18 = vadd.f32 %v1387_v39, %v1380_v61  ;;  %v1315_v2 = vmul.f32 %v2196_v3, %v1255_v51  ;;  %v1191_v58 = vsub.f32 %v1185_v6, %v1189_v54  ;;  %v1258_v38 = vmul.f32 %v3289_v63, %v1184_v46 }
 0x24e   :  { %v1316_v45 = vmul.f32 %v2197_v11, %v1256_v53  ;;  %v1192_v21 = vsub.f32 %v1186_v57, %v1190_v30  ;;  %v1321_v44 = vmul.f32 %v3262_v56, %v1255_v51  ;;  %v1322_v62 = vmul.f32 %v3266_v33, %v1256_v53 }
 0x24f   :  { %v1317_v59 = vsub.f32 %v1313_v22, %v1315_v2  ;;  %v1259_v43 = vmul.f32 %v2198_v29, %v1191_v58  ;;  %vm3810_vm0 = vcmask 261120  }
 0x250   :  { %v1318_v42 = vsub.f32 %v1314_v36, %v1316_v45  ;;  %v1260_v37 = vmul.f32 %v2199_v28, %v1192_v21  ;;  %vm3811_vm12 = vmmov %vm3810_vm0  ;;  %v2306_v21 = vld [vmem:[%s3803_s4 + $0x78] sm:$0xff]  }
 0x251   :  { %v1319_v13 = vmul.f32 0.33333334, %v1317_v59  ;;  %v1261_v60 = vsub.f32 %v1257_v55, %v1259_v43  ;;  %2245 = vmatprep.subr.bf16.mxu1 %v2306_v21 }
 0x252   :  { %v1320_v31 = vmul.f32 0.33333334, %v1318_v42  ;;  %v1262_v9 = vsub.f32 %v1258_v38, %v1260_v37  ;;  %v2307_v38 = vld [vmem:[%s3803_s4 + $0x38] sm:$0xff]  }
 0x253   :  { %v1395_v4 = vmul.f32 %v1393_v49, %v1319_v13  ;;  %v1263_v3 = vmul.f32 0.5, %v1261_v60  ;;  %2246 = vmatpush3.bf16.msra.mxu1 %v2307_v38 }
 0x254   :  { %v1396_v1 = vmul.f32 %v1393_v49, %v1320_v31  ;;  %v1264_v11 = vmul.f32 0.5, %v1262_v9 }
 0x255   :  { %v1397_v17 = vadd.f32 %v1395_v4, %v1388_v35  ;;  %v1323_v48 = vmul.f32 %v2198_v29, %v1263_v3 }
 0x256   :  { %v1398_v19 = vadd.f32 %v1396_v1, %v1389_v18  ;;  %v1324_v63 = vmul.f32 %v2199_v28, %v1264_v11 }
 0x257   :  { %v1325_v23 = vsub.f32 %v1321_v44, %v1323_v48 }
 0x258   :  { %v1326_v50 = vsub.f32 %v1322_v62, %v1324_v63 }
 0x259   :  { %v1327_v24 = vmul.f32 0.33333334, %v1325_v23 }
 0x25a   :  { %v1328_v12 = vmul.f32 0.33333334, %v1326_v50 }
 0x25b   :  { %v1404_v61 = vmul.f32 %v1402_v27, %v1327_v24 }
 0x25c   :  { %v1405_v14 = vmul.f32 %v1402_v27, %v1328_v12 }
 0x25d   :  { %v1406_v0 = vadd.f32 %v1404_v61, %v1397_v17 }
 0x25e   :  { %v1407_v26 = vadd.f32 %v1405_v14, %v1398_v19 }
 0x25f   :  { %vm1408_vm14 = vcmp.ge.f32.partialorder %v1406_v0, 0.0  ;;  %v1410_v5 = vmul.f32 0.1, %v1406_v0 }
 0x260   :  { %vm1409_vm15 = vcmp.ge.f32.partialorder %v1407_v26, 0.0  ;;  %v1411_v56 = vmul.f32 0.1, %v1407_v26 }
 0x261   :  { %v3356_v46 = vsel %vm1408_vm14, %v1406_v0, %v1410_v5 }
 0x262   :  { %v3358_v25 = vsel %vm1409_vm15, %v1407_v26, %v1411_v56  ;;  %v2200_v33 = vmul.f32 -1.442695, %v3356_v46  ;;  %v2202_v41 = vadd.f32 2.2, %v3356_v46  ;;  %1414 = vst.msk [vmem:[#allocation8] sm:$0xff] %vm3810_vm0, %v3356_v46 }
 0x263   :  { %v2201_v16 = vmul.f32 -1.442695, %v3358_v25  ;;  %v2203_v20 = vadd.f32 2.2, %v3358_v25  ;;  %1415 = vst.msk [vmem:[#allocation8 + $0x8] sm:$0xff] %vm3811_vm12, %v3358_v25 }
 0x264   :  { %2348 = vpow2.f32 %v2200_v33  ;;  %v3368_v10 = vmul.f32 2.5, %v2202_v41 }
 0x265   :  { %2350 = vpow2.f32 %v2201_v16  ;;  %v3370_v22 = vmul.f32 2.5, %v2203_v20 }
 0x266   :  { %vm1468_vm11 = vcmp.ge.f32.partialorder %v3368_v10, 4.0  ;;  %vm1470_vm2 = vcmp.lt.f32.partialorder %v3368_v10, 5.0  ;;  %vm1476_vm13 = vcmp.ge.f32.partialorder %v3368_v10, 5.0  ;;  %vm1478_vm1 = vcmp.lt.f32.partialorder %v3368_v10, 6.0 }
 0x267   :  { %vm1472_vm3 = vmand %vm1468_vm11, %vm1470_vm2  ;;  %vm1484_vm4 = vcmp.ge.f32.partialorder %v3368_v10, 6.0  ;;  %vm1486_vm5 = vcmp.lt.f32.partialorder %v3368_v10, 7.0  ;;  %vm1492_vm6 = vcmp.ge.f32.partialorder %v3368_v10, 7.0  ;;  %vm1494_vm7 = vcmp.lt.f32.partialorder %v3368_v10, 8.0 }
 0x268   :  { %v3381_v34 = vsel %vm1472_vm3, 1.0, %v2443_v8  ;;  %vm1480_vm8 = vmand %vm1476_vm13, %vm1478_vm1  ;;  %v3384_v32 = vadd.f32 -4.0, %v3368_v10  ;;  %v3387_v52 = vadd.f32 -5.0, %v3368_v10  ;;  %v3390_v40 = vadd.f32 -6.0, %v3368_v10 }
 0x269   :  { %v1482_v6 = vsel %vm1480_vm8, 1.0, %v2443_v8  ;;  %vm1488_vm9 = vmand %vm1484_vm4, %vm1486_vm5  ;;  %v3394_v47 = vadd.f32 -7.0, %v3368_v10  ;;  %v3397_v15 = vadd.f32 -8.0, %v3368_v10  ;;  %vm1436_vm10 = vcmp.ge.f32.partialorder %v3368_v10, 0.0 }
 0x26a   :  { %v1490_v7 = vsel %vm1488_vm9, 1.0, %v2443_v8  ;;  %vm1496_vm14 = vmand %vm1492_vm6, %vm1494_vm7  ;;  %v1558_v29 = vmul.f32 %v3384_v32, %v3381_v34  ;;  %v1562_v39 = vmul.f32 %v3390_v40, %v1482_v6  ;;  %v1566_v51 = vmul.f32 %v3387_v52, %v1482_v6 }
 0x26b   :  { %v3406_v57 = vsel %vm1496_vm14, 1.0, %v2443_v8  ;;  %v1570_v28 = vmul.f32 %v3394_v47, %v1490_v7  ;;  %v1574_v35 = vmul.f32 %v3390_v40, %v1490_v7  ;;  %vm1438_vm15 = vcmp.lt.f32.partialorder %v3368_v10, 1.0 }
 0x26c   :  { %v3411_v53 = vsub.f32 %v1558_v29, %v1562_v39  ;;  %v1578_v36 = vmul.f32 %v3397_v15, %v3406_v57  ;;  %vm1440_vm0 = vmand %vm1436_vm10, %vm1438_vm15  ;;  %vm1444_vm12 = vcmp.ge.f32.partialorder %v3368_v10, 1.0  ;;  %vm1446_vm11 = vcmp.lt.f32.partialorder %v3368_v10, 2.0 }
 0x26d   :  { %v1572_v54 = vsub.f32 %v1566_v51, %v1570_v28  ;;  %v1442_v18 = vsel %vm1440_vm0, 1.0, %v2443_v8  ;;  %vm1448_vm2 = vmand %vm1444_vm12, %vm1446_vm11  ;;  %vm1452_vm13 = vcmp.ge.f32.partialorder %v3368_v10, 2.0  ;;  %vm1454_vm1 = vcmp.lt.f32.partialorder %v3368_v10, 3.0 }
 0x26e   :  { %v3420_v2 = vsub.f32 %v1574_v35, %v1578_v36  ;;  %v1638_v30 = vmul.f32 %v3384_v32, %v3411_v53  ;;  %v1450_v45 = vsel %vm1448_vm2, 1.0, %v2443_v8  ;;  %vm1456_vm3 = vmand %vm1452_vm13, %vm1454_vm1  ;;  %vm1460_vm4 = vcmp.ge.f32.partialorder %v3368_v10, 3.0 }
 0x26f   :  { %v1640_v58 = vmul.f32 %v3394_v47, %v1572_v54  ;;  %v1646_v55 = vmul.f32 %v3387_v52, %v1572_v54  ;;  %v1458_v59 = vsel %vm1456_vm3, 1.0, %v2443_v8  ;;  %vm1462_vm5 = vcmp.lt.f32.partialorder %v3368_v10, 4.0 }
 0x270   :  { %v1648_v42 = vmul.f32 %v3397_v15, %v3420_v2  ;;  %vm1464_vm6 = vmand %vm1460_vm4, %vm1462_vm5  ;;  %v1524_v43 = vmul.f32 %v1442_v18, %v3368_v10  ;;  %v3440_v13 = vadd.f32 -2.0, %v3368_v10  ;;  %v3443_v37 = vadd.f32 -1.0, %v3368_v10 }
 0x271   :  { %v2349_v49 = vpop.eup %2348  ;;  %v1642_v31 = vsub.f32 %v1638_v30, %v1640_v58  ;;  %v3446_v60 = vsel %vm1464_vm6, 1.0, %v2443_v8  ;;  %v3449_v4 = vadd.f32 -3.0, %v3368_v10  ;;  %vm1469_vm7 = vcmp.ge.f32.partialorder %v3370_v22, 4.0 }
 0x272   :  { %v2351_v9 = vpop.eup %2350  ;;  %v1422_v1 = vadd.f32 1.0, %v2349_v49  ;;  %v1650_v3 = vsub.f32 %v1646_v55, %v1648_v42  ;;  %v1528_v44 = vmul.f32 %v3440_v13, %v1450_v45  ;;  %v1534_v17 = vmul.f32 %v3443_v37, %v1450_v45 }
 0x273   :  { %v1423_v11 = vadd.f32 1.0, %v2351_v9  ;;  %v3454_v62 = vmul.f32 0.5, %v1642_v31  ;;  %v1538_v19 = vmul.f32 %v3449_v4, %v1458_v59  ;;  %v1542_v48 = vmul.f32 %v3440_v13, %v1458_v59 }
 0x274   :  { %2352 = vrcp.f32 %v1422_v1  ;;  %v1652_v63 = vmul.f32 0.5, %v1650_v3  ;;  %v1530_v23 = vsub.f32 %v1524_v43, %v1528_v44  ;;  %v1546_v50 = vmul.f32 %v3384_v32, %v3446_v60 }
 0x275   :  { %2354 = vrcp.f32 %v1423_v11  ;;  %v1710_v24 = vmul.f32 %v3384_v32, %v3454_v62  ;;  %v1540_v27 = vsub.f32 %v1534_v17, %v1538_v19  ;;  %vm1471_vm8 = vcmp.lt.f32.partialorder %v3370_v22, 5.0  ;;  %v2308_v19 = vld [vmem:[%s3803_s4 + $0x70] sm:$0xff]  }
 0x276   :  { %v1712_v12 = vmul.f32 %v3397_v15, %v1652_v63  ;;  %v3464_v61 = vsub.f32 %v1542_v48, %v1546_v50  ;;  %v1606_v14 = vmul.f32 %v1530_v23, %v3368_v10  ;;  %vm1473_vm9 = vmand %vm1469_vm7, %vm1471_vm8  ;;  %vm1477_vm10 = vcmp.ge.f32.partialorder %v3370_v22, 5.0  ;;  %2247 = vmatprep.subr.bf16.mxu1 %v2308_v19 }
 0x277   :  { %v1608_v0 = vmul.f32 %v3449_v4, %v1540_v27  ;;  %v1614_v26 = vmul.f32 %v3443_v37, %v1540_v27  ;;  %v3473_v5 = vsel %vm1473_vm9, 1.0, %v2443_v8  ;;  %vm1479_vm14 = vcmp.lt.f32.partialorder %v3370_v22, 6.0 }
 0x278   :  { %v1714_v56 = vsub.f32 %v1710_v24, %v1712_v12  ;;  %v1616_v33 = vmul.f32 %v3384_v32, %v3464_v61  ;;  %vm1481_vm15 = vmand %vm1477_vm10, %vm1479_vm14  ;;  %vm1485_vm0 = vcmp.ge.f32.partialorder %v3370_v22, 6.0  ;;  %vm1487_vm12 = vcmp.lt.f32.partialorder %v3370_v22, 7.0 }
 0x279   :  { %v1610_v41 = vsub.f32 %v1606_v14, %v1608_v0  ;;  %v1483_v16 = vsel %vm1481_vm15, 1.0, %v2443_v8  ;;  %vm1489_vm11 = vmand %vm1485_vm0, %vm1487_vm12  ;;  %vm1493_vm2 = vcmp.ge.f32.partialorder %v3370_v22, 7.0  ;;  %vm1495_vm13 = vcmp.lt.f32.partialorder %v3370_v22, 8.0 }
 0x27a   :  { %v1716_v20 = vmul.f32 0.33333334, %v1714_v56  ;;  %v1618_v6 = vsub.f32 %v1614_v26, %v1616_v33  ;;  %v1491_v7 = vsel %vm1489_vm11, 1.0, %v2443_v8  ;;  %vm1497_vm1 = vmand %vm1493_vm2, %vm1495_vm13  ;;  %v3485_v29 = vadd.f32 -4.0, %v3370_v22 }
 0x27b   :  { %v1612_v39 = vmul.f32 0.5, %v1610_v41  ;;  %v3488_v51 = vsel %vm1497_vm1, 1.0, %v2443_v8  ;;  %v3491_v28 = vadd.f32 -5.0, %v3370_v22  ;;  %v3494_v35 = vadd.f32 -6.0, %v3370_v22 }
 0x27c   :  { %1779 = vrot.lane.b32.xlu1 %v1716_v20, %s2444_s12  ;;  %v3497_v36 = vmul.f32 0.5, %v1618_v6  ;;  %v1559_v54 = vmul.f32 %v3485_v29, %v3473_v5  ;;  %v3502_v18 = vadd.f32 -7.0, %v3370_v22  ;;  %v3505_v30 = vadd.f32 -8.0, %v3370_v22 }
 0x27d   :  { %v1678_v45 = vmul.f32 %v1612_v39, %v3368_v10  ;;  %v1563_v58 = vmul.f32 %v3494_v35, %v1483_v16  ;;  %v1567_v55 = vmul.f32 %v3491_v28, %v1483_v16  ;;  %v1575_v59 = vmul.f32 %v3494_v35, %v1491_v7 }
 0x27e   :  { %v1680_v21 = vmul.f32 %v3384_v32, %v3497_v36  ;;  %v1571_v38 = vmul.f32 %v3502_v18, %v1491_v7  ;;  %v1579_v42 = vmul.f32 %v3505_v30, %v3488_v51  ;;  %vm1500_vm3 = vcmp.ge.f32.partialorder %v3368_v10, 8.0 }
 0x27f   :  { %v3517_v43 = vsub.f32 %v1559_v54, %v1563_v58  ;;  %vm1502_vm4 = vcmp.lt.f32.partialorder %v3368_v10, 9.0  ;;  %v1582_v49 = vmul.f32 %v3394_v47, %v3406_v57  ;;  %v3523_v31 = vadd.f32 -9.0, %v3368_v10 }
 0x280   :  { %v1682_v9 = vsub.f32 %v1678_v45, %v1680_v21  ;;  %v1573_v1 = vsub.f32 %v1567_v55, %v1571_v38  ;;  %v3525_v32 = vsub.f32 %v1575_v59, %v1579_v42  ;;  %vm1504_vm5 = vmand %vm1500_vm3, %vm1502_vm4  ;;  %v1654_v3 = vmul.f32 %v3390_v40, %v3420_v2  ;;  %v2309_v2 = vld [vmem:[%s3803_s4 + $0x30] sm:$0xff]  }
 0x281   :  { %v3529_v44 = vpop.eup %2352  ;;  %v1639_v17 = vmul.f32 %v3485_v29, %v3517_v43  ;;  %v3534_v11 = vsel %vm1504_vm5, 1.0, %v2443_v8  ;;  %v3537_v57 = vmul.f32 %v3387_v52, %v1652_v63  ;;  %vm1437_vm6 = vcmp.ge.f32.partialorder %v3370_v22, 0.0  ;;  %2248 = vmatpush3.bf16.msra.mxu1 %v2309_v2 }
 0x282   :  { %v3546_v48 = vpop.eup %2354  ;;  %v1684_v23 = vmul.f32 0.33333334, %v1682_v9  ;;  %v1641_v50 = vmul.f32 %v3502_v18, %v1573_v1  ;;  %v1647_v24 = vmul.f32 %v3491_v28, %v1573_v1  ;;  %v1649_v63 = vmul.f32 %v3505_v30, %v3525_v32 }
 0x283   :  { %v1586_v27 = vmul.f32 %v3523_v31, %v3534_v11  ;;  %vm1439_vm7 = vcmp.lt.f32.partialorder %v3370_v22, 1.0  ;;  %vm1445_vm8 = vcmp.ge.f32.partialorder %v3370_v22, 1.0  ;;  %vm1447_vm9 = vcmp.lt.f32.partialorder %v3370_v22, 2.0 }
 0x284   :  { %1744 = vrot.lane.b32.xlu1 %v1684_v23, %s2444_s12  ;;  %v1643_v12 = vsub.f32 %v1639_v17, %v1641_v50  ;;  %v1651_v14 = vsub.f32 %v1647_v24, %v1649_v63  ;;  %vm1441_vm10 = vmand %vm1437_vm6, %vm1439_vm7  ;;  %vm1453_vm14 = vcmp.ge.f32.partialorder %v3370_v22, 2.0  ;;  %vm1455_vm15 = vcmp.lt.f32.partialorder %v3370_v22, 3.0 }
 0x285   :  { %v3562_v0 = vsub.f32 %v1582_v49, %v1586_v27  ;;  %v1443_v26 = vsel %vm1441_vm10, 1.0, %v2443_v8  ;;  %vm1449_vm0 = vmand %vm1445_vm8, %vm1447_vm9  ;;  %vm1461_vm12 = vcmp.ge.f32.partialorder %v3370_v22, 3.0  ;;  %vm1463_vm11 = vcmp.lt.f32.partialorder %v3370_v22, 4.0 }
 0x286   :  { %v3567_v56 = vmul.f32 0.5, %v1643_v12  ;;  %v1653_v33 = vmul.f32 0.5, %v1651_v14  ;;  %v1451_v41 = vsel %vm1449_vm0, 1.0, %v2443_v8  ;;  %vm1457_vm2 = vmand %vm1453_vm14, %vm1455_vm15  ;;  %v1525_v16 = vmul.f32 %v1443_v26, %v3370_v22 }
 0x287   :  { %v1656_v20 = vmul.f32 %v3523_v31, %v3562_v0  ;;  %v1459_v6 = vsel %vm1457_vm2, 1.0, %v2443_v8  ;;  %vm1465_vm13 = vmand %vm1461_vm12, %vm1463_vm11  ;;  %v3575_v7 = vadd.f32 -2.0, %v3370_v22  ;;  %v3578_v39 = vadd.f32 -1.0, %v3370_v22 }
 0x288   :  { %v1711_v54 = vmul.f32 %v3485_v29, %v3567_v56  ;;  %v1713_v45 = vmul.f32 %v3505_v30, %v1653_v33  ;;  %v3584_v58 = vsel %vm1465_vm13, 1.0, %v2443_v8  ;;  %v3587_v55 = vadd.f32 -3.0, %v3370_v22 }
 0x289   :  { %v1658_v59 = vsub.f32 %v1654_v3, %v1656_v20  ;;  %v1529_v21 = vmul.f32 %v3575_v7, %v1451_v41  ;;  %v1535_v38 = vmul.f32 %v3578_v39, %v1451_v41  ;;  %v1543_v42 = vmul.f32 %v3575_v7, %v1459_v6 }
 0x28a   :  { %v1715_v49 = vsub.f32 %v1711_v54, %v1713_v45  ;;  %v1539_v9 = vmul.f32 %v3587_v55, %v1459_v6  ;;  %v1547_v1 = vmul.f32 %v3485_v29, %v3584_v58  ;;  %v1550_v17 = vmul.f32 %v3449_v4, %v3446_v60 }
 0x28b   :  { %v3597_v19 = vmul.f32 0.5, %v1658_v59  ;;  %v1531_v2 = vsub.f32 %v1525_v16, %v1529_v21  ;;  %v1554_v3 = vmul.f32 %v3387_v52, %v3381_v34  ;;  %v1622_v23 = vmul.f32 %v3440_v13, %v3464_v61  ;;  %v2310_v34 = vld [vmem:[%s3803_s4 + $0x68] sm:$0xff]  }
 0x28c   :  { %v1717_v50 = vmul.f32 0.33333334, %v1715_v49  ;;  %v1541_v24 = vsub.f32 %v1535_v38, %v1539_v9  ;;  %v3603_v63 = vsub.f32 %v1543_v42, %v1547_v1  ;;  %v1686_v27 = vmul.f32 %v3443_v37, %v3497_v36  ;;  %v2311_v61 = vld [vmem:[%s3803_s4 + $0x28] sm:$0xff]   ;;  %2249 = vmatprep.subr.bf16.mxu1 %v2310_v34 }
 0x28d   :  { %v1720_v12 = vmul.f32 %v3523_v31, %v3597_v19  ;;  %v1607_v60 = vmul.f32 %v1531_v2, %v3370_v22  ;;  %v3610_v14 = vsub.f32 %v1550_v17, %v1554_v3  ;;  %vm1501_vm1 = vcmp.ge.f32.partialorder %v3370_v22, 8.0  ;;  %2250 = vmatpush3.bf16.msra.mxu1 %v2311_v61 }
 0x28e   :  { %1781 = vrot.lane.b32.xlu0 %v1717_v50, %s2444_s12  ;;  %v1609_v37 = vmul.f32 %v3587_v55, %v1541_v24  ;;  %v1615_v36 = vmul.f32 %v3578_v39, %v1541_v24  ;;  %v1617_v26 = vmul.f32 %v3485_v29, %v3603_v63  ;;  %vm1503_vm3 = vcmp.lt.f32.partialorder %v3370_v22, 9.0  ;;  %v2313_v50 = vld [vmem:[%s3803_s4 + $0x20] sm:$0xff]  }
 0x28f   :  { %v1722_v41 = vsub.f32 %v3537_v57, %v1720_v12  ;;  %v1624_v16 = vmul.f32 %v3387_v52, %v3610_v14  ;;  %vm1505_vm4 = vmand %vm1501_vm1, %vm1503_vm3  ;;  %v1583_v20 = vmul.f32 %v3502_v18, %v3488_v51  ;;  %v3631_v6 = vadd.f32 -9.0, %v3370_v22 }
 0x290   :  { %v1611_v54 = vsub.f32 %v1607_v60, %v1609_v37  ;;  %v1619_v45 = vsub.f32 %v1615_v36, %v1617_v26  ;;  %v3634_v59 = vsel %vm1505_vm4, 1.0, %v2443_v8  ;;  %v1655_v21 = vmul.f32 %v3494_v35, %v3525_v32 }
 0x291   :  { %v1724_v57 = vmul.f32 0.33333334, %v1722_v41  ;;  %v1626_v38 = vsub.f32 %v1622_v23, %v1624_v16  ;;  %v1587_v42 = vmul.f32 %v3631_v6, %v3634_v59  ;;  %v3641_v51 = vmul.f32 %v3491_v28, %v1653_v33  ;;  %v2312_v23 = vld [vmem:[%s3803_s4 + $0x60] sm:$0xff]  }
 0x292   :  { %v1613_v49 = vmul.f32 0.5, %v1611_v54  ;;  %v1621_v9 = vmul.f32 0.5, %v1619_v45  ;;  %vm1508_vm5 = vcmp.ge.f32.partialorder %v3368_v10, 9.0  ;;  %vm1510_vm6 = vcmp.lt.f32.partialorder %v3368_v10, 10.0  ;;  %2251 = vmatprep.subr.bf16.mxu1 %v2312_v23 }
 0x293   :  { %1789 = vrot.lane.b32.xlu1 %v1724_v57, %s2447_s23  ;;  %v1628_v1 = vmul.f32 0.5, %v1626_v38  ;;  %v3646_v17 = vsub.f32 %v1583_v20, %v1587_v42  ;;  %vm1512_vm7 = vmand %vm1508_vm5, %vm1510_vm6  ;;  %vm1516_vm8 = vcmp.ge.f32.partialorder %v3368_v10, 10.0  ;;  %vm1518_vm9 = vcmp.lt.f32.partialorder %v3368_v10, 11.0  ;;  %2252 = vmatpush3.bf16.msra.mxu1 %v2313_v50 }
 0x294   :  { %v1679_v32 = vmul.f32 %v1613_v49, %v3370_v22  ;;  %v1681_v33 = vmul.f32 %v3485_v29, %v1621_v9  ;;  %v1514_v2 = vsel %vm1512_vm7, 1.0, %v2443_v8  ;;  %vm1520_vm10 = vmand %vm1516_vm8, %vm1518_vm9  ;;  %v1590_v3 = vmul.f32 %v3397_v15, %v3534_v11  ;;  %v2314_v49 = vld [vmem:[%s3803_s4 + $0x58] sm:$0xff]  }
 0x295   :  { %v1688_v24 = vmul.f32 %v3387_v52, %v1628_v1  ;;  %v1657_v12 = vmul.f32 %v3631_v6, %v3646_v17  ;;  %v1522_v29 = vsel %vm1520_vm10, 1.0, %v2443_v8  ;;  %v2222_v60 = vadd.f32 -10.0, %v3368_v10  ;;  %2253 = vmatprep.subr.bf16.mxu1 %v2314_v49 }
 0x296   :  { %v1683_v34 = vsub.f32 %v1679_v32, %v1681_v33  ;;  %v1598_v11 = vmul.f32 %v3523_v31, %v1514_v2  ;;  %v2224_v61 = vadd.f32 -11.0, %v3368_v10  ;;  %v1662_v37 = vmul.f32 %v3394_v47, %v3562_v0 }
 0x297   :  { %v1690_v36 = vsub.f32 %v1686_v27, %v1688_v24  ;;  %v1659_v26 = vsub.f32 %v1655_v21, %v1657_v12  ;;  %v1594_v41 = vmul.f32 %v2222_v60, %v1514_v2  ;;  %v1726_v52 = vmul.f32 %v3390_v40, %v3597_v19 }
 0x298   :  { %v1685_v16 = vmul.f32 0.33333334, %v1683_v34  ;;  %v1602_v20 = vmul.f32 %v2224_v61, %v1522_v29  ;;  %v1551_v54 = vmul.f32 %v3587_v55, %v3584_v58  ;;  %v1555_v31 = vmul.f32 %v3491_v28, %v3473_v5 }
 0x299   :  { %v1692_v10 = vmul.f32 0.33333334, %v1690_v36  ;;  %v3676_v45 = vmul.f32 0.5, %v1659_v26  ;;  %v1596_v0 = vsub.f32 %v1590_v3, %v1594_v41  ;;  %v1623_v27 = vmul.f32 %v3575_v7, %v3603_v63 }
 0x29a   :  { %1746 = vrot.lane.b32.xlu0 %v1685_v16, %s2444_s12  ;;  %v1604_v21 = vsub.f32 %v1598_v11, %v1602_v20  ;;  %v1557_v19 = vsub.f32 %v1551_v54, %v1555_v31  ;;  %v1687_v57 = vmul.f32 %v3578_v39, %v1621_v9  ;;  %v1630_v38 = vmul.f32 %v3449_v4, %v3610_v14  ;;  %v2315_v39 = vld [vmem:[%s3803_s4 + $0x18] sm:$0xff]  }
 0x29b   :  { %1755 = vrot.lane.b32.xlu1 %v1692_v10, %s2447_s23  ;;  %v1721_v5 = vmul.f32 %v3631_v6, %v3676_v45  ;;  %v1664_v58 = vmul.f32 %v2222_v60, %v1596_v0  ;;  %v1670_v42 = vmul.f32 %v3397_v15, %v1596_v0  ;;  %v1632_v63 = vmul.f32 %v3390_v40, %v3411_v53 }
 0x29c   :  { %v1672_v14 = vmul.f32 %v2224_v61, %v1604_v21  ;;  %v1625_v9 = vmul.f32 %v3491_v28, %v1557_v19  ;;  %v1694_v32 = vmul.f32 %v3440_v13, %v1628_v1  ;;  %vm1509_vm14 = vcmp.ge.f32.partialorder %v3370_v22, 9.0  ;;  %2254 = vmatpush3.bf16.msra.mxu1 %v2315_v39 }
 0x29d   :  { %v1723_v15 = vsub.f32 %v3641_v51, %v1721_v5  ;;  %v1666_v33 = vsub.f32 %v1662_v37, %v1664_v58  ;;  %v1634_v2 = vsub.f32 %v1630_v38, %v1632_v63  ;;  %vm1511_vm15 = vcmp.lt.f32.partialorder %v3370_v22, 10.0 }
 0x29e   :  { %v1674_v53 = vsub.f32 %v1670_v42, %v1672_v14  ;;  %v1627_v3 = vsub.f32 %v1623_v27, %v1625_v9  ;;  %vm1513_vm0 = vmand %vm1509_vm14, %vm1511_vm15  ;;  %vm1517_vm12 = vcmp.ge.f32.partialorder %v3370_v22, 10.0  ;;  %vm1519_vm11 = vcmp.lt.f32.partialorder %v3370_v22, 11.0 }
 0x29f   :  { %v1725_v23 = vmul.f32 0.33333334, %v1723_v15  ;;  %v1668_v50 = vmul.f32 0.5, %v1666_v33  ;;  %v1636_v13 = vmul.f32 0.5, %v1634_v2  ;;  %v1515_v1 = vsel %vm1513_vm0, 1.0, %v2443_v8  ;;  %vm1521_vm2 = vmand %vm1517_vm12, %vm1519_vm11 }
 0x2a0   :  { %v1676_v51 = vmul.f32 0.5, %v1674_v53  ;;  %v1629_v24 = vmul.f32 0.5, %v1627_v3  ;;  %v1523_v12 = vsel %vm1521_vm2, 1.0, %v2443_v8  ;;  %v1591_v29 = vmul.f32 %v3505_v30, %v3634_v59 }
 0x2a1   :  { %1791 = vrot.lane.b32.xlu0 %v1725_v23, %s2447_s23  ;;  %v1728_v34 = vmul.f32 %v2222_v60, %v1668_v50  ;;  %v1734_v11 = vmul.f32 %v3394_v47, %v1668_v50  ;;  %v1696_v37 = vmul.f32 %v3390_v40, %v1636_v13  ;;  %v2223_v36 = vadd.f32 -10.0, %v3370_v22  ;;  %v2321_v50 = vld [vmem:[%s3803_s4] sm:$0xff]  }
 0x2a2   :  { %v1736_v26 = vmul.f32 %v2224_v61, %v1676_v51  ;;  %v1689_v41 = vmul.f32 %v3491_v28, %v1629_v24  ;;  %v1599_v16 = vmul.f32 %v3631_v6, %v1515_v1  ;;  %v2225_v20 = vadd.f32 -11.0, %v3370_v22  ;;  %v2316_v22 = vld [vmem:[%s3803_s4 + $0x50] sm:$0xff]  }
 0x2a3   :  { %v1730_v54 = vsub.f32 %v1726_v52, %v1728_v34  ;;  %v1595_v31 = vmul.f32 %v2223_v36, %v1515_v1  ;;  %v1698_v0 = vsub.f32 %v1694_v32, %v1696_v37  ;;  %v1663_v40 = vmul.f32 %v3502_v18, %v3646_v17  ;;  %v2317_v52 = vld [vmem:[%s3803_s4 + $0x10] sm:$0xff]   ;;  %2255 = vmatprep.subr.bf16.mxu1 %v2316_v22 }
 0x2a4   :  { %v1738_v10 = vsub.f32 %v1734_v11, %v1736_v26  ;;  %v1691_v59 = vsub.f32 %v1687_v57, %v1689_v41  ;;  %v1603_v27 = vmul.f32 %v2225_v20, %v1523_v12  ;;  %v1631_v38 = vmul.f32 %v3587_v55, %v1557_v19  ;;  %2256 = vmatpush3.bf16.msra.mxu1 %v2317_v52 }
 0x2a5   :  { %v1732_v60 = vmul.f32 0.33333334, %v1730_v54  ;;  %v1597_v21 = vsub.f32 %v1591_v29, %v1595_v31  ;;  %v1633_v6 = vmul.f32 %v3494_v35, %v3517_v43  ;;  %v1702_v19 = vmul.f32 %v3449_v4, %v1636_v13 }
 0x2a6   :  { %v1740_v61 = vmul.f32 0.33333334, %v1738_v10  ;;  %v1693_v5 = vmul.f32 0.33333334, %v1691_v59  ;;  %v1605_v28 = vsub.f32 %v1599_v16, %v1603_v27  ;;  %vm3812_vm13 = vcmask 261120  }
 0x2a7   :  { %1799 = vrot.lane.b32.xlu1 %v1732_v60, %s2449_s27  ;;  %v1665_v57 = vmul.f32 %v2223_v36, %v1597_v21  ;;  %v1671_v17 = vmul.f32 %v3505_v30, %v1597_v21  ;;  %v1635_v58 = vsub.f32 %v1631_v38, %v1633_v6  ;;  %v1704_v42 = vmul.f32 %v3394_v47, %v3454_v62  ;;  %vm3813_vm1 = vmmov %vm3812_vm13  ;;  %v2318_v47 = vld [vmem:[%s3803_s4 + $0x48] sm:$0xff]  }
 0x2a8   :  { %1807 = vst.msk [vmem:[#allocation3 + $0x10] sm:$0xff] %vm3812_vm13, %v1740_v61  ;;  %1757 = vrot.lane.b32.xlu0 %v1693_v5, %s2447_s23  ;;  %v1673_v43 = vmul.f32 %v2225_v20, %v1605_v28  ;;  %v1428_v63 = vmul.f32 %v3529_v44, %v3356_v46  ;;  %v1700_v49 = vmul.f32 0.33333334, %v1698_v0  ;;  %v1429_v14 = vmul.f32 %v3546_v48, %v3358_v25  ;;  %v2319_v46 = vld [vmem:[%s3803_s4 + $0x8] sm:$0xff]   ;;  %vm3814_vm3 = vmmov %vm3813_vm1  ;;  %v2320_v44 = vld [vmem:[%s3803_s4 + $0x40] sm:$0xff]  }
 0x2a9   :  { %v1667_v39 = vsub.f32 %v1663_v40, %v1665_v57  ;;  %v1637_v4 = vmul.f32 0.5, %v1635_v58  ;;  %v1706_v9 = vsub.f32 %v1702_v19, %v1704_v42  ;;  %v1705_v32 = vmul.f32 %v3502_v18, %v3567_v56  ;;  %2257 = vmatprep.subr.bf16.mxu1 %v2318_v47  ;;  %vm3815_vm4 = vmmov %vm3813_vm1  ;;  %v2322_v60 = vld [vmem:[%s3803_s4 + $0x88] sm:$0xff]   ;;  %v2323_v40 = vld [vmem:[%s3803_s4 + $0x80] sm:$0xff]  }
 0x2aa   :  { %v1675_v30 = vsub.f32 %v1671_v17, %v1673_v43  ;;  %1430 = vst.msk [vmem:[#allocation3] sm:$0xff] %vm3813_vm1, %v1428_v63  ;;  %v1727_v62 = vmul.f32 %v3494_v35, %v3676_v45  ;;  %v1695_v53 = vmul.f32 %v3575_v7, %v1629_v24  ;;  %2258 = vmatpush3.bf16.msra.mxu1 %v2319_v46  ;;  %vm3816_vm5 = vmmov %vm3813_vm1  ;;  %vm1750_vm7 = vcmask 523520  }
 0x2ab   :  { %1766 = vrot.lane.b32.xlu1 %v1700_v49, %s2449_s27  ;;  %v1669_v25 = vmul.f32 0.5, %v1667_v39  ;;  %1431 = vst.msk [vmem:[#allocation3 + $0x18] sm:$0xff] %vm3814_vm3, %v1429_v14  ;;  %v1708_v56 = vmul.f32 0.33333334, %v1706_v9  ;;  %v1703_v15 = vmul.f32 %v3587_v55, %v1637_v4  ;;  %v1697_v3 = vmul.f32 %v3494_v35, %v1637_v4  ;;  %2259 = vmatprep.subr.bf16.mxu1 %v2320_v44  ;;  %vm3817_vm6 = vmmov %vm3813_vm1 }
 0x2ac   :  { %v1677_v48 = vmul.f32 0.5, %v1675_v30  ;;  %vm1761_vm8 = vcmask 785920   ;;  %vm1772_vm9 = vcmask 1048320   ;;  %vm2451_vm10 = vmmov 0   ;;  %vm3818_vm14 = vmmov %vm3813_vm1 }
 0x2ad   :  { %v1729_v33 = vmul.f32 %v2223_v36, %v1669_v25  ;;  %v1735_v2 = vmul.f32 %v3502_v18, %v1669_v25  ;;  %1775 = vst.msk [vmem:[#allocation3 + $0x8] sm:$0xff] %vm3815_vm4, %v1708_v56  ;;  %v1707_v45 = vsub.f32 %v1703_v15, %v1705_v32  ;;  %v1699_v12 = vsub.f32 %v1695_v53, %v1697_v3 }
 0x2ae   :  { %v1737_v23 = vmul.f32 %v2225_v20, %v1677_v48  ;;  %2260 = vmatpush3.bf16.msra.mxu1 %v2321_v50 }
 0x2af   :  { %v1731_v13 = vsub.f32 %v1727_v62, %v1729_v33  ;;  %v1709_v1 = vmul.f32 0.33333334, %v1707_v45  ;;  %2270 = vmatprep.subr.bf16.mxu1 %v2443_v8  ;;  %v1701_v35 = vmul.f32 0.33333334, %v1699_v12  ;;  %v1811_v61 = vld [vmem:[#allocation3 + $0x10] sm:$0xff] }
 0x2b0   :  { %v1739_v55 = vsub.f32 %v1735_v2, %v1737_v23 }
 0x2b1   :  { %v1733_v51 = vmul.f32 0.33333334, %v1731_v13  ;;  %1776 = vst.msk [vmem:[#allocation3 + $0x20] sm:$0xff] %vm3816_vm5, %v1709_v1 }
 0x2b2   :  { %v1741_v18 = vmul.f32 0.33333334, %v1739_v55 }
 0x2b3   :  { %1801 = vrot.lane.b32.xlu0 %v1733_v51, %s2449_s27 }
 0x2b4   :  { %1808 = vst.msk [vmem:[#allocation3 + $0x28] sm:$0xff] %vm3817_vm6, %v1741_v18 }
 0x2b7   :  { %1768 = vrot.lane.b32.xlu0 %v1701_v35, %s2449_s27 }
 0x2bb   :  { %v1814_v38 = vld [vmem:[#allocation3 + $0x28] sm:$0xff] }
 0x2bc   :  { %v1817_v5 = vpack.c.bf16 %v1814_v38, %v1811_v61 }
 0x2ee   :  { %v1780_v7 = vpop.permute.xlu1 %1779 }
 0x2ef   :  { %1785 = vst.msk [vmem:[#allocation3 + $0x8] sm:$0xff] %vm1750_vm7, %v1780_v7 }
 0x2f6   :  { %v1745_v24 = vpop.permute.xlu1 %1744 }
 0x2f7   :  { %1751 = vst.msk [vmem:[#allocation3] sm:$0xff] %vm1750_vm7, %v1745_v24 }
 0x300   :  { %v1782_v29 = vpop.permute.xlu0 %1781 }
 0x301   :  { %1786 = vst.msk [vmem:[#allocation3 + $0x20] sm:$0xff] %vm1750_vm7, %v1782_v29 }
 0x305   :  { %v1790_v34 = vpop.permute.xlu1 %1789 }
 0x306   :  { %1795 = vst.msk [vmem:[#allocation3 + $0x8] sm:$0xff] %vm1761_vm8, %v1790_v34 }
 0x30c   :  { %v1747_v11 = vpop.permute.xlu0 %1746 }
 0x30d   :  { %1752 = vst.msk [vmem:[#allocation3 + $0x18] sm:$0xff] %vm1750_vm7, %v1747_v11  ;;  %v1756_v37 = vpop.permute.xlu1 %1755 }
 0x30e   :  { %1762 = vst.msk [vmem:[#allocation3] sm:$0xff] %vm1761_vm8, %v1756_v37 }
 0x313   :  { %v1792_v36 = vpop.permute.xlu0 %1791 }
 0x314   :  { %1796 = vst.msk [vmem:[#allocation3 + $0x20] sm:$0xff] %vm1761_vm8, %v1792_v36 }
 0x319   :  { %v1800_v26 = vpop.permute.xlu1 %1799 }
 0x31a   :  { %1805 = vst.msk [vmem:[#allocation3 + $0x8] sm:$0xff] %vm1772_vm9, %v1800_v26  ;;  %v1758_v41 = vpop.permute.xlu0 %1757 }
 0x31b   :  { %1763 = vst.msk [vmem:[#allocation3 + $0x18] sm:$0xff] %vm1761_vm8, %v1758_v41 }
 0x31d   :  { %v1767_v16 = vpop.permute.xlu1 %1766 }
 0x31e   :  { %1773 = vst.msk [vmem:[#allocation3] sm:$0xff] %vm1772_vm9, %v1767_v16 }
 0x321   :  { %v1810_v31 = vld [vmem:[#allocation3 + $0x8] sm:$0xff] }
 0x325   :  { %v1802_v20 = vpop.permute.xlu0 %1801  ;;  %v1809_v0 = vld [vmem:[#allocation3] sm:$0xff] }
 0x326   :  { %1806 = vst.msk [vmem:[#allocation3 + $0x20] sm:$0xff] %vm1772_vm9, %v1802_v20 }
 0x329   :  { %v1769_v54 = vpop.permute.xlu0 %1768 }
 0x32a   :  { %1774 = vst.msk [vmem:[#allocation3 + $0x18] sm:$0xff] %vm1772_vm9, %v1769_v54 }
 0x32d   :  { %v1813_v10 = vld [vmem:[#allocation3 + $0x20] sm:$0xff] }
 0x32e   :  { %v1816_v59 = vpack.c.bf16 %v1813_v10, %v1810_v31 }
 0x330   :  { %1997 = vmatprep.mubr.bf16.mxu1 %v1816_v59 }
 0x331   :  { %v1812_v27 = vld [vmem:[#allocation3 + $0x18] sm:$0xff] }
 0x332   :  { %v1815_v21 = vpack.c.bf16 %v1812_v27, %v1809_v0 }
 0x334   :  { %1998 = vmatmul.mubr.bf16.vlgmr.msra.gmra.mxu1 %v1815_v21 }
 0x335   :  { %2271 = vmatpush3.bf16.msra.mxu1 %v2322_v60  ;;  %2274 = vmatprep.mubr.msk.bf16.mxu1 %vm2451_vm10, %v2443_v8 }
 0x336   :  { %2272 = vmatprep.subr.bf16.mxu1 %v2443_v8 }
 0x339   :  { %2273 = vmatpush3.bf16.msra.mxu1 %v2323_v40 }
 0x33c   :  { %2275 = vmatmul.mubr.msk.bf16.vlgmr.msra.gmra.mxu1 %vm3818_vm14, %v1817_v5 }
 0x33d   :  { %2367 = shalt.err (!%p2364_p4)
}
 0x33e   :  { %s2454_s4 = smov 1   ;;  %s2376_s21 = scalar_lea.vmem %s2055_s18, 256 }
 0x33f   :  { %2072 = dma.vmem_to_hbm [thread:$0]  %s2067_s16, 32, %s3805_s6, [#allocation7], %s2445_s15, %s2445_s15, %s2454_s4  }
 0x340   :  { %p2377_p5 = scmp.ne.s32.totalorder %s2055_s18, %s2376_s21  ;;  %p2381_p6 = scmp.lt.s32.totalorder %s2055_s18, %s2055_s18 }
 0x341   :  { %p2382_p7 = scmp.lt.s32.totalorder %s2376_s21, %s2376_s21 }
 0x343   :  { %p2383_p8 = por %p2382_p7, %p2381_p6 }
 0x345   :  { %p2384_p9 = pnand %p2383_p8, %p2377_p5 }
 0x347   :  { %2387 = shalt.err (!%p2384_p9)
}
 0x348   :  { %s2455_s22 = smov 128   ;;  %s2456_s24 = smov 8  }
 0x349   :  { %2060 = dma.vmem_to_hbm [thread:$0]  %s2055_s18, 256, %s3804_s5, [#allocation5], %s2455_s22, %s2455_s22, %s2456_s24  }
 0x34a   :  { %s2457_s3 = smov [#allocation8]  }
 0x34b   :  { %s2078_s23 = sshll.u32 %s2457_s3, 4  ;;  %s2079_s23 = int_to_ptr.vmem [resolvable:$true] %s2078_s23 }
 0x34c   :  { %s2396_s6 = scalar_lea.vmem %s2079_s23, 256  ;;  %p2401_p11 = scmp.lt.s32.totalorder %s2079_s23, %s2079_s23 }
 0x34d   :  { %p2397_p10 = scmp.ne.s32.totalorder %s2079_s23, %s2396_s6  ;;  %p2402_p12 = scmp.lt.s32.totalorder %s2396_s6, %s2396_s6 }
 0x34f   :  { %p2403_p13 = por %p2402_p12, %p2401_p11 }
 0x351   :  { %p2404_p0 = pnand %p2403_p13, %p2397_p10 }
 0x353   :  { %2407 = shalt.err (!%p2404_p0)
}
 0x354   :  { %2084 = dma.vmem_to_hbm [thread:$0]  %s2079_s23, 256, %s3806_s7, [#allocation7], %s2455_s22, %s2455_s22, %s2456_s24   ;;  %vm3819_vm15 = vcmask 130048  }
 0x355   :  { %s2458_s5 = smov [#allocation9]   ;;  %vm3820_vm0 = vmmov %vm3819_vm15 }
 0x356   :  { %s2090_s29 = sshll.u32 %s2458_s5, 4  ;;  %s2091_s29 = int_to_ptr.vmem [resolvable:$true] %s2090_s29 }
 0x357   :  { %s2416_s7 = scalar_lea.vmem %s2091_s29, 256  ;;  %p2421_p2 = scmp.lt.s32.totalorder %s2091_s29, %s2091_s29 }
 0x358   :  { %p2417_p1 = scmp.ne.s32.totalorder %s2091_s29, %s2416_s7  ;;  %p2422_p3 = scmp.lt.s32.totalorder %s2416_s7, %s2416_s7 }
 0x35a   :  { %p2423_p4 = por %p2422_p3, %p2421_p2 }
 0x35c   :  { %p2424_p5 = pnand %p2423_p4, %p2417_p1 }
 0x3f4   :  { %v2261_v8 = vpop.f32.mrf.mxu1 }
 0x3f6   :  { %v2262_v28 = vpop.f32.mrf.mxu1 }
 0x3f7   :  { %v2263_v52 = vadd.f32 %v2262_v28, %v2261_v8 }
 0x3f8   :  { %v2264_v6 = vpop.f32.mrf.mxu1 }
 0x3fa   :  { %v2265_v22 = vpop.f32.mrf.mxu1 }
 0x3fb   :  { %v2266_v43 = vadd.f32 %v2265_v22, %v2264_v6 }
 0x3fc   :  { %v2040_v57 = vpop.f32.mrf.mxu1 }
 0x3fd   :  { %v2041_v17 = vadd.f32 %v2263_v52, %v2040_v57 }
 0x3fe   :  { %v2276_v19 = vpop.f32.mrf.mxu1 }
 0x3ff   :  { %2047 = vst.msk [vmem:[#allocation9] sm:$0xff] %vm3819_vm15, %v2041_v17 }
 0x400   :  { %v2043_v58 = vpop.f32.mrf.mxu1 }
 0x401   :  { %v2044_v42 = vadd.f32 %v2266_v43, %v2043_v58 }
 0x402   :  { %v2277_v63 = vpop.f32.mrf.mxu1 }
 0x403   :  { %2048 = vst.msk [vmem:[#allocation9 + $0x8] sm:$0xff] %vm3820_vm0, %v2044_v42 }
 0x404   :  { %2427 = shalt.err (!%p2424_p5)
}
 0x405   :  { %2096 = dma.vmem_to_hbm [thread:$0]  %s2091_s29, 256, %s3807_s8, [#allocation10], %s2455_s22, %s2455_s22, %s2456_s24  }
 0x406   :  { %2436 = dma.done.wait [#allocation5], 256  }
 0x407   :  { %2437 = vsyncadd [#allocation5], 4294967040 }
 0x408   :  { %2438 = dma.done.wait [#allocation7], 288  }
 0x409   :  { %2439 = vsyncadd [#allocation7], 4294967008 }
 0x40a   :  { %2440 = dma.done.wait [#allocation10], 256  }
 0x40b   :  { %2441 = vsyncadd [#allocation10], 4294967040 }
 0x40c   :  { %2109 = vsyncpa [#allocation5], 1 }
 0x40d   :  { %2110 = vsyncpa [#allocation7], 1 }
 0x40e   :  { %2111 = vsyncpa [#allocation10], 1 }

</bundles_post_ra>
